<compile_context>
chip_gen: v5e
topology: v5e:2x2
jax: 0.10.0
libtpu: 0.0.40
codegen_flags: <defaults>
</compile_context>

<pallas_src>
import functools

import jax
import jax.numpy as jnp
from jax import lax
from jax.experimental import pallas as pl
from jax.experimental.pallas import tpu as pltpu


# ----------------------------------------------------------------------------
# Batched input projection:  gx = x2d @ W_ih_packed + b_x   (one big GEMM)
# ----------------------------------------------------------------------------
def _proj_kernel(x_ref, w_ref, b_ref, o_ref):
    o_ref[...] = (jnp.dot(x_ref[...], w_ref[...],
                          preferred_element_type=jnp.float32)
                  + b_ref[...]).astype(o_ref.dtype)


def input_projection(x2d, w_ih, b_x, *, row_block=256):
    """x2d: (T*B, in) -> (T*B, 3*Hp)."""
    R, I = x2d.shape
    H3 = w_ih.shape[1]
    rb = row_block if (R % row_block == 0) else R
    return pl.pallas_call(
        _proj_kernel,
        out_shape=jax.ShapeDtypeStruct((R, H3), jnp.float32),
        grid_spec=pltpu.PrefetchScalarGridSpec(
            num_scalar_prefetch=0,
            grid=(R // rb,),
            in_specs=[
                pl.BlockSpec((rb, I), lambda r: (r, 0)),
                pl.BlockSpec((I, H3), lambda r: (0, 0)),
                pl.BlockSpec((1, H3), lambda r: (0, 0)),
            ],
            out_specs=pl.BlockSpec((rb, H3), lambda r: (r, 0)),
        ),
        compiler_params=pltpu.CompilerParams(dimension_semantics=("parallel",)),
    )(x2d, w_ih, b_x)


# ----------------------------------------------------------------------------
# GRU recurrence over a chunk of TC time steps (hidden state in VMEM scratch)
# ----------------------------------------------------------------------------
def _gru_chunk(gx_ref, w_hh, b_hn, h0, hidden, out_ref=None):
    """Run gx_ref.shape[0] recurrent steps starting from h0; returns final h.
    If out_ref is given, store every step's hidden state into it."""
    H = hidden

    def step(i, h):
        gx = gx_ref[i]                                           # (bb, 3H) precomputed
        gh = jnp.dot(h, w_hh, preferred_element_type=jnp.float32)  # single fused matmul
        r = jax.nn.sigmoid(gx[:, :H] + gh[:, :H])
        z = jax.nn.sigmoid(gx[:, H:2 * H] + gh[:, H:2 * H])
        n = jnp.tanh(gx[:, 2 * H:] + r * (gh[:, 2 * H:] + b_hn))
        h_new = (1.0 - z) * n + z * h
        if out_ref is not None:
            out_ref[i] = h_new.astype(out_ref.dtype)
        return h_new

    return lax.fori_loop(0, gx_ref.shape[0], step, h0, unroll=True)


def gru_seq_kernel(gx_ref, w_hh_ref, bhn_ref, out_ref, h_ref, *, hidden):
    c = pl.program_id(1)

    @pl.when(c == 0)
    def _():
        h_ref[...] = jnp.zeros_like(h_ref)

    h = _gru_chunk(gx_ref, w_hh_ref[...], bhn_ref[...], h_ref[...], hidden,
                   out_ref=out_ref)
    h_ref[...] = h


def gru_head_kernel(gx_ref, w_hh_ref, bhn_ref, fcw_ref, fcb_ref, out_ref, h_ref,
                    *, hidden):
    c = pl.program_id(1)

    @pl.when(c == 0)
    def _():
        h_ref[...] = jnp.zeros_like(h_ref)

    h = _gru_chunk(gx_ref, w_hh_ref[...], bhn_ref[...], h_ref[...], hidden)
    h_ref[...] = h

    # Only the last hidden state is needed: fuse the fc layer, write logits once.
    @pl.when(c == pl.num_programs(1) - 1)
    def _():
        out_ref[...] = (jnp.dot(h, fcw_ref[...], preferred_element_type=jnp.float32)
                        + fcb_ref[...]).astype(out_ref.dtype)


def _layer_grid(T, B, time_block, batch_block):
    tc = T if time_block is None else time_block
    bb = B if batch_block is None else batch_block
    assert T % tc == 0 and B % bb == 0
    return tc, bb, (B // bb, T // tc)


def gru_layer_seq(gx, w_hh, b_hn, *, time_block=None, batch_block=None):
    """gx: (T, B, 3Hp) precomputed gate slab -> full hidden sequence (T, B, Hp)."""
    T, B, H3 = gx.shape
    Hp = w_hh.shape[0]
    tc, bb, grid = _layer_grid(T, B, time_block, batch_block)
    return pl.pallas_call(
        functools.partial(gru_seq_kernel, hidden=Hp),
        out_shape=jax.ShapeDtypeStruct((T, B, Hp), jnp.float32),
        grid_spec=pltpu.PrefetchScalarGridSpec(
            num_scalar_prefetch=0,
            grid=grid,
            in_specs=[
                pl.BlockSpec((tc, bb, H3), lambda b, c: (c, b, 0)),
                pl.BlockSpec((Hp, H3), lambda b, c: (0, 0)),
                pl.BlockSpec((1, Hp), lambda b, c: (0, 0)),
            ],
            out_specs=pl.BlockSpec((tc, bb, Hp), lambda b, c: (c, b, 0)),
            scratch_shapes=[pltpu.VMEM((bb, Hp), jnp.float32)],
        ),
        compiler_params=pltpu.CompilerParams(
            dimension_semantics=("parallel", "arbitrary")),
    )(gx, w_hh, b_hn)


def gru_layer_head(gx, w_hh, b_hn, fc_w_t, fc_b, *, time_block=None,
                   batch_block=None):
    """Last GRU layer fused with the fc head: gx (T,B,3Hp) -> logits (B, C)."""
    T, B, H3 = gx.shape
    Hp = w_hh.shape[0]
    C = fc_w_t.shape[1]
    tc, bb, grid = _layer_grid(T, B, time_block, batch_block)
    return pl.pallas_call(
        functools.partial(gru_head_kernel, hidden=Hp),
        out_shape=jax.ShapeDtypeStruct((B, C), jnp.float32),
        grid_spec=pltpu.PrefetchScalarGridSpec(
            num_scalar_prefetch=0,
            grid=grid,
            in_specs=[
                pl.BlockSpec((tc, bb, H3), lambda b, c: (c, b, 0)),
                pl.BlockSpec((Hp, H3), lambda b, c: (0, 0)),
                pl.BlockSpec((1, Hp), lambda b, c: (0, 0)),
                pl.BlockSpec((Hp, C), lambda b, c: (0, 0)),
                pl.BlockSpec((1, C), lambda b, c: (0, 0)),
            ],
            out_specs=pl.BlockSpec((bb, C), lambda b, c: (b, 0)),
            scratch_shapes=[pltpu.VMEM((bb, Hp), jnp.float32)],
        ),
        compiler_params=pltpu.CompilerParams(
            dimension_semantics=("parallel", "arbitrary")),
    )(gx, w_hh, b_hn, fc_w_t, fc_b)


# ----------------------------------------------------------------------------
# Parameter construction: PyTorch nn.GRU / nn.Linear layout + init law,
# then packed [r|z|n] along lanes and zero-padded to Hp (a multiple of 128).
# Zero padding is an exact no-op: padded weight rows/cols are 0.
# ----------------------------------------------------------------------------
def _pack_gru_weights(w_ih, w_hh, b_ih, b_hh, H, Hp, in_pad):
    def gate(x, g):
        return x[g * H:(g + 1) * H]

    w_ih_cols = []
    for g in range(3):
        wg = gate(w_ih, g).T                                  # (in, H)
        wg = jnp.pad(wg, ((0, in_pad - wg.shape[0]), (0, Hp - H)))
        w_ih_cols.append(wg)
    w_ih_p = jnp.concatenate(w_ih_cols, axis=1)               # (in_pad, 3Hp)

    w_hh_cols = []
    for g in range(3):
        wg = gate(w_hh, g).T                                  # (H, H)
        wg = jnp.pad(wg, ((0, Hp - H), (0, Hp - H)))
        w_hh_cols.append(wg)
    w_hh_p = jnp.concatenate(w_hh_cols, axis=1)               # (Hp, 3Hp)

    # x-side fused bias: [b_ih_r + b_hh_r | b_ih_z + b_hh_z | b_ih_n]
    bx_parts = [gate(b_ih, 0) + gate(b_hh, 0),
                gate(b_ih, 1) + gate(b_hh, 1),
                gate(b_ih, 2)]
    b_x = jnp.concatenate([jnp.pad(p, (0, Hp - H)) for p in bx_parts])[None, :]
    b_hn = jnp.pad(gate(b_hh, 2), (0, Hp - H))[None, :]       # stays inside r*(.)
    return dict(w_ih=w_ih_p, w_hh=w_hh_p, b_x=b_x, b_hn=b_hn)


def init_params(key, input_size, hidden_size, num_layers, num_classes,
                *, lane_pad=128):
    H = hidden_size
    Hp = H if not lane_pad else (-(-H // lane_pad)) * lane_pad
    k = 1.0 / float(H) ** 0.5
    torch_layers, layers = [], []
    for layer in range(num_layers):
        in_sz = input_size if layer == 0 else H
        in_pad = input_size if layer == 0 else Hp
        key, k1, k2, k3, k4 = jax.random.split(key, 5)
        w_ih = jax.random.uniform(k1, (3 * H, in_sz), jnp.float32, -k, k)
        w_hh = jax.random.uniform(k2, (3 * H, H), jnp.float32, -k, k)
        b_ih = jax.random.uniform(k3, (3 * H,), jnp.float32, -k, k)
        b_hh = jax.random.uniform(k4, (3 * H,), jnp.float32, -k, k)
        torch_layers.append(dict(w_ih=w_ih, w_hh=w_hh, b_ih=b_ih, b_hh=b_hh))
        layers.append(_pack_gru_weights(w_ih, w_hh, b_ih, b_hh, H, Hp, in_pad))
    key, k5, k6 = jax.random.split(key, 3)
    fc_w = jax.random.uniform(k5, (num_classes, H), jnp.float32, -k, k)
    fc_b = jax.random.uniform(k6, (num_classes,), jnp.float32, -k, k)
    return dict(
        layers=layers,
        fc_w_t=jnp.pad(fc_w.T, ((0, Hp - H), (0, 0))),        # (Hp, C)
        fc_b=fc_b[None, :],                                   # (1, C)
        torch=dict(layers=torch_layers, fc_w=fc_w, fc_b=fc_b),
    )


# ----------------------------------------------------------------------------
# Full forward pass
# ----------------------------------------------------------------------------
@jax.jit
def gru_forward(x, params):
    # x: (B, T, input_size), batch_first like the PyTorch module
    xs = jnp.transpose(x.astype(jnp.float32), (1, 0, 2))      # time-major (T, B, I)
    T, B, _ = xs.shape
    layers = params["layers"]
    n = len(layers)
    out = None
    for li, lp in enumerate(layers):
        in_sz = lp["w_ih"].shape[0]
        H3 = lp["w_ih"].shape[1]
        # hoisted input projection for ALL time steps: one GEMM (T*B, in)x(in, 3Hp)
        gx = input_projection(xs.reshape(T * B, in_sz), lp["w_ih"], lp["b_x"])
        gx = gx.reshape(T, B, H3)
        if li + 1 < n:
            xs = gru_layer_seq(gx, lp["w_hh"], lp["b_hn"])
        else:
            out = gru_layer_head(gx, lp["w_hh"], lp["b_hn"],
                                 params["fc_w_t"], params["fc_b"])
    return out


# ----------------------------------------------------------------------------
# Pure-JAX reference in the PyTorch nn.GRU formulation (unpacked, unpadded)
# ----------------------------------------------------------------------------
def gru_forward_ref(x, params):
    torch_p = params["torch"]
    H = torch_p["layers"][0]["w_hh"].shape[1]
    xs = jnp.transpose(x.astype(jnp.float32), (1, 0, 2))
    B = xs.shape[1]
    for lp in torch_p["layers"]:
        def step(h, x_t, lp=lp):
            gi = x_t @ lp["w_ih"].T + lp["b_ih"]
            gh = h @ lp["w_hh"].T + lp["b_hh"]
            r = jax.nn.sigmoid(gi[:, :H] + gh[:, :H])
            z = jax.nn.sigmoid(gi[:, H:2 * H] + gh[:, H:2 * H])
            n = jnp.tanh(gi[:, 2 * H:] + r * gh[:, 2 * H:])
            h_new = (1.0 - z) * n + z * h
            return h_new, h_new
        h0 = jnp.zeros((B, H), jnp.float32)
        _, xs = jax.lax.scan(step, h0, xs)
    return xs[-1] @ torch_p["fc_w"].T + torch_p["fc_b"]


if __name__ == "__main__":
    # small, module-consistent shapes
    batch, seq, input_size = 8, 8, 16
    hidden_size, num_layers, num_classes = 32, 2, 5

    key = jax.random.PRNGKey(0)
    key, kx, kp = jax.random.split(key, 3)
    x = jax.random.normal(kx, (batch, seq, input_size), jnp.float32)
    params = init_params(kp, input_size, hidden_size, num_layers, num_classes)

    out = jax.block_until_ready(gru_forward(x, params))
    ref = gru_forward_ref(x, params)

    assert out.shape == (batch, num_classes), out.shape
    assert jnp.allclose(out, ref, atol=1e-4, rtol=1e-3), (
        f"max abs err {jnp.max(jnp.abs(out - ref))}")

    print("KERNEL_OK")
</pallas_src>

<mosaic_0001>
module attributes {stable_mosaic.version = 11 : i64} {
  func.func @_proj_kernel(%arg0: i32, %arg1: memref<64x128xf32, #tpu.memory_space<vmem>>, %arg2: memref<128x384xf32, #tpu.memory_space<vmem>>, %arg3: memref<1x384xf32, #tpu.memory_space<vmem>>, %arg4: memref<64x384xf32, #tpu.memory_space<vmem>>) attributes {dimension_semantics = [#tpu.dimension_semantics<parallel>], iteration_bounds = array<i64: 1>, scalar_prefetch = 0 : i64, scratch_operands = 0 : i64, tpu.core_type = #tpu.core_type<tc>, window_params = [{transform_indices = @transform_0, window_bounds = array<i64: 64, 128>}, {pipeline_mode = #tpu.pipeline_mode<synchronous>, transform_indices = @transform_1, window_bounds = array<i64: 128, 384>}, {pipeline_mode = #tpu.pipeline_mode<synchronous>, transform_indices = @transform_2, window_bounds = array<i64: 1, 384>}, {transform_indices = @transform_3, window_bounds = array<i64: 64, 384>}]} {
    %c0 = arith.constant 0 : index
    %c0_0 = arith.constant 0 : index
    %0 = vector.load %arg1[%c0, %c0_0] : memref<64x128xf32, #tpu.memory_space<vmem>>, vector<64x128xf32>
    %c0_1 = arith.constant 0 : index
    %c0_2 = arith.constant 0 : index
    %1 = vector.load %arg2[%c0_1, %c0_2] : memref<128x384xf32, #tpu.memory_space<vmem>>, vector<128x384xf32>
    %cst = arith.constant dense<0.000000e+00> : vector<64x384xf32>
    %2 = tpu.matmul %0, %1, %cst {dimension_numbers = #tpu.dot_dimension_numbers<[1], [0], [0], [1], [0, 0, 1, 1], [], []>} : vector<64x128xf32>, vector<128x384xf32>, vector<64x384xf32> -> vector<64x384xf32>
    %c0_3 = arith.constant 0 : index
    %c0_4 = arith.constant 0 : index
    %3 = vector.load %arg3[%c0_3, %c0_4] : memref<1x384xf32, #tpu.memory_space<vmem>>, vector<1x384xf32>
    %4 = vector.broadcast %3 : vector<1x384xf32> to vector<64x384xf32>
    %5 = arith.addf %2, %4 : vector<64x384xf32>
    %c0_5 = arith.constant 0 : index
    %c0_6 = arith.constant 0 : index
    %6 = vector.load %arg4[%c0_5, %c0_6] : memref<64x384xf32, #tpu.memory_space<vmem>>, vector<64x384xf32>
    tpu.vector_store %arg4[%c0_5, %c0_6], %5 {strides = array<i32>} : memref<64x384xf32, #tpu.memory_space<vmem>>, vector<64x384xf32>,
    return
  }
  func.func @transform_0(%arg0: i32) -> (i32, i32) {
    %c0_i32 = arith.constant 0 : i32
    %c0_i32_0 = arith.constant 0 : i32
    return %arg0, %c0_i32 : i32, i32
  }
  func.func @transform_1(%arg0: i32) -> (i32, i32) {
    %c0_i32 = arith.constant 0 : i32
    %c0_i32_0 = arith.constant 0 : i32
    %c0_i32_1 = arith.constant 0 : i32
    return %c0_i32, %c0_i32_0 : i32, i32
  }
  func.func @transform_2(%arg0: i32) -> (i32, i32) {
    %c0_i32 = arith.constant 0 : i32
    %c0_i32_0 = arith.constant 0 : i32
    %c0_i32_1 = arith.constant 0 : i32
    return %c0_i32, %c0_i32_0 : i32, i32
  }
  func.func @transform_3(%arg0: i32) -> (i32, i32) {
    %c0_i32 = arith.constant 0 : i32
    %c0_i32_0 = arith.constant 0 : i32
    return %arg0, %c0_i32 : i32, i32
  }
}

module attributes {stable_mosaic.version = 11 : i64} {
  func.func @_proj_kernel(%arg0: i32, %arg1: memref<64x16xf32, #tpu.memory_space<vmem>>, %arg2: memref<16x384xf32, #tpu.memory_space<vmem>>, %arg3: memref<1x384xf32, #tpu.memory_space<vmem>>, %arg4: memref<64x384xf32, #tpu.memory_space<vmem>>) attributes {dimension_semantics = [#tpu.dimension_semantics<parallel>], iteration_bounds = array<i64: 1>, scalar_prefetch = 0 : i64, scratch_operands = 0 : i64, tpu.core_type = #tpu.core_type<tc>, window_params = [{transform_indices = @transform_0, window_bounds = array<i64: 64, 16>}, {pipeline_mode = #tpu.pipeline_mode<synchronous>, transform_indices = @transform_1, window_bounds = array<i64: 16, 384>}, {pipeline_mode = #tpu.pipeline_mode<synchronous>, transform_indices = @transform_2, window_bounds = array<i64: 1, 384>}, {transform_indices = @transform_3, window_bounds = array<i64: 64, 384>}]} {
    %c0 = arith.constant 0 : index
    %c0_0 = arith.constant 0 : index
    %0 = vector.load %arg1[%c0, %c0_0] : memref<64x16xf32, #tpu.memory_space<vmem>>, vector<64x16xf32>
    %c0_1 = arith.constant 0 : index
    %c0_2 = arith.constant 0 : index
    %1 = vector.load %arg2[%c0_1, %c0_2] : memref<16x384xf32, #tpu.memory_space<vmem>>, vector<16x384xf32>
    %cst = arith.constant dense<0.000000e+00> : vector<64x384xf32>
    %2 = tpu.matmul %0, %1, %cst {dimension_numbers = #tpu.dot_dimension_numbers<[1], [0], [0], [1], [0, 0, 1, 1], [], []>} : vector<64x16xf32>, vector<16x384xf32>, vector<64x384xf32> -> vector<64x384xf32>
    %c0_3 = arith.constant 0 : index
    %c0_4 = arith.constant 0 : index
    %3 = vector.load %arg3[%c0_3, %c0_4] : memref<1x384xf32, #tpu.memory_space<vmem>>, vector<1x384xf32>
    %4 = vector.broadcast %3 : vector<1x384xf32> to vector<64x384xf32>
    %5 = arith.addf %2, %4 : vector<64x384xf32>
    %c0_5 = arith.constant 0 : index
    %c0_6 = arith.constant 0 : index
    %6 = vector.load %arg4[%c0_5, %c0_6] : memref<64x384xf32, #tpu.memory_space<vmem>>, vector<64x384xf32>
    tpu.vector_store %arg4[%c0_5, %c0_6], %5 {strides = array<i32>} : memref<64x384xf32, #tpu.memory_space<vmem>>, vector<64x384xf32>,
    return
  }
  func.func @transform_0(%arg0: i32) -> (i32, i32) {
    %c0_i32 = arith.constant 0 : i32
    %c0_i32_0 = arith.constant 0 : i32
    return %arg0, %c0_i32 : i32, i32
  }
  func.func @transform_1(%arg0: i32) -> (i32, i32) {
    %c0_i32 = arith.constant 0 : i32
    %c0_i32_0 = arith.constant 0 : i32
    %c0_i32_1 = arith.constant 0 : i32
    return %c0_i32, %c0_i32_0 : i32, i32
  }
  func.func @transform_2(%arg0: i32) -> (i32, i32) {
    %c0_i32 = arith.constant 0 : i32
    %c0_i32_0 = arith.constant 0 : i32
    %c0_i32_1 = arith.constant 0 : i32
    return %c0_i32, %c0_i32_0 : i32, i32
  }
  func.func @transform_3(%arg0: i32) -> (i32, i32) {
    %c0_i32 = arith.constant 0 : i32
    %c0_i32_0 = arith.constant 0 : i32
    return %arg0, %c0_i32 : i32, i32
  }
}

module attributes {stable_mosaic.version = 11 : i64} {
  func.func @gru_seq_kernel(%arg0: i32, %arg1: i32, %arg2: memref<8x8x384xf32, #tpu.memory_space<vmem>>, %arg3: memref<128x384xf32, #tpu.memory_space<vmem>>, %arg4: memref<1x128xf32, #tpu.memory_space<vmem>>, %arg5: memref<8x8x128xf32, #tpu.memory_space<vmem>>, %arg6: memref<8x128xf32, #tpu.memory_space<vmem>>) attributes {dimension_semantics = [#tpu.dimension_semantics<parallel>, #tpu.dimension_semantics<arbitrary>], iteration_bounds = array<i64: 1, 1>, scalar_prefetch = 0 : i64, scratch_operands = 1 : i64, tpu.core_type = #tpu.core_type<tc>, window_params = [{transform_indices = @transform_0, window_bounds = array<i64: 8, 8, 384>}, {pipeline_mode = #tpu.pipeline_mode<synchronous>, transform_indices = @transform_1, window_bounds = array<i64: 128, 384>}, {pipeline_mode = #tpu.pipeline_mode<synchronous>, transform_indices = @transform_2, window_bounds = array<i64: 1, 128>}, {transform_indices = @transform_3, window_bounds = array<i64: 8, 8, 128>}]} {
    %c0_i32 = arith.constant 0 : i32
    %0 = arith.cmpi eq, %arg1, %c0_i32 : i32
    %1 = arith.extui %0 : i1 to i32
    %c0_i32_0 = arith.constant 0 : i32
    %2 = arith.cmpi ne, %1, %c0_i32_0 : i32
    scf.if %2 {
      %cst_72 = arith.constant 0.000000e+00 : f32
      %295 = vector.broadcast %cst_72 : f32 to vector<8x128xf32>
      %c0_73 = arith.constant 0 : index
      %c0_74 = arith.constant 0 : index
      %296 = vector.load %arg6[%c0_73, %c0_74] : memref<8x128xf32, #tpu.memory_space<vmem>>, vector<8x128xf32>
      tpu.vector_store %arg6[%c0_73, %c0_74], %295 {strides = array<i32>} : memref<8x128xf32, #tpu.memory_space<vmem>>, vector<8x128xf32>,
    } else {
    }
    %c0 = arith.constant 0 : index
    %c0_1 = arith.constant 0 : index
    %3 = vector.load %arg3[%c0, %c0_1] : memref<128x384xf32, #tpu.memory_space<vmem>>, vector<128x384xf32>
    %c0_2 = arith.constant 0 : index
    %c0_3 = arith.constant 0 : index
    %4 = vector.load %arg4[%c0_2, %c0_3] : memref<1x128xf32, #tpu.memory_space<vmem>>, vector<1x128xf32>
    %c0_4 = arith.constant 0 : index
    %c0_5 = arith.constant 0 : index
    %5 = vector.load %arg6[%c0_4, %c0_5] : memref<8x128xf32, #tpu.memory_space<vmem>>, vector<8x128xf32>
    %c0_i32_6 = arith.constant 0 : i32
    %6 = arith.index_cast %c0_i32_6 : i32 to index
    %c0_7 = arith.constant 0 : index
    %c0_8 = arith.constant 0 : index
    %7 = vector.load %arg2[%6, %c0_7, %c0_8] : memref<8x8x384xf32, #tpu.memory_space<vmem>>, vector<1x8x384xf32>
    %8 = vector.shape_cast %7 : vector<1x8x384xf32> to vector<8x384xf32>
    %cst = arith.constant dense<0.000000e+00> : vector<8x384xf32>
    %9 = tpu.matmul %5, %3, %cst {dimension_numbers = #tpu.dot_dimension_numbers<[1], [0], [0], [1], [0, 0, 1, 1], [], []>} : vector<8x128xf32>, vector<128x384xf32>, vector<8x384xf32> -> vector<8x384xf32>
    %10 = vector.extract_strided_slice %8 {offsets = [0, 0], sizes = [8, 128], strides = [1, 1]} : vector<8x384xf32> to vector<8x128xf32>
    %11 = vector.extract_strided_slice %9 {offsets = [0, 0], sizes = [8, 128], strides = [1, 1]} : vector<8x384xf32> to vector<8x128xf32>
    %12 = arith.addf %10, %11 : vector<8x128xf32>
    %13 = arith.negf %12 : vector<8x128xf32>
    %14 = math.exp %13 : vector<8x128xf32>
    %cst_9 = arith.constant 1.000000e+00 : f32
    %15 = vector.broadcast %cst_9 : f32 to vector<8x128xf32>
    %16 = arith.addf %15, %14 : vector<8x128xf32>
    %17 = arith.divf %15, %16 : vector<8x128xf32>
    %18 = vector.extract_strided_slice %8 {offsets = [0, 128], sizes = [8, 128], strides = [1, 1]} : vector<8x384xf32> to vector<8x128xf32>
    %19 = vector.extract_strided_slice %9 {offsets = [0, 128], sizes = [8, 128], strides = [1, 1]} : vector<8x384xf32> to vector<8x128xf32>
    %20 = arith.addf %18, %19 : vector<8x128xf32>
    %21 = arith.negf %20 : vector<8x128xf32>
    %22 = math.exp %21 : vector<8x128xf32>
    %cst_10 = arith.constant 1.000000e+00 : f32
    %23 = vector.broadcast %cst_10 : f32 to vector<8x128xf32>
    %24 = arith.addf %23, %22 : vector<8x128xf32>
    %25 = arith.divf %23, %24 : vector<8x128xf32>
    %26 = vector.extract_strided_slice %8 {offsets = [0, 256], sizes = [8, 128], strides = [1, 1]} : vector<8x384xf32> to vector<8x128xf32>
    %27 = vector.extract_strided_slice %9 {offsets = [0, 256], sizes = [8, 128], strides = [1, 1]} : vector<8x384xf32> to vector<8x128xf32>
    %28 = vector.broadcast %4 : vector<1x128xf32> to vector<8x128xf32>
    %29 = arith.addf %27, %28 : vector<8x128xf32>
    %30 = arith.mulf %17, %29 : vector<8x128xf32>
    %31 = arith.addf %26, %30 : vector<8x128xf32>
    %32 = math.tanh %31 : vector<8x128xf32>
    %cst_11 = arith.constant 1.000000e+00 : f32
    %33 = vector.broadcast %cst_11 : f32 to vector<8x128xf32>
    %34 = arith.subf %33, %25 : vector<8x128xf32>
    %35 = arith.mulf %34, %32 : vector<8x128xf32>
    %36 = arith.mulf %25, %5 : vector<8x128xf32>
    %37 = arith.addf %35, %36 : vector<8x128xf32>
    %38 = arith.index_cast %c0_i32_6 : i32 to index
    %c0_12 = arith.constant 0 : index
    %c0_13 = arith.constant 0 : index
    %39 = vector.load %arg5[%38, %c0_12, %c0_13] : memref<8x8x128xf32, #tpu.memory_space<vmem>>, vector<1x8x128xf32>
    %40 = vector.shape_cast %39 : vector<1x8x128xf32> to vector<8x128xf32>
    %41 = vector.shape_cast %37 : vector<8x128xf32> to vector<1x8x128xf32>
    tpu.vector_store %arg5[%38, %c0_12, %c0_13], %41 {strides = array<i32>} : memref<8x8x128xf32, #tpu.memory_space<vmem>>, vector<1x8x128xf32>,
    %c1_i32 = arith.constant 1 : i32
    %42 = arith.index_cast %c1_i32 : i32 to index
    %c0_14 = arith.constant 0 : index
    %c0_15 = arith.constant 0 : index
    %43 = vector.load %arg2[%42, %c0_14, %c0_15] : memref<8x8x384xf32, #tpu.memory_space<vmem>>, vector<1x8x384xf32>
    %44 = vector.shape_cast %43 : vector<1x8x384xf32> to vector<8x384xf32>
    %cst_16 = arith.constant dense<0.000000e+00> : vector<8x384xf32>
    %45 = tpu.matmul %37, %3, %cst_16 {dimension_numbers = #tpu.dot_dimension_numbers<[1], [0], [0], [1], [0, 0, 1, 1], [], []>} : vector<8x128xf32>, vector<128x384xf32>, vector<8x384xf32> -> vector<8x384xf32>
    %46 = vector.extract_strided_slice %44 {offsets = [0, 0], sizes = [8, 128], strides = [1, 1]} : vector<8x384xf32> to vector<8x128xf32>
    %47 = vector.extract_strided_slice %45 {offsets = [0, 0], sizes = [8, 128], strides = [1, 1]} : vector<8x384xf32> to vector<8x128xf32>
    %48 = arith.addf %46, %47 : vector<8x128xf32>
    %49 = arith.negf %48 : vector<8x128xf32>
    %50 = math.exp %49 : vector<8x128xf32>
    %cst_17 = arith.constant 1.000000e+00 : f32
    %51 = vector.broadcast %cst_17 : f32 to vector<8x128xf32>
    %52 = arith.addf %51, %50 : vector<8x128xf32>
    %53 = arith.divf %51, %52 : vector<8x128xf32>
    %54 = vector.extract_strided_slice %44 {offsets = [0, 128], sizes = [8, 128], strides = [1, 1]} : vector<8x384xf32> to vector<8x128xf32>
    %55 = vector.extract_strided_slice %45 {offsets = [0, 128], sizes = [8, 128], strides = [1, 1]} : vector<8x384xf32> to vector<8x128xf32>
    %56 = arith.addf %54, %55 : vector<8x128xf32>
    %57 = arith.negf %56 : vector<8x128xf32>
    %58 = math.exp %57 : vector<8x128xf32>
    %cst_18 = arith.constant 1.000000e+00 : f32
    %59 = vector.broadcast %cst_18 : f32 to vector<8x128xf32>
    %60 = arith.addf %59, %58 : vector<8x128xf32>
    %61 = arith.divf %59, %60 : vector<8x128xf32>
    %62 = vector.extract_strided_slice %44 {offsets = [0, 256], sizes = [8, 128], strides = [1, 1]} : vector<8x384xf32> to vector<8x128xf32>
    %63 = vector.extract_strided_slice %45 {offsets = [0, 256], sizes = [8, 128], strides = [1, 1]} : vector<8x384xf32> to vector<8x128xf32>
    %64 = vector.broadcast %4 : vector<1x128xf32> to vector<8x128xf32>
    %65 = arith.addf %63, %64 : vector<8x128xf32>
    %66 = arith.mulf %53, %65 : vector<8x128xf32>
    %67 = arith.addf %62, %66 : vector<8x128xf32>
    %68 = math.tanh %67 : vector<8x128xf32>
    %cst_19 = arith.constant 1.000000e+00 : f32
    %69 = vector.broadcast %cst_19 : f32 to vector<8x128xf32>
    %70 = arith.subf %69, %61 : vector<8x128xf32>
    %71 = arith.mulf %70, %68 : vector<8x128xf32>
    %72 = arith.mulf %61, %37 : vector<8x128xf32>
    %73 = arith.addf %71, %72 : vector<8x128xf32>
    %74 = arith.index_cast %c1_i32 : i32 to index
    %c0_20 = arith.constant 0 : index
    %c0_21 = arith.constant 0 : index
    %75 = vector.load %arg5[%74, %c0_20, %c0_21] : memref<8x8x128xf32, #tpu.memory_space<vmem>>, vector<1x8x128xf32>
    %76 = vector.shape_cast %75 : vector<1x8x128xf32> to vector<8x128xf32>
    %77 = vector.shape_cast %73 : vector<8x128xf32> to vector<1x8x128xf32>
    tpu.vector_store %arg5[%74, %c0_20, %c0_21], %77 {strides = array<i32>} : memref<8x8x128xf32, #tpu.memory_space<vmem>>, vector<1x8x128xf32>,
    %c2_i32 = arith.constant 2 : i32
    %78 = arith.index_cast %c2_i32 : i32 to index
    %c0_22 = arith.constant 0 : index
    %c0_23 = arith.constant 0 : index
    %79 = vector.load %arg2[%78, %c0_22, %c0_23] : memref<8x8x384xf32, #tpu.memory_space<vmem>>, vector<1x8x384xf32>
    %80 = vector.shape_cast %79 : vector<1x8x384xf32> to vector<8x384xf32>
    %cst_24 = arith.constant dense<0.000000e+00> : vector<8x384xf32>
    %81 = tpu.matmul %73, %3, %cst_24 {dimension_numbers = #tpu.dot_dimension_numbers<[1], [0], [0], [1], [0, 0, 1, 1], [], []>} : vector<8x128xf32>, vector<128x384xf32>, vector<8x384xf32> -> vector<8x384xf32>
    %82 = vector.extract_strided_slice %80 {offsets = [0, 0], sizes = [8, 128], strides = [1, 1]} : vector<8x384xf32> to vector<8x128xf32>
    %83 = vector.extract_strided_slice %81 {offsets = [0, 0], sizes = [8, 128], strides = [1, 1]} : vector<8x384xf32> to vector<8x128xf32>
    %84 = arith.addf %82, %83 : vector<8x128xf32>
    %85 = arith.negf %84 : vector<8x128xf32>
    %86 = math.exp %85 : vector<8x128xf32>
    %cst_25 = arith.constant 1.000000e+00 : f32
    %87 = vector.broadcast %cst_25 : f32 to vector<8x128xf32>
    %88 = arith.addf %87, %86 : vector<8x128xf32>
    %89 = arith.divf %87, %88 : vector<8x128xf32>
    %90 = vector.extract_strided_slice %80 {offsets = [0, 128], sizes = [8, 128], strides = [1, 1]} : vector<8x384xf32> to vector<8x128xf32>
    %91 = vector.extract_strided_slice %81 {offsets = [0, 128], sizes = [8, 128], strides = [1, 1]} : vector<8x384xf32> to vector<8x128xf32>
    %92 = arith.addf %90, %91 : vector<8x128xf32>
    %93 = arith.negf %92 : vector<8x128xf32>
    %94 = math.exp %93 : vector<8x128xf32>
    %cst_26 = arith.constant 1.000000e+00 : f32
    %95 = vector.broadcast %cst_26 : f32 to vector<8x128xf32>
    %96 = arith.addf %95, %94 : vector<8x128xf32>
    %97 = arith.divf %95, %96 : vector<8x128xf32>
    %98 = vector.extract_strided_slice %80 {offsets = [0, 256], sizes = [8, 128], strides = [1, 1]} : vector<8x384xf32> to vector<8x128xf32>
    %99 = vector.extract_strided_slice %81 {offsets = [0, 256], sizes = [8, 128], strides = [1, 1]} : vector<8x384xf32> to vector<8x128xf32>
    %100 = vector.broadcast %4 : vector<1x128xf32> to vector<8x128xf32>
    %101 = arith.addf %99, %100 : vector<8x128xf32>
    %102 = arith.mulf %89, %101 : vector<8x128xf32>
    %103 = arith.addf %98, %102 : vector<8x128xf32>
    %104 = math.tanh %103 : vector<8x128xf32>
    %cst_27 = arith.constant 1.000000e+00 : f32
    %105 = vector.broadcast %cst_27 : f32 to vector<8x128xf32>
    %106 = arith.subf %105, %97 : vector<8x128xf32>
    %107 = arith.mulf %106, %104 : vector<8x128xf32>
    %108 = arith.mulf %97, %73 : vector<8x128xf32>
    %109 = arith.addf %107, %108 : vector<8x128xf32>
    %110 = arith.index_cast %c2_i32 : i32 to index
    %c0_28 = arith.constant 0 : index
    %c0_29 = arith.constant 0 : index
    %111 = vector.load %arg5[%110, %c0_28, %c0_29] : memref<8x8x128xf32, #tpu.memory_space<vmem>>, vector<1x8x128xf32>
    %112 = vector.shape_cast %111 : vector<1x8x128xf32> to vector<8x128xf32>
    %113 = vector.shape_cast %109 : vector<8x128xf32> to vector<1x8x128xf32>
    tpu.vector_store %arg5[%110, %c0_28, %c0_29], %113 {strides = array<i32>} : memref<8x8x128xf32, #tpu.memory_space<vmem>>, vector<1x8x128xf32>,
    %c3_i32 = arith.constant 3 : i32
    %114 = arith.index_cast %c3_i32 : i32 to index
    %c0_30 = arith.constant 0 : index
    %c0_31 = arith.constant 0 : index
    %115 = vector.load %arg2[%114, %c0_30, %c0_31] : memref<8x8x384xf32, #tpu.memory_space<vmem>>, vector<1x8x384xf32>
    %116 = vector.shape_cast %115 : vector<1x8x384xf32> to vector<8x384xf32>
    %cst_32 = arith.constant dense<0.000000e+00> : vector<8x384xf32>
    %117 = tpu.matmul %109, %3, %cst_32 {dimension_numbers = #tpu.dot_dimension_numbers<[1], [0], [0], [1], [0, 0, 1, 1], [], []>} : vector<8x128xf32>, vector<128x384xf32>, vector<8x384xf32> -> vector<8x384xf32>
    %118 = vector.extract_strided_slice %116 {offsets = [0, 0], sizes = [8, 128], strides = [1, 1]} : vector<8x384xf32> to vector<8x128xf32>
    %119 = vector.extract_strided_slice %117 {offsets = [0, 0], sizes = [8, 128], strides = [1, 1]} : vector<8x384xf32> to vector<8x128xf32>
    %120 = arith.addf %118, %119 : vector<8x128xf32>
    %121 = arith.negf %120 : vector<8x128xf32>
    %122 = math.exp %121 : vector<8x128xf32>
    %cst_33 = arith.constant 1.000000e+00 : f32
    %123 = vector.broadcast %cst_33 : f32 to vector<8x128xf32>
    %124 = arith.addf %123, %122 : vector<8x128xf32>
    %125 = arith.divf %123, %124 : vector<8x128xf32>
    %126 = vector.extract_strided_slice %116 {offsets = [0, 128], sizes = [8, 128], strides = [1, 1]} : vector<8x384xf32> to vector<8x128xf32>
    %127 = vector.extract_strided_slice %117 {offsets = [0, 128], sizes = [8, 128], strides = [1, 1]} : vector<8x384xf32> to vector<8x128xf32>
    %128 = arith.addf %126, %127 : vector<8x128xf32>
    %129 = arith.negf %128 : vector<8x128xf32>
    %130 = math.exp %129 : vector<8x128xf32>
    %cst_34 = arith.constant 1.000000e+00 : f32
    %131 = vector.broadcast %cst_34 : f32 to vector<8x128xf32>
    %132 = arith.addf %131, %130 : vector<8x128xf32>
    %133 = arith.divf %131, %132 : vector<8x128xf32>
    %134 = vector.extract_strided_slice %116 {offsets = [0, 256], sizes = [8, 128], strides = [1, 1]} : vector<8x384xf32> to vector<8x128xf32>
    %135 = vector.extract_strided_slice %117 {offsets = [0, 256], sizes = [8, 128], strides = [1, 1]} : vector<8x384xf32> to vector<8x128xf32>
    %136 = vector.broadcast %4 : vector<1x128xf32> to vector<8x128xf32>
    %137 = arith.addf %135, %136 : vector<8x128xf32>
    %138 = arith.mulf %125, %137 : vector<8x128xf32>
    %139 = arith.addf %134, %138 : vector<8x128xf32>
    %140 = math.tanh %139 : vector<8x128xf32>
    %cst_35 = arith.constant 1.000000e+00 : f32
    %141 = vector.broadcast %cst_35 : f32 to vector<8x128xf32>
    %142 = arith.subf %141, %133 : vector<8x128xf32>
    %143 = arith.mulf %142, %140 : vector<8x128xf32>
    %144 = arith.mulf %133, %109 : vector<8x128xf32>
    %145 = arith.addf %143, %144 : vector<8x128xf32>
    %146 = arith.index_cast %c3_i32 : i32 to index
    %c0_36 = arith.constant 0 : index
    %c0_37 = arith.constant 0 : index
    %147 = vector.load %arg5[%146, %c0_36, %c0_37] : memref<8x8x128xf32, #tpu.memory_space<vmem>>, vector<1x8x128xf32>
    %148 = vector.shape_cast %147 : vector<1x8x128xf32> to vector<8x128xf32>
    %149 = vector.shape_cast %145 : vector<8x128xf32> to vector<1x8x128xf32>
    tpu.vector_store %arg5[%146, %c0_36, %c0_37], %149 {strides = array<i32>} : memref<8x8x128xf32, #tpu.memory_space<vmem>>, vector<1x8x128xf32>,
    %c4_i32 = arith.constant 4 : i32
    %150 = arith.index_cast %c4_i32 : i32 to index
    %c0_38 = arith.constant 0 : index
    %c0_39 = arith.constant 0 : index
    %151 = vector.load %arg2[%150, %c0_38, %c0_39] : memref<8x8x384xf32, #tpu.memory_space<vmem>>, vector<1x8x384xf32>
    %152 = vector.shape_cast %151 : vector<1x8x384xf32> to vector<8x384xf32>
    %cst_40 = arith.constant dense<0.000000e+00> : vector<8x384xf32>
    %153 = tpu.matmul %145, %3, %cst_40 {dimension_numbers = #tpu.dot_dimension_numbers<[1], [0], [0], [1], [0, 0, 1, 1], [], []>} : vector<8x128xf32>, vector<128x384xf32>, vector<8x384xf32> -> vector<8x384xf32>
    %154 = vector.extract_strided_slice %152 {offsets = [0, 0], sizes = [8, 128], strides = [1, 1]} : vector<8x384xf32> to vector<8x128xf32>
    %155 = vector.extract_strided_slice %153 {offsets = [0, 0], sizes = [8, 128], strides = [1, 1]} : vector<8x384xf32> to vector<8x128xf32>
    %156 = arith.addf %154, %155 : vector<8x128xf32>
    %157 = arith.negf %156 : vector<8x128xf32>
    %158 = math.exp %157 : vector<8x128xf32>
    %cst_41 = arith.constant 1.000000e+00 : f32
    %159 = vector.broadcast %cst_41 : f32 to vector<8x128xf32>
    %160 = arith.addf %159, %158 : vector<8x128xf32>
    %161 = arith.divf %159, %160 : vector<8x128xf32>
    %162 = vector.extract_strided_slice %152 {offsets = [0, 128], sizes = [8, 128], strides = [1, 1]} : vector<8x384xf32> to vector<8x128xf32>
    %163 = vector.extract_strided_slice %153 {offsets = [0, 128], sizes = [8, 128], strides = [1, 1]} : vector<8x384xf32> to vector<8x128xf32>
    %164 = arith.addf %162, %163 : vector<8x128xf32>
    %165 = arith.negf %164 : vector<8x128xf32>
    %166 = math.exp %165 : vector<8x128xf32>
    %cst_42 = arith.constant 1.000000e+00 : f32
    %167 = vector.broadcast %cst_42 : f32 to vector<8x128xf32>
    %168 = arith.addf %167, %166 : vector<8x128xf32>
    %169 = arith.divf %167, %168 : vector<8x128xf32>
    %170 = vector.extract_strided_slice %152 {offsets = [0, 256], sizes = [8, 128], strides = [1, 1]} : vector<8x384xf32> to vector<8x128xf32>
    %171 = vector.extract_strided_slice %153 {offsets = [0, 256], sizes = [8, 128], strides = [1, 1]} : vector<8x384xf32> to vector<8x128xf32>
    %172 = vector.broadcast %4 : vector<1x128xf32> to vector<8x128xf32>
    %173 = arith.addf %171, %172 : vector<8x128xf32>
    %174 = arith.mulf %161, %173 : vector<8x128xf32>
    %175 = arith.addf %170, %174 : vector<8x128xf32>
    %176 = math.tanh %175 : vector<8x128xf32>
    %cst_43 = arith.constant 1.000000e+00 : f32
    %177 = vector.broadcast %cst_43 : f32 to vector<8x128xf32>
    %178 = arith.subf %177, %169 : vector<8x128xf32>
    %179 = arith.mulf %178, %176 : vector<8x128xf32>
    %180 = arith.mulf %169, %145 : vector<8x128xf32>
    %181 = arith.addf %179, %180 : vector<8x128xf32>
    %182 = arith.index_cast %c4_i32 : i32 to index
    %c0_44 = arith.constant 0 : index
    %c0_45 = arith.constant 0 : index
    %183 = vector.load %arg5[%182, %c0_44, %c0_45] : memref<8x8x128xf32, #tpu.memory_space<vmem>>, vector<1x8x128xf32>
    %184 = vector.shape_cast %183 : vector<1x8x128xf32> to vector<8x128xf32>
    %185 = vector.shape_cast %181 : vector<8x128xf32> to vector<1x8x128xf32>
    tpu.vector_store %arg5[%182, %c0_44, %c0_45], %185 {strides = array<i32>} : memref<8x8x128xf32, #tpu.memory_space<vmem>>, vector<1x8x128xf32>,
    %c5_i32 = arith.constant 5 : i32
    %186 = arith.index_cast %c5_i32 : i32 to index
    %c0_46 = arith.constant 0 : index
    %c0_47 = arith.constant 0 : index
    %187 = vector.load %arg2[%186, %c0_46, %c0_47] : memref<8x8x384xf32, #tpu.memory_space<vmem>>, vector<1x8x384xf32>
    %188 = vector.shape_cast %187 : vector<1x8x384xf32> to vector<8x384xf32>
    %cst_48 = arith.constant dense<0.000000e+00> : vector<8x384xf32>
    %189 = tpu.matmul %181, %3, %cst_48 {dimension_numbers = #tpu.dot_dimension_numbers<[1], [0], [0], [1], [0, 0, 1, 1], [], []>} : vector<8x128xf32>, vector<128x384xf32>, vector<8x384xf32> -> vector<8x384xf32>
    %190 = vector.extract_strided_slice %188 {offsets = [0, 0], sizes = [8, 128], strides = [1, 1]} : vector<8x384xf32> to vector<8x128xf32>
    %191 = vector.extract_strided_slice %189 {offsets = [0, 0], sizes = [8, 128], strides = [1, 1]} : vector<8x384xf32> to vector<8x128xf32>
    %192 = arith.addf %190, %191 : vector<8x128xf32>
    %193 = arith.negf %192 : vector<8x128xf32>
    %194 = math.exp %193 : vector<8x128xf32>
    %cst_49 = arith.constant 1.000000e+00 : f32
    %195 = vector.broadcast %cst_49 : f32 to vector<8x128xf32>
    %196 = arith.addf %195, %194 : vector<8x128xf32>
    %197 = arith.divf %195, %196 : vector<8x128xf32>
    %198 = vector.extract_strided_slice %188 {offsets = [0, 128], sizes = [8, 128], strides = [1, 1]} : vector<8x384xf32> to vector<8x128xf32>
    %199 = vector.extract_strided_slice %189 {offsets = [0, 128], sizes = [8, 128], strides = [1, 1]} : vector<8x384xf32> to vector<8x128xf32>
    %200 = arith.addf %198, %199 : vector<8x128xf32>
    %201 = arith.negf %200 : vector<8x128xf32>
    %202 = math.exp %201 : vector<8x128xf32>
    %cst_50 = arith.constant 1.000000e+00 : f32
    %203 = vector.broadcast %cst_50 : f32 to vector<8x128xf32>
    %204 = arith.addf %203, %202 : vector<8x128xf32>
    %205 = arith.divf %203, %204 : vector<8x128xf32>
    %206 = vector.extract_strided_slice %188 {offsets = [0, 256], sizes = [8, 128], strides = [1, 1]} : vector<8x384xf32> to vector<8x128xf32>
    %207 = vector.extract_strided_slice %189 {offsets = [0, 256], sizes = [8, 128], strides = [1, 1]} : vector<8x384xf32> to vector<8x128xf32>
    %208 = vector.broadcast %4 : vector<1x128xf32> to vector<8x128xf32>
    %209 = arith.addf %207, %208 : vector<8x128xf32>
    %210 = arith.mulf %197, %209 : vector<8x128xf32>
    %211 = arith.addf %206, %210 : vector<8x128xf32>
    %212 = math.tanh %211 : vector<8x128xf32>
    %cst_51 = arith.constant 1.000000e+00 : f32
    %213 = vector.broadcast %cst_51 : f32 to vector<8x128xf32>
    %214 = arith.subf %213, %205 : vector<8x128xf32>
    %215 = arith.mulf %214, %212 : vector<8x128xf32>
    %216 = arith.mulf %205, %181 : vector<8x128xf32>
    %217 = arith.addf %215, %216 : vector<8x128xf32>
    %218 = arith.index_cast %c5_i32 : i32 to index
    %c0_52 = arith.constant 0 : index
    %c0_53 = arith.constant 0 : index
    %219 = vector.load %arg5[%218, %c0_52, %c0_53] : memref<8x8x128xf32, #tpu.memory_space<vmem>>, vector<1x8x128xf32>
    %220 = vector.shape_cast %219 : vector<1x8x128xf32> to vector<8x128xf32>
    %221 = vector.shape_cast %217 : vector<8x128xf32> to vector<1x8x128xf32>
    tpu.vector_store %arg5[%218, %c0_52, %c0_53], %221 {strides = array<i32>} : memref<8x8x128xf32, #tpu.memory_space<vmem>>, vector<1x8x128xf32>,
    %c6_i32 = arith.constant 6 : i32
    %222 = arith.index_cast %c6_i32 : i32 to index
    %c0_54 = arith.constant 0 : index
    %c0_55 = arith.constant 0 : index
    %223 = vector.load %arg2[%222, %c0_54, %c0_55] : memref<8x8x384xf32, #tpu.memory_space<vmem>>, vector<1x8x384xf32>
    %224 = vector.shape_cast %223 : vector<1x8x384xf32> to vector<8x384xf32>
    %cst_56 = arith.constant dense<0.000000e+00> : vector<8x384xf32>
    %225 = tpu.matmul %217, %3, %cst_56 {dimension_numbers = #tpu.dot_dimension_numbers<[1], [0], [0], [1], [0, 0, 1, 1], [], []>} : vector<8x128xf32>, vector<128x384xf32>, vector<8x384xf32> -> vector<8x384xf32>
    %226 = vector.extract_strided_slice %224 {offsets = [0, 0], sizes = [8, 128], strides = [1, 1]} : vector<8x384xf32> to vector<8x128xf32>
    %227 = vector.extract_strided_slice %225 {offsets = [0, 0], sizes = [8, 128], strides = [1, 1]} : vector<8x384xf32> to vector<8x128xf32>
    %228 = arith.addf %226, %227 : vector<8x128xf32>
    %229 = arith.negf %228 : vector<8x128xf32>
    %230 = math.exp %229 : vector<8x128xf32>
    %cst_57 = arith.constant 1.000000e+00 : f32
    %231 = vector.broadcast %cst_57 : f32 to vector<8x128xf32>
    %232 = arith.addf %231, %230 : vector<8x128xf32>
    %233 = arith.divf %231, %232 : vector<8x128xf32>
    %234 = vector.extract_strided_slice %224 {offsets = [0, 128], sizes = [8, 128], strides = [1, 1]} : vector<8x384xf32> to vector<8x128xf32>
    %235 = vector.extract_strided_slice %225 {offsets = [0, 128], sizes = [8, 128], strides = [1, 1]} : vector<8x384xf32> to vector<8x128xf32>
    %236 = arith.addf %234, %235 : vector<8x128xf32>
    %237 = arith.negf %236 : vector<8x128xf32>
    %238 = math.exp %237 : vector<8x128xf32>
    %cst_58 = arith.constant 1.000000e+00 : f32
    %239 = vector.broadcast %cst_58 : f32 to vector<8x128xf32>
    %240 = arith.addf %239, %238 : vector<8x128xf32>
    %241 = arith.divf %239, %240 : vector<8x128xf32>
    %242 = vector.extract_strided_slice %224 {offsets = [0, 256], sizes = [8, 128], strides = [1, 1]} : vector<8x384xf32> to vector<8x128xf32>
    %243 = vector.extract_strided_slice %225 {offsets = [0, 256], sizes = [8, 128], strides = [1, 1]} : vector<8x384xf32> to vector<8x128xf32>
    %244 = vector.broadcast %4 : vector<1x128xf32> to vector<8x128xf32>
    %245 = arith.addf %243, %244 : vector<8x128xf32>
    %246 = arith.mulf %233, %245 : vector<8x128xf32>
    %247 = arith.addf %242, %246 : vector<8x128xf32>
    %248 = math.tanh %247 : vector<8x128xf32>
    %cst_59 = arith.constant 1.000000e+00 : f32
    %249 = vector.broadcast %cst_59 : f32 to vector<8x128xf32>
    %250 = arith.subf %249, %241 : vector<8x128xf32>
    %251 = arith.mulf %250, %248 : vector<8x128xf32>
    %252 = arith.mulf %241, %217 : vector<8x128xf32>
    %253 = arith.addf %251, %252 : vector<8x128xf32>
    %254 = arith.index_cast %c6_i32 : i32 to index
    %c0_60 = arith.constant 0 : index
    %c0_61 = arith.constant 0 : index
    %255 = vector.load %arg5[%254, %c0_60, %c0_61] : memref<8x8x128xf32, #tpu.memory_space<vmem>>, vector<1x8x128xf32>
    %256 = vector.shape_cast %255 : vector<1x8x128xf32> to vector<8x128xf32>
    %257 = vector.shape_cast %253 : vector<8x128xf32> to vector<1x8x128xf32>
    tpu.vector_store %arg5[%254, %c0_60, %c0_61], %257 {strides = array<i32>} : memref<8x8x128xf32, #tpu.memory_space<vmem>>, vector<1x8x128xf32>,
    %c7_i32 = arith.constant 7 : i32
    %258 = arith.index_cast %c7_i32 : i32 to index
    %c0_62 = arith.constant 0 : index
    %c0_63 = arith.constant 0 : index
    %259 = vector.load %arg2[%258, %c0_62, %c0_63] : memref<8x8x384xf32, #tpu.memory_space<vmem>>, vector<1x8x384xf32>
    %260 = vector.shape_cast %259 : vector<1x8x384xf32> to vector<8x384xf32>
    %cst_64 = arith.constant dense<0.000000e+00> : vector<8x384xf32>
    %261 = tpu.matmul %253, %3, %cst_64 {dimension_numbers = #tpu.dot_dimension_numbers<[1], [0], [0], [1], [0, 0, 1, 1], [], []>} : vector<8x128xf32>, vector<128x384xf32>, vector<8x384xf32> -> vector<8x384xf32>
    %262 = vector.extract_strided_slice %260 {offsets = [0, 0], sizes = [8, 128], strides = [1, 1]} : vector<8x384xf32> to vector<8x128xf32>
    %263 = vector.extract_strided_slice %261 {offsets = [0, 0], sizes = [8, 128], strides = [1, 1]} : vector<8x384xf32> to vector<8x128xf32>
    %264 = arith.addf %262, %263 : vector<8x128xf32>
    %265 = arith.negf %264 : vector<8x128xf32>
    %266 = math.exp %265 : vector<8x128xf32>
    %cst_65 = arith.constant 1.000000e+00 : f32
    %267 = vector.broadcast %cst_65 : f32 to vector<8x128xf32>
    %268 = arith.addf %267, %266 : vector<8x128xf32>
    %269 = arith.divf %267, %268 : vector<8x128xf32>
    %270 = vector.extract_strided_slice %260 {offsets = [0, 128], sizes = [8, 128], strides = [1, 1]} : vector<8x384xf32> to vector<8x128xf32>
    %271 = vector.extract_strided_slice %261 {offsets = [0, 128], sizes = [8, 128], strides = [1, 1]} : vector<8x384xf32> to vector<8x128xf32>
    %272 = arith.addf %270, %271 : vector<8x128xf32>
    %273 = arith.negf %272 : vector<8x128xf32>
    %274 = math.exp %273 : vector<8x128xf32>
    %cst_66 = arith.constant 1.000000e+00 : f32
    %275 = vector.broadcast %cst_66 : f32 to vector<8x128xf32>
    %276 = arith.addf %275, %274 : vector<8x128xf32>
    %277 = arith.divf %275, %276 : vector<8x128xf32>
    %278 = vector.extract_strided_slice %260 {offsets = [0, 256], sizes = [8, 128], strides = [1, 1]} : vector<8x384xf32> to vector<8x128xf32>
    %279 = vector.extract_strided_slice %261 {offsets = [0, 256], sizes = [8, 128], strides = [1, 1]} : vector<8x384xf32> to vector<8x128xf32>
    %280 = vector.broadcast %4 : vector<1x128xf32> to vector<8x128xf32>
    %281 = arith.addf %279, %280 : vector<8x128xf32>
    %282 = arith.mulf %269, %281 : vector<8x128xf32>
    %283 = arith.addf %278, %282 : vector<8x128xf32>
    %284 = math.tanh %283 : vector<8x128xf32>
    %cst_67 = arith.constant 1.000000e+00 : f32
    %285 = vector.broadcast %cst_67 : f32 to vector<8x128xf32>
    %286 = arith.subf %285, %277 : vector<8x128xf32>
    %287 = arith.mulf %286, %284 : vector<8x128xf32>
    %288 = arith.mulf %277, %253 : vector<8x128xf32>
    %289 = arith.addf %287, %288 : vector<8x128xf32>
    %290 = arith.index_cast %c7_i32 : i32 to index
    %c0_68 = arith.constant 0 : index
    %c0_69 = arith.constant 0 : index
    %291 = vector.load %arg5[%290, %c0_68, %c0_69] : memref<8x8x128xf32, #tpu.memory_space<vmem>>, vector<1x8x128xf32>
    %292 = vector.shape_cast %291 : vector<1x8x128xf32> to vector<8x128xf32>
    %293 = vector.shape_cast %289 : vector<8x128xf32> to vector<1x8x128xf32>
    tpu.vector_store %arg5[%290, %c0_68, %c0_69], %293 {strides = array<i32>} : memref<8x8x128xf32, #tpu.memory_space<vmem>>, vector<1x8x128xf32>,
    %c8_i32 = arith.constant 8 : i32
    %c0_70 = arith.constant 0 : index
    %c0_71 = arith.constant 0 : index
    %294 = vector.load %arg6[%c0_70, %c0_71] : memref<8x128xf32, #tpu.memory_space<vmem>>, vector<8x128xf32>
    tpu.vector_store %arg6[%c0_70, %c0_71], %289 {strides = array<i32>} : memref<8x128xf32, #tpu.memory_space<vmem>>, vector<8x128xf32>,
    return
  }
  func.func @transform_0(%arg0: i32, %arg1: i32) -> (i32, i32, i32) {
    %c0_i32 = arith.constant 0 : i32
    %c0_i32_0 = arith.constant 0 : i32
    return %arg1, %arg0, %c0_i32 : i32, i32, i32
  }
  func.func @transform_1(%arg0: i32, %arg1: i32) -> (i32, i32) {
    %c0_i32 = arith.constant 0 : i32
    %c0_i32_0 = arith.constant 0 : i32
    %c0_i32_1 = arith.constant 0 : i32
    return %c0_i32, %c0_i32_0 : i32, i32
  }
  func.func @transform_2(%arg0: i32, %arg1: i32) -> (i32, i32) {
    %c0_i32 = arith.constant 0 : i32
    %c0_i32_0 = arith.constant 0 : i32
    %c0_i32_1 = arith.constant 0 : i32
    return %c0_i32, %c0_i32_0 : i32, i32
  }
  func.func @transform_3(%arg0: i32, %arg1: i32) -> (i32, i32, i32) {
    %c0_i32 = arith.constant 0 : i32
    %c0_i32_0 = arith.constant 0 : i32
    return %arg1, %arg0, %c0_i32 : i32, i32, i32
  }
}

module attributes {stable_mosaic.version = 11 : i64} {
  func.func @gru_head_kernel(%arg0: i32, %arg1: i32, %arg2: memref<8x8x384xf32, #tpu.memory_space<vmem>>, %arg3: memref<128x384xf32, #tpu.memory_space<vmem>>, %arg4: memref<1x128xf32, #tpu.memory_space<vmem>>, %arg5: memref<128x5xf32, #tpu.memory_space<vmem>>, %arg6: memref<1x5xf32, #tpu.memory_space<vmem>>, %arg7: memref<8x5xf32, #tpu.memory_space<vmem>>, %arg8: memref<8x128xf32, #tpu.memory_space<vmem>>) attributes {dimension_semantics = [#tpu.dimension_semantics<parallel>, #tpu.dimension_semantics<arbitrary>], iteration_bounds = array<i64: 1, 1>, scalar_prefetch = 0 : i64, scratch_operands = 1 : i64, tpu.core_type = #tpu.core_type<tc>, window_params = [{transform_indices = @transform_0, window_bounds = array<i64: 8, 8, 384>}, {pipeline_mode = #tpu.pipeline_mode<synchronous>, transform_indices = @transform_1, window_bounds = array<i64: 128, 384>}, {pipeline_mode = #tpu.pipeline_mode<synchronous>, transform_indices = @transform_2, window_bounds = array<i64: 1, 128>}, {pipeline_mode = #tpu.pipeline_mode<synchronous>, transform_indices = @transform_3, window_bounds = array<i64: 128, 5>}, {pipeline_mode = #tpu.pipeline_mode<synchronous>, transform_indices = @transform_4, window_bounds = array<i64: 1, 5>}, {transform_indices = @transform_5, window_bounds = array<i64: 8, 5>}]} {
    %c0_i32 = arith.constant 0 : i32
    %0 = arith.cmpi eq, %arg1, %c0_i32 : i32
    %1 = arith.extui %0 : i1 to i32
    %c0_i32_0 = arith.constant 0 : i32
    %2 = arith.cmpi ne, %1, %c0_i32_0 : i32
    scf.if %2 {
      %cst_58 = arith.constant 0.000000e+00 : f32
      %266 = vector.broadcast %cst_58 : f32 to vector<8x128xf32>
      %c0_59 = arith.constant 0 : index
      %c0_60 = arith.constant 0 : index
      %267 = vector.load %arg8[%c0_59, %c0_60] : memref<8x128xf32, #tpu.memory_space<vmem>>, vector<8x128xf32>
      tpu.vector_store %arg8[%c0_59, %c0_60], %266 {strides = array<i32>} : memref<8x128xf32, #tpu.memory_space<vmem>>, vector<8x128xf32>,
    } else {
    }
    %c0 = arith.constant 0 : index
    %c0_1 = arith.constant 0 : index
    %3 = vector.load %arg3[%c0, %c0_1] : memref<128x384xf32, #tpu.memory_space<vmem>>, vector<128x384xf32>
    %c0_2 = arith.constant 0 : index
    %c0_3 = arith.constant 0 : index
    %4 = vector.load %arg4[%c0_2, %c0_3] : memref<1x128xf32, #tpu.memory_space<vmem>>, vector<1x128xf32>
    %c0_4 = arith.constant 0 : index
    %c0_5 = arith.constant 0 : index
    %5 = vector.load %arg8[%c0_4, %c0_5] : memref<8x128xf32, #tpu.memory_space<vmem>>, vector<8x128xf32>
    %c0_i32_6 = arith.constant 0 : i32
    %6 = arith.index_cast %c0_i32_6 : i32 to index
    %c0_7 = arith.constant 0 : index
    %c0_8 = arith.constant 0 : index
    %7 = vector.load %arg2[%6, %c0_7, %c0_8] : memref<8x8x384xf32, #tpu.memory_space<vmem>>, vector<1x8x384xf32>
    %8 = vector.shape_cast %7 : vector<1x8x384xf32> to vector<8x384xf32>
    %cst = arith.constant dense<0.000000e+00> : vector<8x384xf32>
    %9 = tpu.matmul %5, %3, %cst {dimension_numbers = #tpu.dot_dimension_numbers<[1], [0], [0], [1], [0, 0, 1, 1], [], []>} : vector<8x128xf32>, vector<128x384xf32>, vector<8x384xf32> -> vector<8x384xf32>
    %10 = vector.extract_strided_slice %8 {offsets = [0, 0], sizes = [8, 128], strides = [1, 1]} : vector<8x384xf32> to vector<8x128xf32>
    %11 = vector.extract_strided_slice %9 {offsets = [0, 0], sizes = [8, 128], strides = [1, 1]} : vector<8x384xf32> to vector<8x128xf32>
    %12 = arith.addf %10, %11 : vector<8x128xf32>
    %13 = arith.negf %12 : vector<8x128xf32>
    %14 = math.exp %13 : vector<8x128xf32>
    %cst_9 = arith.constant 1.000000e+00 : f32
    %15 = vector.broadcast %cst_9 : f32 to vector<8x128xf32>
    %16 = arith.addf %15, %14 : vector<8x128xf32>
    %17 = arith.divf %15, %16 : vector<8x128xf32>
    %18 = vector.extract_strided_slice %8 {offsets = [0, 128], sizes = [8, 128], strides = [1, 1]} : vector<8x384xf32> to vector<8x128xf32>
    %19 = vector.extract_strided_slice %9 {offsets = [0, 128], sizes = [8, 128], strides = [1, 1]} : vector<8x384xf32> to vector<8x128xf32>
    %20 = arith.addf %18, %19 : vector<8x128xf32>
    %21 = arith.negf %20 : vector<8x128xf32>
    %22 = math.exp %21 : vector<8x128xf32>
    %cst_10 = arith.constant 1.000000e+00 : f32
    %23 = vector.broadcast %cst_10 : f32 to vector<8x128xf32>
    %24 = arith.addf %23, %22 : vector<8x128xf32>
    %25 = arith.divf %23, %24 : vector<8x128xf32>
    %26 = vector.extract_strided_slice %8 {offsets = [0, 256], sizes = [8, 128], strides = [1, 1]} : vector<8x384xf32> to vector<8x128xf32>
    %27 = vector.extract_strided_slice %9 {offsets = [0, 256], sizes = [8, 128], strides = [1, 1]} : vector<8x384xf32> to vector<8x128xf32>
    %28 = vector.broadcast %4 : vector<1x128xf32> to vector<8x128xf32>
    %29 = arith.addf %27, %28 : vector<8x128xf32>
    %30 = arith.mulf %17, %29 : vector<8x128xf32>
    %31 = arith.addf %26, %30 : vector<8x128xf32>
    %32 = math.tanh %31 : vector<8x128xf32>
    %cst_11 = arith.constant 1.000000e+00 : f32
    %33 = vector.broadcast %cst_11 : f32 to vector<8x128xf32>
    %34 = arith.subf %33, %25 : vector<8x128xf32>
    %35 = arith.mulf %34, %32 : vector<8x128xf32>
    %36 = arith.mulf %25, %5 : vector<8x128xf32>
    %37 = arith.addf %35, %36 : vector<8x128xf32>
    %c1_i32 = arith.constant 1 : i32
    %38 = arith.index_cast %c1_i32 : i32 to index
    %c0_12 = arith.constant 0 : index
    %c0_13 = arith.constant 0 : index
    %39 = vector.load %arg2[%38, %c0_12, %c0_13] : memref<8x8x384xf32, #tpu.memory_space<vmem>>, vector<1x8x384xf32>
    %40 = vector.shape_cast %39 : vector<1x8x384xf32> to vector<8x384xf32>
    %cst_14 = arith.constant dense<0.000000e+00> : vector<8x384xf32>
    %41 = tpu.matmul %37, %3, %cst_14 {dimension_numbers = #tpu.dot_dimension_numbers<[1], [0], [0], [1], [0, 0, 1, 1], [], []>} : vector<8x128xf32>, vector<128x384xf32>, vector<8x384xf32> -> vector<8x384xf32>
    %42 = vector.extract_strided_slice %40 {offsets = [0, 0], sizes = [8, 128], strides = [1, 1]} : vector<8x384xf32> to vector<8x128xf32>
    %43 = vector.extract_strided_slice %41 {offsets = [0, 0], sizes = [8, 128], strides = [1, 1]} : vector<8x384xf32> to vector<8x128xf32>
    %44 = arith.addf %42, %43 : vector<8x128xf32>
    %45 = arith.negf %44 : vector<8x128xf32>
    %46 = math.exp %45 : vector<8x128xf32>
    %cst_15 = arith.constant 1.000000e+00 : f32
    %47 = vector.broadcast %cst_15 : f32 to vector<8x128xf32>
    %48 = arith.addf %47, %46 : vector<8x128xf32>
    %49 = arith.divf %47, %48 : vector<8x128xf32>
    %50 = vector.extract_strided_slice %40 {offsets = [0, 128], sizes = [8, 128], strides = [1, 1]} : vector<8x384xf32> to vector<8x128xf32>
    %51 = vector.extract_strided_slice %41 {offsets = [0, 128], sizes = [8, 128], strides = [1, 1]} : vector<8x384xf32> to vector<8x128xf32>
    %52 = arith.addf %50, %51 : vector<8x128xf32>
    %53 = arith.negf %52 : vector<8x128xf32>
    %54 = math.exp %53 : vector<8x128xf32>
    %cst_16 = arith.constant 1.000000e+00 : f32
    %55 = vector.broadcast %cst_16 : f32 to vector<8x128xf32>
    %56 = arith.addf %55, %54 : vector<8x128xf32>
    %57 = arith.divf %55, %56 : vector<8x128xf32>
    %58 = vector.extract_strided_slice %40 {offsets = [0, 256], sizes = [8, 128], strides = [1, 1]} : vector<8x384xf32> to vector<8x128xf32>
    %59 = vector.extract_strided_slice %41 {offsets = [0, 256], sizes = [8, 128], strides = [1, 1]} : vector<8x384xf32> to vector<8x128xf32>
    %60 = vector.broadcast %4 : vector<1x128xf32> to vector<8x128xf32>
    %61 = arith.addf %59, %60 : vector<8x128xf32>
    %62 = arith.mulf %49, %61 : vector<8x128xf32>
    %63 = arith.addf %58, %62 : vector<8x128xf32>
    %64 = math.tanh %63 : vector<8x128xf32>
    %cst_17 = arith.constant 1.000000e+00 : f32
    %65 = vector.broadcast %cst_17 : f32 to vector<8x128xf32>
    %66 = arith.subf %65, %57 : vector<8x128xf32>
    %67 = arith.mulf %66, %64 : vector<8x128xf32>
    %68 = arith.mulf %57, %37 : vector<8x128xf32>
    %69 = arith.addf %67, %68 : vector<8x128xf32>
    %c2_i32 = arith.constant 2 : i32
    %70 = arith.index_cast %c2_i32 : i32 to index
    %c0_18 = arith.constant 0 : index
    %c0_19 = arith.constant 0 : index
    %71 = vector.load %arg2[%70, %c0_18, %c0_19] : memref<8x8x384xf32, #tpu.memory_space<vmem>>, vector<1x8x384xf32>
    %72 = vector.shape_cast %71 : vector<1x8x384xf32> to vector<8x384xf32>
    %cst_20 = arith.constant dense<0.000000e+00> : vector<8x384xf32>
    %73 = tpu.matmul %69, %3, %cst_20 {dimension_numbers = #tpu.dot_dimension_numbers<[1], [0], [0], [1], [0, 0, 1, 1], [], []>} : vector<8x128xf32>, vector<128x384xf32>, vector<8x384xf32> -> vector<8x384xf32>
    %74 = vector.extract_strided_slice %72 {offsets = [0, 0], sizes = [8, 128], strides = [1, 1]} : vector<8x384xf32> to vector<8x128xf32>
    %75 = vector.extract_strided_slice %73 {offsets = [0, 0], sizes = [8, 128], strides = [1, 1]} : vector<8x384xf32> to vector<8x128xf32>
    %76 = arith.addf %74, %75 : vector<8x128xf32>
    %77 = arith.negf %76 : vector<8x128xf32>
    %78 = math.exp %77 : vector<8x128xf32>
    %cst_21 = arith.constant 1.000000e+00 : f32
    %79 = vector.broadcast %cst_21 : f32 to vector<8x128xf32>
    %80 = arith.addf %79, %78 : vector<8x128xf32>
    %81 = arith.divf %79, %80 : vector<8x128xf32>
    %82 = vector.extract_strided_slice %72 {offsets = [0, 128], sizes = [8, 128], strides = [1, 1]} : vector<8x384xf32> to vector<8x128xf32>
    %83 = vector.extract_strided_slice %73 {offsets = [0, 128], sizes = [8, 128], strides = [1, 1]} : vector<8x384xf32> to vector<8x128xf32>
    %84 = arith.addf %82, %83 : vector<8x128xf32>
    %85 = arith.negf %84 : vector<8x128xf32>
    %86 = math.exp %85 : vector<8x128xf32>
    %cst_22 = arith.constant 1.000000e+00 : f32
    %87 = vector.broadcast %cst_22 : f32 to vector<8x128xf32>
    %88 = arith.addf %87, %86 : vector<8x128xf32>
    %89 = arith.divf %87, %88 : vector<8x128xf32>
    %90 = vector.extract_strided_slice %72 {offsets = [0, 256], sizes = [8, 128], strides = [1, 1]} : vector<8x384xf32> to vector<8x128xf32>
    %91 = vector.extract_strided_slice %73 {offsets = [0, 256], sizes = [8, 128], strides = [1, 1]} : vector<8x384xf32> to vector<8x128xf32>
    %92 = vector.broadcast %4 : vector<1x128xf32> to vector<8x128xf32>
    %93 = arith.addf %91, %92 : vector<8x128xf32>
    %94 = arith.mulf %81, %93 : vector<8x128xf32>
    %95 = arith.addf %90, %94 : vector<8x128xf32>
    %96 = math.tanh %95 : vector<8x128xf32>
    %cst_23 = arith.constant 1.000000e+00 : f32
    %97 = vector.broadcast %cst_23 : f32 to vector<8x128xf32>
    %98 = arith.subf %97, %89 : vector<8x128xf32>
    %99 = arith.mulf %98, %96 : vector<8x128xf32>
    %100 = arith.mulf %89, %69 : vector<8x128xf32>
    %101 = arith.addf %99, %100 : vector<8x128xf32>
    %c3_i32 = arith.constant 3 : i32
    %102 = arith.index_cast %c3_i32 : i32 to index
    %c0_24 = arith.constant 0 : index
    %c0_25 = arith.constant 0 : index
    %103 = vector.load %arg2[%102, %c0_24, %c0_25] : memref<8x8x384xf32, #tpu.memory_space<vmem>>, vector<1x8x384xf32>
    %104 = vector.shape_cast %103 : vector<1x8x384xf32> to vector<8x384xf32>
    %cst_26 = arith.constant dense<0.000000e+00> : vector<8x384xf32>
    %105 = tpu.matmul %101, %3, %cst_26 {dimension_numbers = #tpu.dot_dimension_numbers<[1], [0], [0], [1], [0, 0, 1, 1], [], []>} : vector<8x128xf32>, vector<128x384xf32>, vector<8x384xf32> -> vector<8x384xf32>
    %106 = vector.extract_strided_slice %104 {offsets = [0, 0], sizes = [8, 128], strides = [1, 1]} : vector<8x384xf32> to vector<8x128xf32>
    %107 = vector.extract_strided_slice %105 {offsets = [0, 0], sizes = [8, 128], strides = [1, 1]} : vector<8x384xf32> to vector<8x128xf32>
    %108 = arith.addf %106, %107 : vector<8x128xf32>
    %109 = arith.negf %108 : vector<8x128xf32>
    %110 = math.exp %109 : vector<8x128xf32>
    %cst_27 = arith.constant 1.000000e+00 : f32
    %111 = vector.broadcast %cst_27 : f32 to vector<8x128xf32>
    %112 = arith.addf %111, %110 : vector<8x128xf32>
    %113 = arith.divf %111, %112 : vector<8x128xf32>
    %114 = vector.extract_strided_slice %104 {offsets = [0, 128], sizes = [8, 128], strides = [1, 1]} : vector<8x384xf32> to vector<8x128xf32>
    %115 = vector.extract_strided_slice %105 {offsets = [0, 128], sizes = [8, 128], strides = [1, 1]} : vector<8x384xf32> to vector<8x128xf32>
    %116 = arith.addf %114, %115 : vector<8x128xf32>
    %117 = arith.negf %116 : vector<8x128xf32>
    %118 = math.exp %117 : vector<8x128xf32>
    %cst_28 = arith.constant 1.000000e+00 : f32
    %119 = vector.broadcast %cst_28 : f32 to vector<8x128xf32>
    %120 = arith.addf %119, %118 : vector<8x128xf32>
    %121 = arith.divf %119, %120 : vector<8x128xf32>
    %122 = vector.extract_strided_slice %104 {offsets = [0, 256], sizes = [8, 128], strides = [1, 1]} : vector<8x384xf32> to vector<8x128xf32>
    %123 = vector.extract_strided_slice %105 {offsets = [0, 256], sizes = [8, 128], strides = [1, 1]} : vector<8x384xf32> to vector<8x128xf32>
    %124 = vector.broadcast %4 : vector<1x128xf32> to vector<8x128xf32>
    %125 = arith.addf %123, %124 : vector<8x128xf32>
    %126 = arith.mulf %113, %125 : vector<8x128xf32>
    %127 = arith.addf %122, %126 : vector<8x128xf32>
    %128 = math.tanh %127 : vector<8x128xf32>
    %cst_29 = arith.constant 1.000000e+00 : f32
    %129 = vector.broadcast %cst_29 : f32 to vector<8x128xf32>
    %130 = arith.subf %129, %121 : vector<8x128xf32>
    %131 = arith.mulf %130, %128 : vector<8x128xf32>
    %132 = arith.mulf %121, %101 : vector<8x128xf32>
    %133 = arith.addf %131, %132 : vector<8x128xf32>
    %c4_i32 = arith.constant 4 : i32
    %134 = arith.index_cast %c4_i32 : i32 to index
    %c0_30 = arith.constant 0 : index
    %c0_31 = arith.constant 0 : index
    %135 = vector.load %arg2[%134, %c0_30, %c0_31] : memref<8x8x384xf32, #tpu.memory_space<vmem>>, vector<1x8x384xf32>
    %136 = vector.shape_cast %135 : vector<1x8x384xf32> to vector<8x384xf32>
    %cst_32 = arith.constant dense<0.000000e+00> : vector<8x384xf32>
    %137 = tpu.matmul %133, %3, %cst_32 {dimension_numbers = #tpu.dot_dimension_numbers<[1], [0], [0], [1], [0, 0, 1, 1], [], []>} : vector<8x128xf32>, vector<128x384xf32>, vector<8x384xf32> -> vector<8x384xf32>
    %138 = vector.extract_strided_slice %136 {offsets = [0, 0], sizes = [8, 128], strides = [1, 1]} : vector<8x384xf32> to vector<8x128xf32>
    %139 = vector.extract_strided_slice %137 {offsets = [0, 0], sizes = [8, 128], strides = [1, 1]} : vector<8x384xf32> to vector<8x128xf32>
    %140 = arith.addf %138, %139 : vector<8x128xf32>
    %141 = arith.negf %140 : vector<8x128xf32>
    %142 = math.exp %141 : vector<8x128xf32>
    %cst_33 = arith.constant 1.000000e+00 : f32
    %143 = vector.broadcast %cst_33 : f32 to vector<8x128xf32>
    %144 = arith.addf %143, %142 : vector<8x128xf32>
    %145 = arith.divf %143, %144 : vector<8x128xf32>
    %146 = vector.extract_strided_slice %136 {offsets = [0, 128], sizes = [8, 128], strides = [1, 1]} : vector<8x384xf32> to vector<8x128xf32>
    %147 = vector.extract_strided_slice %137 {offsets = [0, 128], sizes = [8, 128], strides = [1, 1]} : vector<8x384xf32> to vector<8x128xf32>
    %148 = arith.addf %146, %147 : vector<8x128xf32>
    %149 = arith.negf %148 : vector<8x128xf32>
    %150 = math.exp %149 : vector<8x128xf32>
    %cst_34 = arith.constant 1.000000e+00 : f32
    %151 = vector.broadcast %cst_34 : f32 to vector<8x128xf32>
    %152 = arith.addf %151, %150 : vector<8x128xf32>
    %153 = arith.divf %151, %152 : vector<8x128xf32>
    %154 = vector.extract_strided_slice %136 {offsets = [0, 256], sizes = [8, 128], strides = [1, 1]} : vector<8x384xf32> to vector<8x128xf32>
    %155 = vector.extract_strided_slice %137 {offsets = [0, 256], sizes = [8, 128], strides = [1, 1]} : vector<8x384xf32> to vector<8x128xf32>
    %156 = vector.broadcast %4 : vector<1x128xf32> to vector<8x128xf32>
    %157 = arith.addf %155, %156 : vector<8x128xf32>
    %158 = arith.mulf %145, %157 : vector<8x128xf32>
    %159 = arith.addf %154, %158 : vector<8x128xf32>
    %160 = math.tanh %159 : vector<8x128xf32>
    %cst_35 = arith.constant 1.000000e+00 : f32
    %161 = vector.broadcast %cst_35 : f32 to vector<8x128xf32>
    %162 = arith.subf %161, %153 : vector<8x128xf32>
    %163 = arith.mulf %162, %160 : vector<8x128xf32>
    %164 = arith.mulf %153, %133 : vector<8x128xf32>
    %165 = arith.addf %163, %164 : vector<8x128xf32>
    %c5_i32 = arith.constant 5 : i32
    %166 = arith.index_cast %c5_i32 : i32 to index
    %c0_36 = arith.constant 0 : index
    %c0_37 = arith.constant 0 : index
    %167 = vector.load %arg2[%166, %c0_36, %c0_37] : memref<8x8x384xf32, #tpu.memory_space<vmem>>, vector<1x8x384xf32>
    %168 = vector.shape_cast %167 : vector<1x8x384xf32> to vector<8x384xf32>
    %cst_38 = arith.constant dense<0.000000e+00> : vector<8x384xf32>
    %169 = tpu.matmul %165, %3, %cst_38 {dimension_numbers = #tpu.dot_dimension_numbers<[1], [0], [0], [1], [0, 0, 1, 1], [], []>} : vector<8x128xf32>, vector<128x384xf32>, vector<8x384xf32> -> vector<8x384xf32>
    %170 = vector.extract_strided_slice %168 {offsets = [0, 0], sizes = [8, 128], strides = [1, 1]} : vector<8x384xf32> to vector<8x128xf32>
    %171 = vector.extract_strided_slice %169 {offsets = [0, 0], sizes = [8, 128], strides = [1, 1]} : vector<8x384xf32> to vector<8x128xf32>
    %172 = arith.addf %170, %171 : vector<8x128xf32>
    %173 = arith.negf %172 : vector<8x128xf32>
    %174 = math.exp %173 : vector<8x128xf32>
    %cst_39 = arith.constant 1.000000e+00 : f32
    %175 = vector.broadcast %cst_39 : f32 to vector<8x128xf32>
    %176 = arith.addf %175, %174 : vector<8x128xf32>
    %177 = arith.divf %175, %176 : vector<8x128xf32>
    %178 = vector.extract_strided_slice %168 {offsets = [0, 128], sizes = [8, 128], strides = [1, 1]} : vector<8x384xf32> to vector<8x128xf32>
    %179 = vector.extract_strided_slice %169 {offsets = [0, 128], sizes = [8, 128], strides = [1, 1]} : vector<8x384xf32> to vector<8x128xf32>
    %180 = arith.addf %178, %179 : vector<8x128xf32>
    %181 = arith.negf %180 : vector<8x128xf32>
    %182 = math.exp %181 : vector<8x128xf32>
    %cst_40 = arith.constant 1.000000e+00 : f32
    %183 = vector.broadcast %cst_40 : f32 to vector<8x128xf32>
    %184 = arith.addf %183, %182 : vector<8x128xf32>
    %185 = arith.divf %183, %184 : vector<8x128xf32>
    %186 = vector.extract_strided_slice %168 {offsets = [0, 256], sizes = [8, 128], strides = [1, 1]} : vector<8x384xf32> to vector<8x128xf32>
    %187 = vector.extract_strided_slice %169 {offsets = [0, 256], sizes = [8, 128], strides = [1, 1]} : vector<8x384xf32> to vector<8x128xf32>
    %188 = vector.broadcast %4 : vector<1x128xf32> to vector<8x128xf32>
    %189 = arith.addf %187, %188 : vector<8x128xf32>
    %190 = arith.mulf %177, %189 : vector<8x128xf32>
    %191 = arith.addf %186, %190 : vector<8x128xf32>
    %192 = math.tanh %191 : vector<8x128xf32>
    %cst_41 = arith.constant 1.000000e+00 : f32
    %193 = vector.broadcast %cst_41 : f32 to vector<8x128xf32>
    %194 = arith.subf %193, %185 : vector<8x128xf32>
    %195 = arith.mulf %194, %192 : vector<8x128xf32>
    %196 = arith.mulf %185, %165 : vector<8x128xf32>
    %197 = arith.addf %195, %196 : vector<8x128xf32>
    %c6_i32 = arith.constant 6 : i32
    %198 = arith.index_cast %c6_i32 : i32 to index
    %c0_42 = arith.constant 0 : index
    %c0_43 = arith.constant 0 : index
    %199 = vector.load %arg2[%198, %c0_42, %c0_43] : memref<8x8x384xf32, #tpu.memory_space<vmem>>, vector<1x8x384xf32>
    %200 = vector.shape_cast %199 : vector<1x8x384xf32> to vector<8x384xf32>
    %cst_44 = arith.constant dense<0.000000e+00> : vector<8x384xf32>
    %201 = tpu.matmul %197, %3, %cst_44 {dimension_numbers = #tpu.dot_dimension_numbers<[1], [0], [0], [1], [0, 0, 1, 1], [], []>} : vector<8x128xf32>, vector<128x384xf32>, vector<8x384xf32> -> vector<8x384xf32>
    %202 = vector.extract_strided_slice %200 {offsets = [0, 0], sizes = [8, 128], strides = [1, 1]} : vector<8x384xf32> to vector<8x128xf32>
    %203 = vector.extract_strided_slice %201 {offsets = [0, 0], sizes = [8, 128], strides = [1, 1]} : vector<8x384xf32> to vector<8x128xf32>
    %204 = arith.addf %202, %203 : vector<8x128xf32>
    %205 = arith.negf %204 : vector<8x128xf32>
    %206 = math.exp %205 : vector<8x128xf32>
    %cst_45 = arith.constant 1.000000e+00 : f32
    %207 = vector.broadcast %cst_45 : f32 to vector<8x128xf32>
    %208 = arith.addf %207, %206 : vector<8x128xf32>
    %209 = arith.divf %207, %208 : vector<8x128xf32>
    %210 = vector.extract_strided_slice %200 {offsets = [0, 128], sizes = [8, 128], strides = [1, 1]} : vector<8x384xf32> to vector<8x128xf32>
    %211 = vector.extract_strided_slice %201 {offsets = [0, 128], sizes = [8, 128], strides = [1, 1]} : vector<8x384xf32> to vector<8x128xf32>
    %212 = arith.addf %210, %211 : vector<8x128xf32>
    %213 = arith.negf %212 : vector<8x128xf32>
    %214 = math.exp %213 : vector<8x128xf32>
    %cst_46 = arith.constant 1.000000e+00 : f32
    %215 = vector.broadcast %cst_46 : f32 to vector<8x128xf32>
    %216 = arith.addf %215, %214 : vector<8x128xf32>
    %217 = arith.divf %215, %216 : vector<8x128xf32>
    %218 = vector.extract_strided_slice %200 {offsets = [0, 256], sizes = [8, 128], strides = [1, 1]} : vector<8x384xf32> to vector<8x128xf32>
    %219 = vector.extract_strided_slice %201 {offsets = [0, 256], sizes = [8, 128], strides = [1, 1]} : vector<8x384xf32> to vector<8x128xf32>
    %220 = vector.broadcast %4 : vector<1x128xf32> to vector<8x128xf32>
    %221 = arith.addf %219, %220 : vector<8x128xf32>
    %222 = arith.mulf %209, %221 : vector<8x128xf32>
    %223 = arith.addf %218, %222 : vector<8x128xf32>
    %224 = math.tanh %223 : vector<8x128xf32>
    %cst_47 = arith.constant 1.000000e+00 : f32
    %225 = vector.broadcast %cst_47 : f32 to vector<8x128xf32>
    %226 = arith.subf %225, %217 : vector<8x128xf32>
    %227 = arith.mulf %226, %224 : vector<8x128xf32>
    %228 = arith.mulf %217, %197 : vector<8x128xf32>
    %229 = arith.addf %227, %228 : vector<8x128xf32>
    %c7_i32 = arith.constant 7 : i32
    %230 = arith.index_cast %c7_i32 : i32 to index
    %c0_48 = arith.constant 0 : index
    %c0_49 = arith.constant 0 : index
    %231 = vector.load %arg2[%230, %c0_48, %c0_49] : memref<8x8x384xf32, #tpu.memory_space<vmem>>, vector<1x8x384xf32>
    %232 = vector.shape_cast %231 : vector<1x8x384xf32> to vector<8x384xf32>
    %cst_50 = arith.constant dense<0.000000e+00> : vector<8x384xf32>
    %233 = tpu.matmul %229, %3, %cst_50 {dimension_numbers = #tpu.dot_dimension_numbers<[1], [0], [0], [1], [0, 0, 1, 1], [], []>} : vector<8x128xf32>, vector<128x384xf32>, vector<8x384xf32> -> vector<8x384xf32>
    %234 = vector.extract_strided_slice %232 {offsets = [0, 0], sizes = [8, 128], strides = [1, 1]} : vector<8x384xf32> to vector<8x128xf32>
    %235 = vector.extract_strided_slice %233 {offsets = [0, 0], sizes = [8, 128], strides = [1, 1]} : vector<8x384xf32> to vector<8x128xf32>
    %236 = arith.addf %234, %235 : vector<8x128xf32>
    %237 = arith.negf %236 : vector<8x128xf32>
    %238 = math.exp %237 : vector<8x128xf32>
    %cst_51 = arith.constant 1.000000e+00 : f32
    %239 = vector.broadcast %cst_51 : f32 to vector<8x128xf32>
    %240 = arith.addf %239, %238 : vector<8x128xf32>
    %241 = arith.divf %239, %240 : vector<8x128xf32>
    %242 = vector.extract_strided_slice %232 {offsets = [0, 128], sizes = [8, 128], strides = [1, 1]} : vector<8x384xf32> to vector<8x128xf32>
    %243 = vector.extract_strided_slice %233 {offsets = [0, 128], sizes = [8, 128], strides = [1, 1]} : vector<8x384xf32> to vector<8x128xf32>
    %244 = arith.addf %242, %243 : vector<8x128xf32>
    %245 = arith.negf %244 : vector<8x128xf32>
    %246 = math.exp %245 : vector<8x128xf32>
    %cst_52 = arith.constant 1.000000e+00 : f32
    %247 = vector.broadcast %cst_52 : f32 to vector<8x128xf32>
    %248 = arith.addf %247, %246 : vector<8x128xf32>
    %249 = arith.divf %247, %248 : vector<8x128xf32>
    %250 = vector.extract_strided_slice %232 {offsets = [0, 256], sizes = [8, 128], strides = [1, 1]} : vector<8x384xf32> to vector<8x128xf32>
    %251 = vector.extract_strided_slice %233 {offsets = [0, 256], sizes = [8, 128], strides = [1, 1]} : vector<8x384xf32> to vector<8x128xf32>
    %252 = vector.broadcast %4 : vector<1x128xf32> to vector<8x128xf32>
    %253 = arith.addf %251, %252 : vector<8x128xf32>
    %254 = arith.mulf %241, %253 : vector<8x128xf32>
    %255 = arith.addf %250, %254 : vector<8x128xf32>
    %256 = math.tanh %255 : vector<8x128xf32>
    %cst_53 = arith.constant 1.000000e+00 : f32
    %257 = vector.broadcast %cst_53 : f32 to vector<8x128xf32>
    %258 = arith.subf %257, %249 : vector<8x128xf32>
    %259 = arith.mulf %258, %256 : vector<8x128xf32>
    %260 = arith.mulf %249, %229 : vector<8x128xf32>
    %261 = arith.addf %259, %260 : vector<8x128xf32>
    %c8_i32 = arith.constant 8 : i32
    %c0_54 = arith.constant 0 : index
    %c0_55 = arith.constant 0 : index
    %262 = vector.load %arg8[%c0_54, %c0_55] : memref<8x128xf32, #tpu.memory_space<vmem>>, vector<8x128xf32>
    tpu.vector_store %arg8[%c0_54, %c0_55], %261 {strides = array<i32>} : memref<8x128xf32, #tpu.memory_space<vmem>>, vector<8x128xf32>,
    %c0_i32_56 = arith.constant 0 : i32
    %263 = arith.cmpi eq, %arg1, %c0_i32_56 : i32
    %264 = arith.extui %263 : i1 to i32
    %c0_i32_57 = arith.constant 0 : i32
    %265 = arith.cmpi ne, %264, %c0_i32_57 : i32
    scf.if %265 {
      %c0_58 = arith.constant 0 : index
      %c0_59 = arith.constant 0 : index
      %266 = vector.load %arg5[%c0_58, %c0_59] : memref<128x5xf32, #tpu.memory_space<vmem>>, vector<128x5xf32>
      %cst_60 = arith.constant dense<0.000000e+00> : vector<8x5xf32>
      %267 = tpu.matmul %261, %266, %cst_60 {dimension_numbers = #tpu.dot_dimension_numbers<[1], [0], [0], [1], [0, 0, 1, 1], [], []>} : vector<8x128xf32>, vector<128x5xf32>, vector<8x5xf32> -> vector<8x5xf32>
      %c0_61 = arith.constant 0 : index
      %c0_62 = arith.constant 0 : index
      %268 = vector.load %arg6[%c0_61, %c0_62] : memref<1x5xf32, #tpu.memory_space<vmem>>, vector<1x5xf32>
      %269 = vector.broadcast %268 : vector<1x5xf32> to vector<8x5xf32>
      %270 = arith.addf %267, %269 : vector<8x5xf32>
      %c0_63 = arith.constant 0 : index
      %c0_64 = arith.constant 0 : index
      %271 = vector.load %arg7[%c0_63, %c0_64] : memref<8x5xf32, #tpu.memory_space<vmem>>, vector<8x5xf32>
      tpu.vector_store %arg7[%c0_63, %c0_64], %270 {strides = array<i32>} : memref<8x5xf32, #tpu.memory_space<vmem>>, vector<8x5xf32>,
    } else {
    }
    return
  }
  func.func @transform_0(%arg0: i32, %arg1: i32) -> (i32, i32, i32) {
    %c0_i32 = arith.constant 0 : i32
    %c0_i32_0 = arith.constant 0 : i32
    return %arg1, %arg0, %c0_i32 : i32, i32, i32
  }
  func.func @transform_1(%arg0: i32, %arg1: i32) -> (i32, i32) {
    %c0_i32 = arith.constant 0 : i32
    %c0_i32_0 = arith.constant 0 : i32
    %c0_i32_1 = arith.constant 0 : i32
    return %c0_i32, %c0_i32_0 : i32, i32
  }
  func.func @transform_2(%arg0: i32, %arg1: i32) -> (i32, i32) {
    %c0_i32 = arith.constant 0 : i32
    %c0_i32_0 = arith.constant 0 : i32
    %c0_i32_1 = arith.constant 0 : i32
    return %c0_i32, %c0_i32_0 : i32, i32
  }
  func.func @transform_3(%arg0: i32, %arg1: i32) -> (i32, i32) {
    %c0_i32 = arith.constant 0 : i32
    %c0_i32_0 = arith.constant 0 : i32
    %c0_i32_1 = arith.constant 0 : i32
    return %c0_i32, %c0_i32_0 : i32, i32
  }
  func.func @transform_4(%arg0: i32, %arg1: i32) -> (i32, i32) {
    %c0_i32 = arith.constant 0 : i32
    %c0_i32_0 = arith.constant 0 : i32
    %c0_i32_1 = arith.constant 0 : i32
    return %c0_i32, %c0_i32_0 : i32, i32
  }
  func.func @transform_5(%arg0: i32, %arg1: i32) -> (i32, i32) {
    %c0_i32 = arith.constant 0 : i32
    %c0_i32_0 = arith.constant 0 : i32
    return %arg0, %c0_i32 : i32, i32
  }
}

</mosaic_0001>

<bundles_post_ra>
// kernel: gru_forward.4
= control target key start
LH: loop header
LB: loop body
LE: loop exit
PB: predicated region body
PF: predicated region fallthrough
CT: control target
= control target key end

     0   :  { %vm36_vm0 = vcmask 130048   ;;  %s433_s1 = inlined_call_operand.vmem [shape: f32[16,384], index: 1, kind: input, shape index: {}]   ;;  %s434_s0 = inlined_call_operand.vmem [shape: f32[64,16], index: 0, kind: input, shape index: {}]   ;;  %s435_s2 = inlined_call_operand.vmem [shape: f32[1,384], index: 2, kind: input, shape index: {}]   ;;  %s436_s3 = inlined_call_operand.vmem [shape: f32[64,384], index: 3, kind: output, shape index: {}]  }
   0x1   :  { %v25_v0 = vld [vmem:[%s433_s1 + $0x18] sm:$0xff]  ;;  %v27_v1 = vld [vmem:[%s433_s1 + $0x28] sm:$0xff]  ;;  %v22_v2 = vld [vmem:[%s433_s1] sm:$0xff] }
   0x2   :  { %236 = vmatpush.msra.mxu3 %v25_v0  ;;  %157 = vmatpush.msra.mxu2 %v27_v1  ;;  %v24_v3 = vld [vmem:[%s433_s1 + $0x10] sm:$0xff]  ;;  %v26_v5 = vld [vmem:[%s433_s1 + $0x20] sm:$0xff]  ;;  %v23_v7 = vld [vmem:[%s433_s1 + $0x8] sm:$0xff] }
   0x3   :  { %v20_v4 = vld [vmem:[%s434_s0 + $0x30] sm:$0xff]  ;;  %v14_v6 = vld [vmem:[%s434_s0] sm:$0xff]  ;;  %75 = vmatpush.msra.mxu0 %v25_v0  ;;  %116 = vmatpush.msra.mxu1 %v26_v5  ;;  %v21_v8 = vld [vmem:[%s434_s0 + $0x38] sm:$0xff] }
   0x4   :  { %237 = vmatpush.msra.mxu3 %v22_v2  ;;  %158 = vmatpush.msra.mxu2 %v24_v3  ;;  %v15_v9 = vld [vmem:[%s434_s0 + $0x8] sm:$0xff]  ;;  %v16_v10 = vld [vmem:[%s434_s0 + $0x10] sm:$0xff]  ;;  %v17_v11 = vld [vmem:[%s434_s0 + $0x18] sm:$0xff] }
   0x5   :  { %218 = vmatmul.msk.f32.vlgmr.msra.gmra.mxu3 %vm36_vm0, %v20_v4  ;;  %228 = vmatmul.msk.f32.vlgmr.msra.gmra.mxu2 %vm36_vm0, %v14_v6  ;;  %v18_v12 = vld [vmem:[%s434_s0 + $0x20] sm:$0xff]  ;;  %v19_v13 = vld [vmem:[%s434_s0 + $0x28] sm:$0xff] }
   0x6   :  { %238 = vmatpush.msrb.mxu3 %v26_v5  ;;  %76 = vmatpush.msra.mxu0 %v22_v2  ;;  %v28_v14 = vld [vmem:[%s435_s2] sm:$0x7] }
   0x7   :  { %117 = vmatpush.msra.mxu1 %v23_v7  ;;  %212 = vmatmul.msk.f32.vlgmr.msra.gmra.mxu0 %vm36_vm0, %v14_v6  ;;  %v331_v15 = vperm.slane %v28_v14, 0  ;;  %v333_v16 = vperm.slane %v28_v14, 1  ;;  %v336_v20 = vperm.slane %v28_v14, 2 }
   0x8   :  { %220 = vmatmul.msk.f32.vlgmr.msra.gmra.mxu1 %vm36_vm0, %v14_v6  ;;  %239 = vmatpush.msrb.mxu3 %v23_v7 }
   0xa   :  { %240 = vmatpush.msra.mxu3 %v27_v1 }
   0xc   :  { %241 = vmatpush.msra.mxu3 %v24_v3 }
   0xd   :  { %219 = vmatmul.msk.f32.gmra.mxu3 %vm36_vm0, %v21_v8  ;;  %229 = vmatmul.msk.f32.gmra.mxu2 %vm36_vm0, %v15_v9 }
   0xf   :  { %213 = vmatmul.msk.f32.gmra.mxu0 %vm36_vm0, %v15_v9 }
  0x10   :  { %221 = vmatmul.msk.f32.gmra.mxu1 %vm36_vm0, %v15_v9 }
  0x15   :  { %226 = vmatmul.msk.f32.vlgmr.msrb.gmra.mxu3 %vm36_vm0, %v20_v4  ;;  %230 = vmatmul.msk.f32.gmra.mxu2 %vm36_vm0, %v16_v10 }
  0x17   :  { %214 = vmatmul.msk.f32.gmra.mxu0 %vm36_vm0, %v16_v10 }
  0x18   :  { %222 = vmatmul.msk.f32.gmra.mxu1 %vm36_vm0, %v16_v10 }
  0x1d   :  { %227 = vmatmul.msk.f32.gmra.mxu3 %vm36_vm0, %v21_v8  ;;  %231 = vmatmul.msk.f32.gmra.mxu2 %vm36_vm0, %v17_v11 }
  0x1f   :  { %215 = vmatmul.msk.f32.gmra.mxu0 %vm36_vm0, %v17_v11 }
  0x20   :  { %223 = vmatmul.msk.f32.gmra.mxu1 %vm36_vm0, %v17_v11 }
  0x25   :  { %232 = vmatmul.msk.f32.gmra.mxu2 %vm36_vm0, %v18_v12  ;;  %234 = vmatmul.msk.f32.vlgmr.msra.gmra.mxu3 %vm36_vm0, %v20_v4 }
  0x27   :  { %216 = vmatmul.msk.f32.gmra.mxu0 %vm36_vm0, %v18_v12 }
  0x28   :  { %224 = vmatmul.msk.f32.gmra.mxu1 %vm36_vm0, %v18_v12 }
  0x2d   :  { %233 = vmatmul.msk.f32.gmra.mxu2 %vm36_vm0, %v19_v13  ;;  %235 = vmatmul.msk.f32.gmra.mxu3 %vm36_vm0, %v21_v8 }
  0x2f   :  { %217 = vmatmul.msk.f32.gmra.mxu0 %vm36_vm0, %v19_v13 }
  0x30   :  { %225 = vmatmul.msk.f32.gmra.mxu1 %vm36_vm0, %v19_v13 }
  0x84   :  { %v78_v17 = vpop.f32.mrf.mxu0 }
  0x85   :  { %v79_v18 = vadd.f32 %v78_v17, %v331_v15  ;;  %v119_v19 = vpop.f32.mrf.mxu1 }
  0x86   :  { %v120_v21 = vadd.f32 %v119_v19, %v333_v16 }
  0x87   :  { %184 = vst [vmem:[%s436_s3] sm:$0xff] %v79_v18 }
  0x88   :  { %v96_v22 = vpop.f32.mrf.mxu3  ;;  %185 = vst [vmem:[%s436_s3 + $0x8] sm:$0xff] %v120_v21  ;;  %v160_v23 = vpop.f32.mrf.mxu2 }
  0x89   :  { %v97_v24 = vadd.f32 %v96_v22, %v331_v15  ;;  %v161_v25 = vadd.f32 %v160_v23, %v336_v20 }
  0x8b   :  { %202 = vst [vmem:[%s436_s3 + $0x90] sm:$0xff] %v97_v24 }
  0x8c   :  { %186 = vst [vmem:[%s436_s3 + $0x10] sm:$0xff] %v161_v25  ;;  %v81_v26 = vpop.f32.mrf.mxu0 }
  0x8d   :  { %v82_v27 = vadd.f32 %v81_v26, %v331_v15  ;;  %v122_v28 = vpop.f32.mrf.mxu1 }
  0x8e   :  { %v123_v29 = vadd.f32 %v122_v28, %v333_v16 }
  0x8f   :  { %187 = vst [vmem:[%s436_s3 + $0x18] sm:$0xff] %v82_v27 }
  0x90   :  { %v99_v30 = vpop.f32.mrf.mxu3  ;;  %188 = vst [vmem:[%s436_s3 + $0x20] sm:$0xff] %v123_v29  ;;  %v163_v31 = vpop.f32.mrf.mxu2 }
  0x91   :  { %v100_v32 = vadd.f32 %v99_v30, %v331_v15  ;;  %v164_v33 = vadd.f32 %v163_v31, %v336_v20 }
  0x93   :  { %205 = vst [vmem:[%s436_s3 + $0xa8] sm:$0xff] %v100_v32 }
  0x94   :  { %189 = vst [vmem:[%s436_s3 + $0x28] sm:$0xff] %v164_v33  ;;  %v84_v34 = vpop.f32.mrf.mxu0 }
  0x95   :  { %v85_v35 = vadd.f32 %v84_v34, %v331_v15  ;;  %v125_v36 = vpop.f32.mrf.mxu1 }
  0x96   :  { %v126_v37 = vadd.f32 %v125_v36, %v333_v16 }
  0x97   :  { %190 = vst [vmem:[%s436_s3 + $0x30] sm:$0xff] %v85_v35 }
  0x98   :  { %191 = vst [vmem:[%s436_s3 + $0x38] sm:$0xff] %v126_v37  ;;  %v137_v38 = vpop.f32.mrf.mxu3  ;;  %v166_v39 = vpop.f32.mrf.mxu2 }
  0x99   :  { %v138_v40 = vadd.f32 %v137_v38, %v333_v16  ;;  %v167_v41 = vadd.f32 %v166_v39, %v336_v20 }
  0x9b   :  { %203 = vst [vmem:[%s436_s3 + $0x98] sm:$0xff] %v138_v40 }
  0x9c   :  { %192 = vst [vmem:[%s436_s3 + $0x40] sm:$0xff] %v167_v41  ;;  %v87_v42 = vpop.f32.mrf.mxu0 }
  0x9d   :  { %v88_v43 = vadd.f32 %v87_v42, %v331_v15  ;;  %v128_v44 = vpop.f32.mrf.mxu1 }
  0x9e   :  { %v129_v45 = vadd.f32 %v128_v44, %v333_v16 }
  0x9f   :  { %193 = vst [vmem:[%s436_s3 + $0x48] sm:$0xff] %v88_v43 }
  0xa0   :  { %194 = vst [vmem:[%s436_s3 + $0x50] sm:$0xff] %v129_v45  ;;  %v140_v46 = vpop.f32.mrf.mxu3  ;;  %v169_v47 = vpop.f32.mrf.mxu2 }
  0xa1   :  { %v141_v48 = vadd.f32 %v140_v46, %v333_v16  ;;  %v170_v49 = vadd.f32 %v169_v47, %v336_v20 }
  0xa3   :  { %206 = vst [vmem:[%s436_s3 + $0xb0] sm:$0xff] %v141_v48 }
  0xa4   :  { %195 = vst [vmem:[%s436_s3 + $0x58] sm:$0xff] %v170_v49  ;;  %v90_v50 = vpop.f32.mrf.mxu0 }
  0xa5   :  { %v91_v51 = vadd.f32 %v90_v50, %v331_v15  ;;  %v131_v52 = vpop.f32.mrf.mxu1 }
  0xa6   :  { %v132_v53 = vadd.f32 %v131_v52, %v333_v16 }
  0xa7   :  { %196 = vst [vmem:[%s436_s3 + $0x60] sm:$0xff] %v91_v51 }
  0xa8   :  { %197 = vst [vmem:[%s436_s3 + $0x68] sm:$0xff] %v132_v53  ;;  %v172_v54 = vpop.f32.mrf.mxu2  ;;  %v178_v55 = vpop.f32.mrf.mxu3 }
  0xa9   :  { %v173_v56 = vadd.f32 %v172_v54, %v336_v20  ;;  %v179_v57 = vadd.f32 %v178_v55, %v336_v20 }
  0xab   :  { %198 = vst [vmem:[%s436_s3 + $0x70] sm:$0xff] %v173_v56 }
  0xac   :  { %204 = vst [vmem:[%s436_s3 + $0xa0] sm:$0xff] %v179_v57  ;;  %v93_v58 = vpop.f32.mrf.mxu0 }
  0xad   :  { %v94_v59 = vadd.f32 %v93_v58, %v331_v15  ;;  %v134_v60 = vpop.f32.mrf.mxu1 }
  0xae   :  { %v135_v61 = vadd.f32 %v134_v60, %v333_v16 }
  0xaf   :  { %199 = vst [vmem:[%s436_s3 + $0x78] sm:$0xff] %v94_v59 }
  0xb0   :  { %200 = vst [vmem:[%s436_s3 + $0x80] sm:$0xff] %v135_v61  ;;  %v175_v62 = vpop.f32.mrf.mxu2  ;;  %v181_v63 = vpop.f32.mrf.mxu3 }
  0xb1   :  { %v176_v0 = vadd.f32 %v175_v62, %v336_v20  ;;  %v182_v1 = vadd.f32 %v181_v63, %v336_v20 }
  0xb3   :  { %201 = vst [vmem:[%s436_s3 + $0x88] sm:$0xff] %v176_v0 }
  0xb4   :  { %207 = vst [vmem:[%s436_s3 + $0xb8] sm:$0xff] %v182_v1 }

// kernel: gru_forward.6
= control target key start
LH: loop header
LB: loop body
LE: loop exit
PB: predicated region body
PF: predicated region fallthrough
CT: control target
= control target key end

     0   :  { %8 = vsyncpa [#allocation3], 0  ;;  %s307_s15 = smov [#allocation2]   ;;  %s308_s17 = smov 384   ;;  %s504_s0 = inlined_call_operand.vmem [shape: f32[64,128], index: 0, kind: input, shape index: {}]   ;;  %s505_s1 = inlined_call_operand.hbm [shape: f32[128,384], index: 1, kind: input, shape index: {}]   ;;  %s506_s2 = inlined_call_operand.vmem [shape: f32[1,384], index: 2, kind: input, shape index: {}]   ;;  %s507_s3 = inlined_call_operand.vmem [shape: f32[64,384], index: 3, kind: output, shape index: {}]  }
   0x1   :  { %s15_s14 = sshll.u32 %s505_s1, 4  ;;  %s17_s16 = sshll.u32 %s307_s15, 4  ;;  %s16_s14 = int_to_ptr.hbm [resolvable:$true] %s15_s14  ;;  %s18_s16 = int_to_ptr.vmem [resolvable:$true] %s17_s16 }
   0x2   :  { %s309_s18 = smov 24  }
   0x3   :  { %23 = dma.hbm_to_vmem [thread:$0]  %s16_s14, 6144, %s18_s16, [#allocation3], %s308_s17, %s308_s17, %s309_s18  }
   0x4   :  { %305 = dma.done.wait [#allocation3], 6144  }
   0x5   :  { %306 = vsyncadd [#allocation3], 4294961152  ;;  %v85_v0 = vld [vmem:[#allocation2 + $0x178] sm:$0xff]  ;;  %v82_v1 = vld [vmem:[#allocation2 + $0x160] sm:$0xff] }
   0x6   :  { %176 = vmatpush.msra.mxu2 %v85_v0  ;;  %v79_v2 = vld [vmem:[#allocation2 + $0x148] sm:$0xff]  ;;  %v333_v3 = vld [vmem:[#allocation2 + $0x170] sm:$0xff]  ;;  %v336_v4 = vld [vmem:[#allocation2 + $0x158] sm:$0xff] }
   0x7   :  { %135 = vmatpush.msra.mxu1 %v333_v3  ;;  %v76_v5 = vld [vmem:[#allocation2 + $0x130] sm:$0xff]  ;;  %v338_v6 = vld [vmem:[#allocation2 + $0x140] sm:$0xff]  ;;  %v83_v7 = vld [vmem:[#allocation2 + $0x168] sm:$0xff] }
   0x8   :  { %177 = vmatpush.msra.mxu2 %v82_v1  ;;  %v73_v8 = vld [vmem:[#allocation2 + $0x118] sm:$0xff]  ;;  %v341_v9 = vld [vmem:[#allocation2 + $0x128] sm:$0xff]  ;;  %94 = vmatpush.msra.mxu0 %v83_v7  ;;  %v80_v10 = vld [vmem:[#allocation2 + $0x150] sm:$0xff] }
   0x9   :  { %136 = vmatpush.msra.mxu1 %v336_v4  ;;  %246 = vmatpush.msra.mxu3 %v83_v7  ;;  %v77_v11 = vld [vmem:[#allocation2 + $0x138] sm:$0xff]  ;;  %v70_v12 = vld [vmem:[#allocation2 + $0x100] sm:$0xff]  ;;  %v344_v13 = vld [vmem:[#allocation2 + $0x110] sm:$0xff] }
   0xa   :  { %178 = vmatpush.msra.mxu2 %v79_v2  ;;  %95 = vmatpush.msra.mxu0 %v80_v10  ;;  %v74_v14 = vld [vmem:[#allocation2 + $0x120] sm:$0xff]  ;;  %v67_v15 = vld [vmem:[#allocation2 + $0xe8] sm:$0xff]  ;;  %v347_v16 = vld [vmem:[#allocation2 + $0xf8] sm:$0xff] }
   0xb   :  { %137 = vmatpush.msra.mxu1 %v338_v6  ;;  %247 = vmatpush.msra.mxu3 %v80_v10  ;;  %v71_v17 = vld [vmem:[#allocation2 + $0x108] sm:$0xff]  ;;  %v64_v18 = vld [vmem:[#allocation2 + $0xd0] sm:$0xff]  ;;  %v350_v19 = vld [vmem:[#allocation2 + $0xe0] sm:$0xff] }
   0xc   :  { %179 = vmatpush.msra.mxu2 %v76_v5  ;;  %96 = vmatpush.msra.mxu0 %v77_v11  ;;  %v68_v20 = vld [vmem:[#allocation2 + $0xf0] sm:$0xff]  ;;  %v61_v21 = vld [vmem:[#allocation2 + $0xb8] sm:$0xff]  ;;  %v353_v22 = vld [vmem:[#allocation2 + $0xc8] sm:$0xff] }
   0xd   :  { %138 = vmatpush.msra.mxu1 %v341_v9  ;;  %248 = vmatpush.msra.mxu3 %v77_v11  ;;  %v65_v23 = vld [vmem:[#allocation2 + $0xd8] sm:$0xff]  ;;  %v58_v24 = vld [vmem:[#allocation2 + $0xa0] sm:$0xff]  ;;  %v356_v25 = vld [vmem:[#allocation2 + $0xb0] sm:$0xff] }
   0xe   :  { %180 = vmatpush.msra.mxu2 %v73_v8  ;;  %97 = vmatpush.msra.mxu0 %v74_v14  ;;  %v62_v26 = vld [vmem:[#allocation2 + $0xc0] sm:$0xff]  ;;  %v55_v27 = vld [vmem:[#allocation2 + $0x88] sm:$0xff]  ;;  %v359_v28 = vld [vmem:[#allocation2 + $0x98] sm:$0xff] }
   0xf   :  { %139 = vmatpush.msra.mxu1 %v344_v13  ;;  %249 = vmatpush.msra.mxu3 %v74_v14  ;;  %v59_v29 = vld [vmem:[#allocation2 + $0xa8] sm:$0xff]  ;;  %v52_v30 = vld [vmem:[#allocation2 + $0x70] sm:$0xff]  ;;  %v362_v31 = vld [vmem:[#allocation2 + $0x80] sm:$0xff] }
  0x10   :  { %181 = vmatpush.msra.mxu2 %v70_v12  ;;  %98 = vmatpush.msra.mxu0 %v71_v17  ;;  %v56_v32 = vld [vmem:[#allocation2 + $0x90] sm:$0xff]  ;;  %v49_v33 = vld [vmem:[#allocation2 + $0x58] sm:$0xff]  ;;  %v365_v34 = vld [vmem:[#allocation2 + $0x68] sm:$0xff] }
  0x11   :  { %140 = vmatpush.msra.mxu1 %v347_v16  ;;  %250 = vmatpush.msra.mxu3 %v71_v17  ;;  %v53_v35 = vld [vmem:[#allocation2 + $0x78] sm:$0xff]  ;;  %v46_v36 = vld [vmem:[#allocation2 + $0x40] sm:$0xff]  ;;  %v368_v37 = vld [vmem:[#allocation2 + $0x50] sm:$0xff] }
  0x12   :  { %182 = vmatpush.msra.mxu2 %v67_v15  ;;  %99 = vmatpush.msra.mxu0 %v68_v20  ;;  %v50_v38 = vld [vmem:[#allocation2 + $0x60] sm:$0xff]  ;;  %v43_v39 = vld [vmem:[#allocation2 + $0x28] sm:$0xff]  ;;  %v45_v40 = vld [vmem:[#allocation2 + $0x38] sm:$0xff] }
  0x13   :  { %141 = vmatpush.msra.mxu1 %v350_v19  ;;  %251 = vmatpush.msra.mxu3 %v68_v20  ;;  %v47_v41 = vld [vmem:[#allocation2 + $0x48] sm:$0xff]  ;;  %v40_v42 = vld [vmem:[#allocation2 + $0x10] sm:$0xff]  ;;  %v42_v43 = vld [vmem:[#allocation2 + $0x20] sm:$0xff] }
  0x14   :  { %183 = vmatpush.msra.mxu2 %v64_v18  ;;  %100 = vmatpush.msra.mxu0 %v65_v23  ;;  %v30_v44 = vld [vmem:[%s504_s0] sm:$0xff]  ;;  %v44_v45 = vld [vmem:[#allocation2 + $0x30] sm:$0xff]  ;;  %v39_v46 = vld [vmem:[#allocation2 + $0x8] sm:$0xff] }
  0x15   :  { %142 = vmatpush.msra.mxu1 %v353_v22  ;;  %252 = vmatpush.msra.mxu3 %v65_v23  ;;  %v41_v47 = vld [vmem:[#allocation2 + $0x18] sm:$0xff]  ;;  %v38_v48 = vld [vmem:[#allocation2] sm:$0xff]  ;;  %v36_v49 = vld [vmem:[%s504_s0 + $0x30] sm:$0xff] }
  0x16   :  { %184 = vmatpush.msra.mxu2 %v61_v21  ;;  %101 = vmatpush.msra.mxu0 %v62_v26  ;;  %v31_v50 = vld [vmem:[%s504_s0 + $0x8] sm:$0xff]  ;;  %v37_v51 = vld [vmem:[%s504_s0 + $0x38] sm:$0xff]  ;;  %v32_v52 = vld [vmem:[%s504_s0 + $0x10] sm:$0xff] }
  0x17   :  { %143 = vmatpush.msra.mxu1 %v356_v25  ;;  %253 = vmatpush.msra.mxu3 %v62_v26  ;;  %v33_v53 = vld [vmem:[%s504_s0 + $0x18] sm:$0xff]  ;;  %v34_v54 = vld [vmem:[%s504_s0 + $0x20] sm:$0xff]  ;;  %v35_v55 = vld [vmem:[%s504_s0 + $0x28] sm:$0xff] }
  0x18   :  { %185 = vmatpush.msra.mxu2 %v58_v24  ;;  %102 = vmatpush.msra.mxu0 %v59_v29  ;;  %v86_v56 = vld [vmem:[%s506_s2] sm:$0x7] }
  0x19   :  { %144 = vmatpush.msra.mxu1 %v359_v28  ;;  %254 = vmatpush.msra.mxu3 %v59_v29  ;;  %v412_v57 = vperm.slane %v86_v56, 1  ;;  %v88_v59 = vperm.slane %v86_v56, 0  ;;  %v414_v60 = vperm.slane %v86_v56, 2 }
  0x1a   :  { %186 = vmatpush.msra.mxu2 %v55_v27  ;;  %103 = vmatpush.msra.mxu0 %v56_v32 }
  0x1b   :  { %145 = vmatpush.msra.mxu1 %v362_v31  ;;  %255 = vmatpush.msra.mxu3 %v56_v32 }
  0x1c   :  { %187 = vmatpush.msra.mxu2 %v52_v30  ;;  %104 = vmatpush.msra.mxu0 %v53_v35 }
  0x1d   :  { %146 = vmatpush.msra.mxu1 %v365_v34  ;;  %256 = vmatpush.msra.mxu3 %v53_v35 }
  0x1e   :  { %188 = vmatpush.msra.mxu2 %v49_v33  ;;  %105 = vmatpush.msra.mxu0 %v50_v38 }
  0x1f   :  { %147 = vmatpush.msra.mxu1 %v368_v37  ;;  %257 = vmatpush.msra.mxu3 %v50_v38 }
  0x20   :  { %189 = vmatpush.msra.mxu2 %v46_v36  ;;  %106 = vmatpush.msra.mxu0 %v47_v41 }
  0x21   :  { %148 = vmatpush.msra.mxu1 %v45_v40  ;;  %258 = vmatpush.msra.mxu3 %v47_v41 }
  0x22   :  { %190 = vmatpush.msra.mxu2 %v43_v39  ;;  %107 = vmatpush.msra.mxu0 %v44_v45 }
  0x23   :  { %149 = vmatpush.msra.mxu1 %v42_v43  ;;  %259 = vmatpush.msra.mxu3 %v44_v45 }
  0x24   :  { %191 = vmatpush.msra.mxu2 %v40_v42  ;;  %108 = vmatpush.msra.mxu0 %v41_v47 }
  0x25   :  { %192 = vmatmul.f32.vlgmr.msra.gmra.mxu2 %v30_v44  ;;  %150 = vmatpush.msra.mxu1 %v39_v46 }
  0x26   :  { %151 = vmatmul.f32.vlgmr.msra.gmra.mxu1 %v30_v44  ;;  %260 = vmatpush.msra.mxu3 %v41_v47 }
  0x27   :  { %109 = vmatpush.msra.mxu0 %v38_v48 }
  0x28   :  { %110 = vmatmul.f32.vlgmr.msra.gmra.mxu0 %v30_v44  ;;  %261 = vmatpush.msra.mxu3 %v38_v48 }
  0x29   :  { %128 = vmatmul.f32.vlgmr.msra.gmra.mxu3 %v36_v49 }
  0x2a   :  { %262 = vmatpush.msrb.mxu3 %v333_v3 }
  0x2c   :  { %263 = vmatpush.msrb.mxu3 %v336_v4 }
  0x2d   :  { %195 = vmatmul.f32.gmra.mxu2 %v31_v50 }
  0x2e   :  { %154 = vmatmul.f32.gmra.mxu1 %v31_v50  ;;  %264 = vmatpush.msrb.mxu3 %v338_v6 }
  0x30   :  { %265 = vmatpush.msrb.mxu3 %v341_v9  ;;  %113 = vmatmul.f32.gmra.mxu0 %v31_v50 }
  0x31   :  { %131 = vmatmul.f32.gmra.mxu3 %v37_v51 }
  0x32   :  { %266 = vmatpush.msrb.mxu3 %v344_v13 }
  0x34   :  { %267 = vmatpush.msrb.mxu3 %v347_v16 }
  0x35   :  { %198 = vmatmul.f32.gmra.mxu2 %v32_v52 }
  0x36   :  { %157 = vmatmul.f32.gmra.mxu1 %v32_v52  ;;  %268 = vmatpush.msrb.mxu3 %v350_v19 }
  0x38   :  { %269 = vmatpush.msrb.mxu3 %v353_v22  ;;  %116 = vmatmul.f32.gmra.mxu0 %v32_v52 }
  0x3a   :  { %270 = vmatpush.msrb.mxu3 %v356_v25 }
  0x3c   :  { %271 = vmatpush.msrb.mxu3 %v359_v28 }
  0x3d   :  { %201 = vmatmul.f32.gmra.mxu2 %v33_v53 }
  0x3e   :  { %160 = vmatmul.f32.gmra.mxu1 %v33_v53  ;;  %272 = vmatpush.msrb.mxu3 %v362_v31 }
  0x40   :  { %273 = vmatpush.msrb.mxu3 %v365_v34  ;;  %119 = vmatmul.f32.gmra.mxu0 %v33_v53 }
  0x42   :  { %274 = vmatpush.msrb.mxu3 %v368_v37 }
  0x44   :  { %275 = vmatpush.msrb.mxu3 %v45_v40 }
  0x45   :  { %204 = vmatmul.f32.gmra.mxu2 %v34_v54 }
  0x46   :  { %163 = vmatmul.f32.gmra.mxu1 %v34_v54  ;;  %276 = vmatpush.msrb.mxu3 %v42_v43 }
  0x48   :  { %277 = vmatpush.msrb.mxu3 %v39_v46  ;;  %122 = vmatmul.f32.gmra.mxu0 %v34_v54 }
  0x49   :  { %172 = vmatmul.f32.vlgmr.msrb.gmra.mxu3 %v37_v51 }
  0x4d   :  { %207 = vmatmul.f32.gmra.mxu2 %v35_v55 }
  0x4e   :  { %166 = vmatmul.f32.gmra.mxu1 %v35_v55 }
  0x50   :  { %125 = vmatmul.f32.gmra.mxu0 %v35_v55 }
  0x55   :  { %210 = vmatmul.f32.gmra.mxu2 %v36_v49 }
  0x56   :  { %169 = vmatmul.f32.gmra.mxu1 %v36_v49 }
  0x5d   :  { %213 = vmatmul.f32.gmra.mxu2 %v37_v51 }
  0xa3   :  { %v152_v58 = vpop.f32.mrf.mxu1 }
  0xa4   :  { %v153_v61 = vadd.f32 %v152_v58, %v412_v57 }
  0xa5   :  { %v111_v62 = vpop.f32.mrf.mxu0 }
  0xa6   :  { %218 = vst [vmem:[%s507_s3 + $0x8] sm:$0xff] %v153_v61  ;;  %v112_v0 = vadd.f32 %v111_v62, %v88_v59 }
  0xa8   :  { %v193_v63 = vpop.f32.mrf.mxu2  ;;  %217 = vst [vmem:[%s507_s3] sm:$0xff] %v112_v0 }
  0xa9   :  { %v194_v1 = vadd.f32 %v193_v63, %v414_v60 }
  0xab   :  { %219 = vst [vmem:[%s507_s3 + $0x10] sm:$0xff] %v194_v1  ;;  %v155_v2 = vpop.f32.mrf.mxu1 }
  0xac   :  { %v156_v3 = vadd.f32 %v155_v2, %v412_v57  ;;  %v129_v5 = vpop.f32.mrf.mxu3 }
  0xad   :  { %v114_v4 = vpop.f32.mrf.mxu0  ;;  %v130_v8 = vadd.f32 %v129_v5, %v88_v59 }
  0xae   :  { %221 = vst [vmem:[%s507_s3 + $0x20] sm:$0xff] %v156_v3  ;;  %v115_v7 = vadd.f32 %v114_v4, %v88_v59 }
  0xaf   :  { %235 = vst [vmem:[%s507_s3 + $0x90] sm:$0xff] %v130_v8 }
  0xb0   :  { %v196_v6 = vpop.f32.mrf.mxu2  ;;  %220 = vst [vmem:[%s507_s3 + $0x18] sm:$0xff] %v115_v7 }
  0xb1   :  { %v197_v9 = vadd.f32 %v196_v6, %v414_v60 }
  0xb3   :  { %222 = vst [vmem:[%s507_s3 + $0x28] sm:$0xff] %v197_v9  ;;  %v158_v10 = vpop.f32.mrf.mxu1 }
  0xb4   :  { %v159_v11 = vadd.f32 %v158_v10, %v412_v57  ;;  %v132_v13 = vpop.f32.mrf.mxu3 }
  0xb5   :  { %v117_v12 = vpop.f32.mrf.mxu0  ;;  %v133_v16 = vadd.f32 %v132_v13, %v88_v59 }
  0xb6   :  { %224 = vst [vmem:[%s507_s3 + $0x38] sm:$0xff] %v159_v11  ;;  %v118_v15 = vadd.f32 %v117_v12, %v88_v59 }
  0xb7   :  { %238 = vst [vmem:[%s507_s3 + $0xa8] sm:$0xff] %v133_v16 }
  0xb8   :  { %v199_v14 = vpop.f32.mrf.mxu2  ;;  %223 = vst [vmem:[%s507_s3 + $0x30] sm:$0xff] %v118_v15 }
  0xb9   :  { %v200_v17 = vadd.f32 %v199_v14, %v414_v60 }
  0xbb   :  { %225 = vst [vmem:[%s507_s3 + $0x40] sm:$0xff] %v200_v17  ;;  %v161_v18 = vpop.f32.mrf.mxu1 }
  0xbc   :  { %v162_v19 = vadd.f32 %v161_v18, %v412_v57 }
  0xbd   :  { %v120_v20 = vpop.f32.mrf.mxu0 }
  0xbe   :  { %227 = vst [vmem:[%s507_s3 + $0x50] sm:$0xff] %v162_v19  ;;  %v121_v22 = vadd.f32 %v120_v20, %v88_v59 }
  0xc0   :  { %v202_v21 = vpop.f32.mrf.mxu2  ;;  %226 = vst [vmem:[%s507_s3 + $0x48] sm:$0xff] %v121_v22 }
  0xc1   :  { %v203_v23 = vadd.f32 %v202_v21, %v414_v60 }
  0xc3   :  { %228 = vst [vmem:[%s507_s3 + $0x58] sm:$0xff] %v203_v23  ;;  %v164_v24 = vpop.f32.mrf.mxu1 }
  0xc4   :  { %v165_v25 = vadd.f32 %v164_v24, %v412_v57 }
  0xc5   :  { %v123_v26 = vpop.f32.mrf.mxu0 }
  0xc6   :  { %230 = vst [vmem:[%s507_s3 + $0x68] sm:$0xff] %v165_v25  ;;  %v124_v28 = vadd.f32 %v123_v26, %v88_v59 }
  0xc8   :  { %v205_v27 = vpop.f32.mrf.mxu2  ;;  %229 = vst [vmem:[%s507_s3 + $0x60] sm:$0xff] %v124_v28 }
  0xc9   :  { %v206_v29 = vadd.f32 %v205_v27, %v414_v60 }
  0xcb   :  { %231 = vst [vmem:[%s507_s3 + $0x70] sm:$0xff] %v206_v29  ;;  %v167_v30 = vpop.f32.mrf.mxu1 }
  0xcc   :  { %v168_v31 = vadd.f32 %v167_v30, %v412_v57  ;;  %v173_v32 = vpop.f32.mrf.mxu3 }
  0xcd   :  { %v174_v33 = vadd.f32 %v173_v32, %v412_v57  ;;  %v126_v34 = vpop.f32.mrf.mxu0 }
  0xce   :  { %233 = vst [vmem:[%s507_s3 + $0x80] sm:$0xff] %v168_v31  ;;  %v127_v36 = vadd.f32 %v126_v34, %v88_v59 }
  0xcf   :  { %239 = vst [vmem:[%s507_s3 + $0xb0] sm:$0xff] %v174_v33 }
  0xd0   :  { %v208_v35 = vpop.f32.mrf.mxu2  ;;  %232 = vst [vmem:[%s507_s3 + $0x78] sm:$0xff] %v127_v36 }
  0xd1   :  { %v209_v37 = vadd.f32 %v208_v35, %v414_v60 }
  0xd3   :  { %234 = vst [vmem:[%s507_s3 + $0x88] sm:$0xff] %v209_v37  ;;  %v170_v38 = vpop.f32.mrf.mxu1 }
  0xd4   :  { %v171_v39 = vadd.f32 %v170_v38, %v412_v57 }
  0xd6   :  { %236 = vst [vmem:[%s507_s3 + $0x98] sm:$0xff] %v171_v39 }
  0xd8   :  { %v211_v40 = vpop.f32.mrf.mxu2 }
  0xd9   :  { %v212_v41 = vadd.f32 %v211_v40, %v414_v60 }
  0xdb   :  { %237 = vst [vmem:[%s507_s3 + $0xa0] sm:$0xff] %v212_v41 }
  0xe0   :  { %v214_v42 = vpop.f32.mrf.mxu2 }
  0xe1   :  { %v215_v43 = vadd.f32 %v214_v42, %v414_v60 }
  0xe3   :  { %240 = vst [vmem:[%s507_s3 + $0xb8] sm:$0xff] %v215_v43 }
  0xe4   :  { %245 = vsyncpa [#allocation3], 1 }

// kernel: gru_forward.5
= control target key start
LH: loop header
LB: loop body
LE: loop exit
PB: predicated region body
PF: predicated region fallthrough
CT: control target
= control target key end

     0   :  { %8 = vsyncpa [#allocation4], 0  ;;  %s1208_s15 = smov [#allocation3]   ;;  %s1209_s17 = smov 384   ;;  %s1864_s0 = inlined_call_operand.vmem [shape: f32[8,8,384], index: 0, kind: input, shape index: {}]   ;;  %s1865_s1 = inlined_call_operand.hbm [shape: f32[128,384], index: 1, kind: input, shape index: {}]   ;;  %s1866_s2 = inlined_call_operand.vmem [shape: f32[1,128], index: 2, kind: input, shape index: {}]   ;;  %s1867_s3 = inlined_call_operand.vmem [shape: f32[8,8,128], index: 3, kind: output, shape index: {}]  }
   0x1   :  { %s15_s14 = sshll.u32 %s1865_s1, 4  ;;  %s17_s16 = sshll.u32 %s1208_s15, 4  ;;  %s16_s14 = int_to_ptr.hbm [resolvable:$true] %s15_s14  ;;  %s18_s16 = int_to_ptr.vmem [resolvable:$true] %s17_s16 }
   0x2   :  { %s1210_s18 = smov 24  }
   0x3   :  { %23 = dma.hbm_to_vmem [thread:$0]  %s16_s14, 6144, %s18_s16, [#allocation4], %s1209_s17, %s1209_s17, %s1210_s18  }
   0x4   :  { %1206 = dma.done.wait [#allocation4], 6144  }
   0x5   :  { %1207 = vsyncadd [#allocation4], 4294961152  ;;  %v1235_v0 = vld [vmem:[#allocation3 + $0x168] sm:$0xff]  ;;  %v1237_v1 = vld [vmem:[#allocation3 + $0x170] sm:$0xff]  ;;  %v1211_v44 = vmov 0.0  }
   0x6   :  { %v1239_v2 = vld [vmem:[#allocation3 + $0x150] sm:$0xff]  ;;  %88 = vmatpush.msra.mxu0 %v1235_v0  ;;  %108 = vmatpush.msra.mxu1 %v1237_v1  ;;  %v1243_v3 = vld [vmem:[#allocation3 + $0x158] sm:$0xff]  ;;  %v1247_v5 = vld [vmem:[#allocation3 + $0x140] sm:$0xff] }
   0x7   :  { %v1245_v4 = vld [vmem:[#allocation3 + $0x138] sm:$0xff]  ;;  %204 = vmatpush.msra.mxu3 %v1235_v0  ;;  %v1252_v6 = vld [vmem:[#allocation3 + $0x120] sm:$0xff]  ;;  %v1254_v7 = vld [vmem:[#allocation3 + $0x128] sm:$0xff] }
   0x8   :  { %89 = vmatpush.msra.mxu0 %v1239_v2  ;;  %109 = vmatpush.msra.mxu1 %v1243_v3  ;;  %v1259_v8 = vld [vmem:[#allocation3 + $0x108] sm:$0xff]  ;;  %v1261_v9 = vld [vmem:[#allocation3 + $0x110] sm:$0xff]  ;;  %v1268_v11 = vld [vmem:[#allocation3 + $0xf8] sm:$0xff] }
   0x9   :  { %205 = vmatpush.msra.mxu3 %v1239_v2  ;;  %v1266_v10 = vld [vmem:[#allocation3 + $0xf0] sm:$0xff]  ;;  %v1270_v12 = vld [vmem:[#allocation3 + $0x178] sm:$0xff]  ;;  %v1275_v13 = vld [vmem:[#allocation3 + $0x160] sm:$0xff] }
   0xa   :  { %90 = vmatpush.msra.mxu0 %v1245_v4  ;;  %110 = vmatpush.msra.mxu1 %v1247_v5  ;;  %v1277_v14 = vld [vmem:[#allocation3 + $0xd8] sm:$0xff]  ;;  %v1279_v15 = vld [vmem:[#allocation3 + $0xe0] sm:$0xff]  ;;  %v1285_v16 = vld [vmem:[#allocation3 + $0x148] sm:$0xff] }
   0xb   :  { %206 = vmatpush.msra.mxu3 %v1245_v4  ;;  %128 = vmatpush.msra.mxu2 %v1270_v12  ;;  %v1287_v17 = vld [vmem:[#allocation3 + $0xc0] sm:$0xff]  ;;  %v1289_v18 = vld [vmem:[#allocation3 + $0xc8] sm:$0xff]  ;;  %v1295_v19 = vld [vmem:[#allocation3 + $0x130] sm:$0xff] }
   0xc   :  { %91 = vmatpush.msra.mxu0 %v1252_v6  ;;  %111 = vmatpush.msra.mxu1 %v1254_v7  ;;  %v1297_v20 = vld [vmem:[#allocation3 + $0xa8] sm:$0xff]  ;;  %v1299_v21 = vld [vmem:[#allocation3 + $0xb0] sm:$0xff]  ;;  %v1305_v22 = vld [vmem:[#allocation3 + $0x118] sm:$0xff] }
   0xd   :  { %207 = vmatpush.msra.mxu3 %v1252_v6  ;;  %129 = vmatpush.msra.mxu2 %v1275_v13  ;;  %v1307_v23 = vld [vmem:[#allocation3 + $0x90] sm:$0xff]  ;;  %v1309_v24 = vld [vmem:[#allocation3 + $0x98] sm:$0xff]  ;;  %v1315_v25 = vld [vmem:[#allocation3 + $0x100] sm:$0xff] }
   0xe   :  { %92 = vmatpush.msra.mxu0 %v1259_v8  ;;  %112 = vmatpush.msra.mxu1 %v1261_v9  ;;  %v1317_v26 = vld [vmem:[#allocation3 + $0x78] sm:$0xff]  ;;  %v1319_v27 = vld [vmem:[#allocation3 + $0x80] sm:$0xff]  ;;  %v1325_v28 = vld [vmem:[#allocation3 + $0xe8] sm:$0xff] }
   0xf   :  { %208 = vmatpush.msra.mxu3 %v1259_v8  ;;  %130 = vmatpush.msra.mxu2 %v1285_v16  ;;  %v1327_v29 = vld [vmem:[#allocation3 + $0x60] sm:$0xff]  ;;  %v1329_v30 = vld [vmem:[#allocation3 + $0x68] sm:$0xff]  ;;  %v1335_v31 = vld [vmem:[#allocation3 + $0xd0] sm:$0xff] }
  0x10   :  { %93 = vmatpush.msra.mxu0 %v1266_v10  ;;  %113 = vmatpush.msra.mxu1 %v1268_v11  ;;  %v1337_v32 = vld [vmem:[#allocation3 + $0x48] sm:$0xff]  ;;  %v1339_v33 = vld [vmem:[#allocation3 + $0x50] sm:$0xff]  ;;  %v1345_v34 = vld [vmem:[#allocation3 + $0xb8] sm:$0xff] }
  0x11   :  { %209 = vmatpush.msra.mxu3 %v1266_v10  ;;  %131 = vmatpush.msra.mxu2 %v1295_v19  ;;  %v1347_v35 = vld [vmem:[#allocation3 + $0x30] sm:$0xff]  ;;  %v1349_v36 = vld [vmem:[#allocation3 + $0x38] sm:$0xff]  ;;  %v1355_v37 = vld [vmem:[#allocation3 + $0xa0] sm:$0xff] }
  0x12   :  { %94 = vmatpush.msra.mxu0 %v1277_v14  ;;  %114 = vmatpush.msra.mxu1 %v1279_v15  ;;  %v1357_v38 = vld [vmem:[#allocation3 + $0x18] sm:$0xff]  ;;  %v1359_v39 = vld [vmem:[#allocation3 + $0x20] sm:$0xff]  ;;  %v1365_v40 = vld [vmem:[#allocation3 + $0x88] sm:$0xff] }
  0x13   :  { %210 = vmatpush.msra.mxu3 %v1277_v14  ;;  %132 = vmatpush.msra.mxu2 %v1305_v22  ;;  %1880 = vst [vmem:[#allocation6_spill] sm:$0xff] %v1357_v38  ;;  %v1367_v41 = vld [vmem:[#allocation3] sm:$0xff]  ;;  %v1369_v42 = vld [vmem:[#allocation3 + $0x8] sm:$0xff]  ;;  %v1376_v43 = vld [vmem:[#allocation3 + $0x70] sm:$0xff] }
  0x14   :  { %95 = vmatpush.msra.mxu0 %v1287_v17  ;;  %115 = vmatpush.msra.mxu1 %v1289_v18  ;;  %1881 = vst [vmem:[#allocation7_spill] sm:$0xff] %v1359_v39  ;;  %v1381_v45 = vld [vmem:[#allocation3 + $0x58] sm:$0xff]  ;;  %v1385_v46 = vld [vmem:[#allocation3 + $0x40] sm:$0xff]  ;;  %v1391_v47 = vld [vmem:[#allocation3 + $0x28] sm:$0xff] }
  0x15   :  { %211 = vmatpush.msra.mxu3 %v1287_v17  ;;  %133 = vmatpush.msra.mxu2 %v1315_v25  ;;  %1882 = vst [vmem:[#allocation8_spill] sm:$0xff] %v1367_v41  ;;  %v1397_v48 = vld [vmem:[#allocation3 + $0x10] sm:$0xff]  ;;  %v85_v49 = vld [vmem:[%s1864_s0] sm:$0xff]  ;;  %v86_v50 = vld [vmem:[%s1864_s0 + $0x8] sm:$0xff] }
  0x16   :  { %96 = vmatpush.msra.mxu0 %v1297_v20  ;;  %116 = vmatpush.msra.mxu1 %v1299_v21  ;;  %1883 = vst [vmem:[#allocation9_spill] sm:$0xff] %v1369_v42 }
  0x17   :  { %212 = vmatpush.msra.mxu3 %v1297_v20  ;;  %134 = vmatpush.msra.mxu2 %v1325_v28  ;;  %1884 = vst [vmem:[#allocation10_spill] sm:$0xff] %v1391_v47 }
  0x18   :  { %97 = vmatpush.msra.mxu0 %v1307_v23  ;;  %117 = vmatpush.msra.mxu1 %v1309_v24  ;;  %1885 = vst [vmem:[#allocation11_spill] sm:$0xff] %v1397_v48 }
  0x19   :  { %213 = vmatpush.msra.mxu3 %v1307_v23  ;;  %135 = vmatpush.msra.mxu2 %v1335_v31 }
  0x1a   :  { %98 = vmatpush.msra.mxu0 %v1317_v26  ;;  %118 = vmatpush.msra.mxu1 %v1319_v27 }
  0x1b   :  { %214 = vmatpush.msra.mxu3 %v1317_v26  ;;  %136 = vmatpush.msra.mxu2 %v1345_v34 }
  0x1c   :  { %99 = vmatpush.msra.mxu0 %v1327_v29  ;;  %119 = vmatpush.msra.mxu1 %v1329_v30 }
  0x1d   :  { %215 = vmatpush.msra.mxu3 %v1327_v29  ;;  %137 = vmatpush.msra.mxu2 %v1355_v37 }
  0x1e   :  { %100 = vmatpush.msra.mxu0 %v1337_v32  ;;  %120 = vmatpush.msra.mxu1 %v1339_v33 }
  0x1f   :  { %216 = vmatpush.msra.mxu3 %v1337_v32  ;;  %138 = vmatpush.msra.mxu2 %v1365_v40 }
  0x20   :  { %101 = vmatpush.msra.mxu0 %v1347_v35  ;;  %121 = vmatpush.msra.mxu1 %v1349_v36 }
  0x21   :  { %217 = vmatpush.msra.mxu3 %v1347_v35  ;;  %139 = vmatpush.msra.mxu2 %v1376_v43 }
  0x22   :  { %102 = vmatpush.msra.mxu0 %v1357_v38  ;;  %122 = vmatpush.msra.mxu1 %v1359_v39 }
  0x23   :  { %218 = vmatpush.msra.mxu3 %v1357_v38  ;;  %140 = vmatpush.msra.mxu2 %v1381_v45 }
  0x24   :  { %103 = vmatpush.msra.mxu0 %v1367_v41  ;;  %123 = vmatpush.msra.mxu1 %v1369_v42 }
  0x25   :  { %104 = vmatmul.f32.vlgmr.msra.gmra.mxu0 %v1211_v44  ;;  %124 = vmatmul.f32.vlgmr.msra.gmra.mxu1 %v1211_v44 }
  0x26   :  { %224 = vmatpush.msrb.mxu0 %v1237_v1  ;;  %244 = vmatpush.msrb.mxu1 %v1270_v12 }
  0x27   :  { %219 = vmatpush.msra.mxu3 %v1367_v41  ;;  %141 = vmatpush.msra.mxu2 %v1385_v46 }
  0x28   :  { %225 = vmatpush.msrb.mxu0 %v1243_v3  ;;  %245 = vmatpush.msrb.mxu1 %v1275_v13 }
  0x29   :  { %338 = vmatpush.msrb.mxu3 %v1237_v1  ;;  %142 = vmatpush.msra.mxu2 %v1391_v47 }
  0x2a   :  { %226 = vmatpush.msrb.mxu0 %v1247_v5  ;;  %246 = vmatpush.msrb.mxu1 %v1285_v16 }
  0x2b   :  { %339 = vmatpush.msrb.mxu3 %v1243_v3  ;;  %143 = vmatpush.msra.mxu2 %v1397_v48 }
  0x2c   :  { %227 = vmatpush.msrb.mxu0 %v1254_v7  ;;  %247 = vmatpush.msrb.mxu1 %v1295_v19 }
  0x2d   :  { %340 = vmatpush.msrb.mxu3 %v1247_v5  ;;  %144 = vmatmul.f32.vlgmr.msra.gmra.mxu2 %v1211_v44 }
  0x2e   :  { %228 = vmatpush.msrb.mxu0 %v1261_v9  ;;  %248 = vmatpush.msrb.mxu1 %v1305_v22 }
  0x2f   :  { %318 = vmatpush.msrb.mxu2 %v1235_v0  ;;  %341 = vmatpush.msrb.mxu3 %v1254_v7 }
  0x30   :  { %229 = vmatpush.msrb.mxu0 %v1268_v11  ;;  %249 = vmatpush.msrb.mxu1 %v1315_v25 }
  0x31   :  { %319 = vmatpush.msrb.mxu2 %v1239_v2  ;;  %342 = vmatpush.msrb.mxu3 %v1261_v9 }
  0x32   :  { %230 = vmatpush.msrb.mxu0 %v1279_v15  ;;  %250 = vmatpush.msrb.mxu1 %v1325_v28 }
  0x33   :  { %320 = vmatpush.msrb.mxu2 %v1245_v4  ;;  %343 = vmatpush.msrb.mxu3 %v1268_v11 }
  0x34   :  { %231 = vmatpush.msrb.mxu0 %v1289_v18  ;;  %251 = vmatpush.msrb.mxu1 %v1335_v31 }
  0x35   :  { %321 = vmatpush.msrb.mxu2 %v1252_v6  ;;  %344 = vmatpush.msrb.mxu3 %v1279_v15 }
  0x36   :  { %232 = vmatpush.msrb.mxu0 %v1299_v21  ;;  %252 = vmatpush.msrb.mxu1 %v1345_v34 }
  0x37   :  { %322 = vmatpush.msrb.mxu2 %v1259_v8  ;;  %345 = vmatpush.msrb.mxu3 %v1289_v18 }
  0x38   :  { %233 = vmatpush.msrb.mxu0 %v1309_v24  ;;  %253 = vmatpush.msrb.mxu1 %v1355_v37 }
  0x39   :  { %323 = vmatpush.msrb.mxu2 %v1266_v10  ;;  %346 = vmatpush.msrb.mxu3 %v1299_v21 }
  0x3a   :  { %234 = vmatpush.msrb.mxu0 %v1319_v27  ;;  %254 = vmatpush.msrb.mxu1 %v1365_v40 }
  0x3b   :  { %324 = vmatpush.msrb.mxu2 %v1277_v14  ;;  %347 = vmatpush.msrb.mxu3 %v1309_v24 }
  0x3c   :  { %235 = vmatpush.msrb.mxu0 %v1329_v30  ;;  %255 = vmatpush.msrb.mxu1 %v1376_v43 }
  0x3d   :  { %325 = vmatpush.msrb.mxu2 %v1287_v17  ;;  %348 = vmatpush.msrb.mxu3 %v1319_v27 }
  0x3e   :  { %236 = vmatpush.msrb.mxu0 %v1339_v33  ;;  %256 = vmatpush.msrb.mxu1 %v1381_v45 }
  0x3f   :  { %326 = vmatpush.msrb.mxu2 %v1297_v20  ;;  %349 = vmatpush.msrb.mxu3 %v1329_v30 }
  0x40   :  { %237 = vmatpush.msrb.mxu0 %v1349_v36  ;;  %257 = vmatpush.msrb.mxu1 %v1385_v46 }
  0x41   :  { %327 = vmatpush.msrb.mxu2 %v1307_v23  ;;  %350 = vmatpush.msrb.mxu3 %v1339_v33 }
  0x42   :  { %238 = vmatpush.msrb.mxu0 %v1359_v39  ;;  %258 = vmatpush.msrb.mxu1 %v1391_v47 }
  0x43   :  { %328 = vmatpush.msrb.mxu2 %v1317_v26  ;;  %351 = vmatpush.msrb.mxu3 %v1349_v36 }
  0x44   :  { %239 = vmatpush.msrb.mxu0 %v1369_v42  ;;  %259 = vmatpush.msrb.mxu1 %v1397_v48 }
  0x45   :  { %329 = vmatpush.msrb.mxu2 %v1327_v29  ;;  %352 = vmatpush.msrb.mxu3 %v1359_v39 }
  0x46   :  { %358 = vmatpush.msra.mxu0 %v1270_v12  ;;  %432 = vmatpush.msra.mxu1 %v1235_v0 }
  0x47   :  { %330 = vmatpush.msrb.mxu2 %v1337_v32  ;;  %353 = vmatpush.msrb.mxu3 %v1369_v42 }
  0x48   :  { %359 = vmatpush.msra.mxu0 %v1275_v13  ;;  %433 = vmatpush.msra.mxu1 %v1239_v2 }
  0x49   :  { %331 = vmatpush.msrb.mxu2 %v1347_v35 }
  0x4a   :  { %360 = vmatpush.msra.mxu0 %v1285_v16  ;;  %434 = vmatpush.msra.mxu1 %v1245_v4 }
  0x4b   :  { %332 = vmatpush.msrb.mxu2 %v1357_v38 }
  0x4c   :  { %361 = vmatpush.msra.mxu0 %v1295_v19  ;;  %435 = vmatpush.msra.mxu1 %v1252_v6 }
  0x4d   :  { %333 = vmatpush.msrb.mxu2 %v1367_v41 }
  0x4e   :  { %362 = vmatpush.msra.mxu0 %v1305_v22  ;;  %436 = vmatpush.msra.mxu1 %v1259_v8 }
  0x4f   :  { %452 = vmatpush.msra.mxu2 %v1237_v1 }
  0x50   :  { %363 = vmatpush.msra.mxu0 %v1315_v25  ;;  %437 = vmatpush.msra.mxu1 %v1266_v10 }
  0x51   :  { %453 = vmatpush.msra.mxu2 %v1243_v3 }
  0x52   :  { %364 = vmatpush.msra.mxu0 %v1325_v28  ;;  %438 = vmatpush.msra.mxu1 %v1277_v14 }
  0x53   :  { %454 = vmatpush.msra.mxu2 %v1247_v5 }
  0x54   :  { %365 = vmatpush.msra.mxu0 %v1335_v31  ;;  %439 = vmatpush.msra.mxu1 %v1287_v17 }
  0x55   :  { %455 = vmatpush.msra.mxu2 %v1254_v7 }
  0x56   :  { %366 = vmatpush.msra.mxu0 %v1345_v34  ;;  %440 = vmatpush.msra.mxu1 %v1297_v20 }
  0x57   :  { %456 = vmatpush.msra.mxu2 %v1261_v9 }
  0x58   :  { %367 = vmatpush.msra.mxu0 %v1355_v37  ;;  %441 = vmatpush.msra.mxu1 %v1307_v23 }
  0x59   :  { %457 = vmatpush.msra.mxu2 %v1268_v11 }
  0x5a   :  { %368 = vmatpush.msra.mxu0 %v1365_v40  ;;  %442 = vmatpush.msra.mxu1 %v1317_v26 }
  0x5b   :  { %458 = vmatpush.msra.mxu2 %v1279_v15 }
  0x5c   :  { %369 = vmatpush.msra.mxu0 %v1376_v43  ;;  %443 = vmatpush.msra.mxu1 %v1327_v29 }
  0x5d   :  { %459 = vmatpush.msra.mxu2 %v1289_v18 }
  0x5e   :  { %370 = vmatpush.msra.mxu0 %v1381_v45  ;;  %444 = vmatpush.msra.mxu1 %v1337_v32 }
  0x5f   :  { %460 = vmatpush.msra.mxu2 %v1299_v21 }
  0x60   :  { %371 = vmatpush.msra.mxu0 %v1385_v46  ;;  %445 = vmatpush.msra.mxu1 %v1347_v35 }
  0x61   :  { %461 = vmatpush.msra.mxu2 %v1309_v24 }
  0x62   :  { %372 = vmatpush.msra.mxu0 %v1391_v47  ;;  %446 = vmatpush.msra.mxu1 %v1357_v38 }
  0x63   :  { %462 = vmatpush.msra.mxu2 %v1319_v27 }
  0x64   :  { %373 = vmatpush.msra.mxu0 %v1397_v48  ;;  %447 = vmatpush.msra.mxu1 %v1367_v41 }
  0x65   :  { %463 = vmatpush.msra.mxu2 %v1329_v30 }
  0x67   :  { %464 = vmatpush.msra.mxu2 %v1339_v33 }
  0x69   :  { %465 = vmatpush.msra.mxu2 %v1349_v36 }
  0x6b   :  { %466 = vmatpush.msra.mxu2 %v1359_v39 }
  0x6d   :  { %467 = vmatpush.msra.mxu2 %v1369_v42 }
  0xa2   :  { %v105_v51 = vpop.f32.mrf.mxu0  ;;  %v125_v52 = vpop.f32.mrf.mxu1 }
  0xa3   :  { %v148_v53 = vadd.f32 %v105_v51, %v85_v49  ;;  %v168_v54 = vadd.f32 %v125_v52, %v86_v50  ;;  %v1516_v49 = vld [vmem:[%s1866_s2] ss:$0 sm:$0xff] }
  0xa5   :  { %v1004_v55 = vmul.f32 -1.442695, %v148_v53  ;;  %v1005_v56 = vmul.f32 -1.442695, %v168_v54 }
  0xa7   :  { %1053 = vpow2.f32 %v1004_v55 }
  0xa8   :  { %1055 = vpow2.f32 %v1005_v56 }
  0xad   :  { %v1054_v57 = vpop.eup %1053 }
  0xae   :  { %v1056_v58 = vpop.eup %1055  ;;  %v152_v59 = vadd.f32 1.0, %v1054_v57 }
  0xaf   :  { %v172_v60 = vadd.f32 1.0, %v1056_v58 }
  0xb0   :  { %1057 = vrcp.f32 %v152_v59  ;;  %v145_v51 = vpop.f32.mrf.mxu2  ;;  %v164_v52 = vand.u32 2147483648, %v152_v59  ;;  %v162_v54 = vand.u32 2147483647, %v152_v59  ;;  %vm158_vm1 = vweird.f32 %v152_v59 }
  0xb1   :  { %1059 = vrcp.f32 %v172_v60  ;;  %v191_v57 = vadd.f32 %v1516_v49, %v145_v51  ;;  %vm178_vm4 = vweird.f32 %v172_v60  ;;  %v182_v38 = vand.u32 2147483647, %v172_v60 }
  0xb2   :  { %v165_v58 = vor.u32 1.1754944e-38, %v164_v52  ;;  %vm163_vm3 = vcmp.eq.f32.partialorder %v162_v54, 8.507059e+37 }
  0xb3   :  { %vm183_vm7 = vcmp.eq.f32.partialorder %v182_v38, 8.507059e+37  ;;  %v1886_v38 = vld [vmem:[#allocation6_spill] sm:$0xff] }
  0xb6   :  { %v1058_v61 = vpop.eup %1057 }
  0xb7   :  { %v1060_v62 = vpop.eup %1059  ;;  %v154_v63 = vmul.f32 %v1058_v61, %v152_v59  ;;  %vm159_vm0 = vweird.f32 %v1058_v61 }
  0xb8   :  { %v174_v44 = vmul.f32 %v1060_v62, %v172_v60  ;;  %vm160_vm2 = vmor %vm158_vm1, %vm159_vm0  ;;  %vm179_vm5 = vweird.f32 %v1060_v62 }
  0xb9   :  { %v155_v42 = vsub.f32 1.0, %v154_v63  ;;  %vm180_vm6 = vmor %vm178_vm4, %vm179_vm5 }
  0xba   :  { %v175_v50 = vsub.f32 1.0, %v174_v44  ;;  %v87_v44 = vld [vmem:[%s1864_s0 + $0x10] sm:$0xff] }
  0xbb   :  { %v156_v53 = vmul.f32 %v1058_v61, %v155_v42  ;;  %v184_v42 = vand.u32 2147483648, %v172_v60  ;;  %v1890_v60 = vld [vmem:[#allocation9_spill] sm:$0xff] }
  0xbc   :  { %v176_v55 = vmul.f32 %v1060_v62, %v175_v50 }
  0xbd   :  { %v157_v56 = vadd.f32 %v1058_v61, %v156_v53  ;;  %v185_v53 = vor.u32 1.1754944e-38, %v184_v42 }
  0xbe   :  { %v177_v63 = vadd.f32 %v1060_v62, %v176_v55 }
  0xbf   :  { %v161_v41 = vsel %vm160_vm2, %v1058_v61, %v157_v56 }
  0xc0   :  { %v166_v48 = vsel %vm163_vm3, %v165_v58, %v161_v41  ;;  %v181_v59 = vsel %vm180_vm6, %v1060_v62, %v177_v63  ;;  %v1888_v41 = vld [vmem:[#allocation11_spill] sm:$0xff]  ;;  %v1007_v62 = vld [vmem:[%s1864_s0 + $0x20] sm:$0xff] }
  0xc1   :  { %v192_v39 = vmul.f32 %v191_v57, %v166_v48  ;;  %v186_v51 = vsel %vm183_vm7, %v185_v53, %v181_v59  ;;  %v1889_v48 = vld [vmem:[#allocation8_spill] sm:$0xff] }
  0xc2   :  { %v195_v61 = vsub.f32 1.0, %v186_v51  ;;  %v197_v55 = vmul.f32 0.0, %v186_v51 }
  0xc3   :  { %v193_v50 = vadd.f32 %v192_v39, %v87_v44  ;;  %v1887_v39 = vld [vmem:[#allocation7_spill] sm:$0xff]  ;;  %v1006_v44 = vld [vmem:[%s1864_s0 + $0x18] sm:$0xff] }
  0xc5   :  { %1061 = vtanh.f32 %v193_v50 }
  0xcb   :  { %v1062_v52 = vpop.eup %1061 }
  0xcc   :  { %v196_v54 = vmul.f32 %v1062_v52, %v195_v61 }
  0xce   :  { %v1522_v56 = vadd.f32 %v197_v55, %v196_v54 }
  0xd0   :  { %199 = vst [vmem:[%s1867_s3] sm:$0xff] %v1522_v56  ;;  %220 = vmatmul.f32.vlgmr.msra.gmra.mxu3 %v1522_v56  ;;  %240 = vmatmul.f32.vlgmr.msrb.gmra.mxu0 %v1522_v56 }
  0xd1   :  { %260 = vmatmul.f32.vlgmr.msrb.gmra.mxu1 %v1522_v56  ;;  %472 = vmatpush.msra.mxu3 %v1270_v12 }
  0xd2   :  { %546 = vmatpush.msrb.mxu0 %v1235_v0  ;;  %566 = vmatpush.msrb.mxu1 %v1237_v1 }
  0xd3   :  { %473 = vmatpush.msra.mxu3 %v1275_v13 }
  0xd4   :  { %547 = vmatpush.msrb.mxu0 %v1239_v2  ;;  %567 = vmatpush.msrb.mxu1 %v1243_v3 }
  0xd5   :  { %474 = vmatpush.msra.mxu3 %v1285_v16 }
  0xd6   :  { %548 = vmatpush.msrb.mxu0 %v1245_v4  ;;  %568 = vmatpush.msrb.mxu1 %v1247_v5 }
  0xd7   :  { %475 = vmatpush.msra.mxu3 %v1295_v19 }
  0xd8   :  { %549 = vmatpush.msrb.mxu0 %v1252_v6  ;;  %569 = vmatpush.msrb.mxu1 %v1254_v7 }
  0xd9   :  { %476 = vmatpush.msra.mxu3 %v1305_v22 }
  0xda   :  { %550 = vmatpush.msrb.mxu0 %v1259_v8  ;;  %570 = vmatpush.msrb.mxu1 %v1261_v9 }
  0xdb   :  { %477 = vmatpush.msra.mxu3 %v1315_v25 }
  0xdc   :  { %551 = vmatpush.msrb.mxu0 %v1266_v10  ;;  %571 = vmatpush.msrb.mxu1 %v1268_v11 }
  0xdd   :  { %478 = vmatpush.msra.mxu3 %v1325_v28 }
  0xde   :  { %552 = vmatpush.msrb.mxu0 %v1277_v14  ;;  %572 = vmatpush.msrb.mxu1 %v1279_v15 }
  0xdf   :  { %479 = vmatpush.msra.mxu3 %v1335_v31 }
  0xe0   :  { %553 = vmatpush.msrb.mxu0 %v1287_v17  ;;  %573 = vmatpush.msrb.mxu1 %v1289_v18 }
  0xe1   :  { %480 = vmatpush.msra.mxu3 %v1345_v34 }
  0xe2   :  { %554 = vmatpush.msrb.mxu0 %v1297_v20  ;;  %574 = vmatpush.msrb.mxu1 %v1299_v21 }
  0xe3   :  { %481 = vmatpush.msra.mxu3 %v1355_v37 }
  0xe4   :  { %555 = vmatpush.msrb.mxu0 %v1307_v23  ;;  %575 = vmatpush.msrb.mxu1 %v1309_v24 }
  0xe5   :  { %482 = vmatpush.msra.mxu3 %v1365_v40 }
  0xe6   :  { %556 = vmatpush.msrb.mxu0 %v1317_v26  ;;  %576 = vmatpush.msrb.mxu1 %v1319_v27 }
  0xe7   :  { %483 = vmatpush.msra.mxu3 %v1376_v43 }
  0xe8   :  { %557 = vmatpush.msrb.mxu0 %v1327_v29  ;;  %577 = vmatpush.msrb.mxu1 %v1329_v30 }
  0xe9   :  { %484 = vmatpush.msra.mxu3 %v1381_v45 }
  0xea   :  { %558 = vmatpush.msrb.mxu0 %v1337_v32  ;;  %578 = vmatpush.msrb.mxu1 %v1339_v33 }
  0xeb   :  { %485 = vmatpush.msra.mxu3 %v1385_v46 }
  0xec   :  { %559 = vmatpush.msrb.mxu0 %v1347_v35  ;;  %579 = vmatpush.msrb.mxu1 %v1349_v36 }
  0xed   :  { %486 = vmatpush.msra.mxu3 %v1391_v47 }
  0xee   :  { %560 = vmatpush.msrb.mxu0 %v1886_v38  ;;  %580 = vmatpush.msrb.mxu1 %v1887_v39 }
  0xef   :  { %487 = vmatpush.msra.mxu3 %v1888_v41 }
  0xf0   :  { %561 = vmatpush.msrb.mxu0 %v1889_v48  ;;  %581 = vmatpush.msrb.mxu1 %v1890_v60 }
 0x14d   :  { %v241_v57 = vpop.f32.mrf.mxu0 }
 0x14e   :  { %v284_v58 = vadd.f32 %v1007_v62, %v241_v57 }
 0x150   :  { %v1010_v63 = vmul.f32 -1.442695, %v284_v58 }
 0x152   :  { %1063 = vpow2.f32 %v1010_v63 }
 0x153   :  { %v221_v42 = vpop.f32.mrf.mxu3 }
 0x154   :  { %v264_v50 = vadd.f32 %v1006_v44, %v221_v42  ;;  %v261_v44 = vpop.f32.mrf.mxu1 }
 0x156   :  { %v1009_v59 = vmul.f32 -1.442695, %v264_v50 }
 0x158   :  { %v1064_v53 = vpop.eup %1063  ;;  %1065 = vpow2.f32 %v1009_v59  ;;  %v304_v59 = vadd.f32 %v1516_v49, %v261_v44 }
 0x159   :  { %v288_v51 = vadd.f32 1.0, %v1064_v53 }
 0x15b   :  { %1067 = vrcp.f32 %v288_v51  ;;  %vm294_vm13 = vweird.f32 %v288_v51 }
 0x15e   :  { %v1066_v61 = vpop.eup %1065 }
 0x15f   :  { %v268_v52 = vadd.f32 1.0, %v1066_v61 }
 0x161   :  { %1069 = vrcp.f32 %v268_v52  ;;  %v1068_v54 = vpop.eup %1067  ;;  %v280_v48 = vand.u32 2147483648, %v268_v52  ;;  %v278_v63 = vand.u32 2147483647, %v268_v52  ;;  %vm274_vm9 = vweird.f32 %v268_v52 }
 0x162   :  { %v290_v55 = vmul.f32 %v1068_v54, %v288_v51  ;;  %vm295_vm12 = vweird.f32 %v1068_v54 }
 0x163   :  { %v281_v50 = vor.u32 1.1754944e-38, %v280_v48  ;;  %vm279_vm11 = vcmp.eq.f32.partialorder %v278_v63, 8.507059e+37  ;;  %vm296_vm14 = vmor %vm294_vm13, %vm295_vm12 }
 0x164   :  { %v291_v57 = vsub.f32 1.0, %v290_v55  ;;  %v1008_v55 = vld [vmem:[%s1864_s0 + $0x28] sm:$0xff] }
 0x166   :  { %v292_v39 = vmul.f32 %v1068_v54, %v291_v57  ;;  %v298_v57 = vand.u32 2147483647, %v288_v51 }
 0x167   :  { %v1070_v60 = vpop.eup %1069 }
 0x168   :  { %v270_v62 = vmul.f32 %v1070_v60, %v268_v52  ;;  %vm275_vm8 = vweird.f32 %v1070_v60  ;;  %v293_v61 = vadd.f32 %v1068_v54, %v292_v39  ;;  %vm299_vm15 = vcmp.eq.f32.partialorder %v298_v57, 8.507059e+37 }
 0x169   :  { %vm276_vm10 = vmor %vm274_vm9, %vm275_vm8 }
 0x16a   :  { %v271_v58 = vsub.f32 1.0, %v270_v62  ;;  %v300_v62 = vand.u32 2147483648, %v288_v51  ;;  %v297_v52 = vsel %vm296_vm14, %v1068_v54, %v293_v61  ;;  %v1894_v51 = vld [vmem:[#allocation11_spill] sm:$0xff]  ;;  %v1895_v54 = vld [vmem:[#allocation8_spill] sm:$0xff] }
 0x16c   :  { %v272_v41 = vmul.f32 %v1070_v60, %v271_v58  ;;  %v301_v47 = vor.u32 1.1754944e-38, %v300_v62 }
 0x16e   :  { %v273_v42 = vadd.f32 %v1070_v60, %v272_v41  ;;  %v302_v48 = vsel %vm299_vm15, %v301_v47, %v297_v52  ;;  %v1891_v47 = vld [vmem:[#allocation10_spill] sm:$0xff] }
 0x16f   :  { %v310_v44 = vmul.f32 %v302_v48, %v1522_v56  ;;  %v1892_v56 = vld [vmem:[#allocation6_spill] sm:$0xff] }
 0x170   :  { %v277_v53 = vsel %vm276_vm10, %v1070_v60, %v273_v42  ;;  %v308_v60 = vsub.f32 1.0, %v302_v48 }
 0x171   :  { %v282_v38 = vsel %vm279_vm11, %v281_v50, %v277_v53  ;;  %v1896_v50 = vld [vmem:[#allocation9_spill] sm:$0xff] }
 0x172   :  { %v305_v58 = vmul.f32 %v304_v59, %v282_v38  ;;  %v1893_v38 = vld [vmem:[#allocation7_spill] sm:$0xff]  ;;  %v1012_v59 = vld [vmem:[%s1864_s0 + $0x30] sm:$0xff]  ;;  %v1013_v53 = vld [vmem:[%s1864_s0 + $0x38] sm:$0xff] }
 0x174   :  { %v306_v41 = vadd.f32 %v1008_v55, %v305_v58 }
 0x176   :  { %1071 = vtanh.f32 %v306_v41 }
 0x17c   :  { %v1072_v63 = vpop.eup %1071 }
 0x17d   :  { %v309_v39 = vmul.f32 %v1072_v63, %v308_v60 }
 0x17f   :  { %v1590_v42 = vadd.f32 %v310_v44, %v309_v39 }
 0x181   :  { %1011 = vst [vmem:[%s1867_s3 + $0x8] sm:$0xff] %v1590_v42  ;;  %334 = vmatmul.f32.vlgmr.msrb.gmra.mxu2 %v1590_v42  ;;  %354 = vmatmul.f32.vlgmr.msrb.gmra.mxu3 %v1590_v42 }
 0x182   :  { %374 = vmatmul.f32.vlgmr.msra.gmra.mxu0 %v1590_v42  ;;  %586 = vmatpush.msrb.mxu2 %v1270_v12 }
 0x183   :  { %660 = vmatpush.msrb.mxu3 %v1235_v0  ;;  %680 = vmatpush.msra.mxu0 %v1237_v1 }
 0x184   :  { %587 = vmatpush.msrb.mxu2 %v1275_v13 }
 0x185   :  { %661 = vmatpush.msrb.mxu3 %v1239_v2  ;;  %681 = vmatpush.msra.mxu0 %v1243_v3 }
 0x186   :  { %588 = vmatpush.msrb.mxu2 %v1285_v16 }
 0x187   :  { %662 = vmatpush.msrb.mxu3 %v1245_v4  ;;  %682 = vmatpush.msra.mxu0 %v1247_v5 }
 0x188   :  { %589 = vmatpush.msrb.mxu2 %v1295_v19 }
 0x189   :  { %663 = vmatpush.msrb.mxu3 %v1252_v6  ;;  %683 = vmatpush.msra.mxu0 %v1254_v7 }
 0x18a   :  { %590 = vmatpush.msrb.mxu2 %v1305_v22 }
 0x18b   :  { %664 = vmatpush.msrb.mxu3 %v1259_v8  ;;  %684 = vmatpush.msra.mxu0 %v1261_v9 }
 0x18c   :  { %591 = vmatpush.msrb.mxu2 %v1315_v25 }
 0x18d   :  { %665 = vmatpush.msrb.mxu3 %v1266_v10  ;;  %685 = vmatpush.msra.mxu0 %v1268_v11 }
 0x18e   :  { %592 = vmatpush.msrb.mxu2 %v1325_v28 }
 0x18f   :  { %666 = vmatpush.msrb.mxu3 %v1277_v14  ;;  %686 = vmatpush.msra.mxu0 %v1279_v15 }
 0x190   :  { %593 = vmatpush.msrb.mxu2 %v1335_v31 }
 0x191   :  { %667 = vmatpush.msrb.mxu3 %v1287_v17  ;;  %687 = vmatpush.msra.mxu0 %v1289_v18 }
 0x192   :  { %594 = vmatpush.msrb.mxu2 %v1345_v34 }
 0x193   :  { %668 = vmatpush.msrb.mxu3 %v1297_v20  ;;  %688 = vmatpush.msra.mxu0 %v1299_v21 }
 0x194   :  { %595 = vmatpush.msrb.mxu2 %v1355_v37 }
 0x195   :  { %669 = vmatpush.msrb.mxu3 %v1307_v23  ;;  %689 = vmatpush.msra.mxu0 %v1309_v24 }
 0x196   :  { %596 = vmatpush.msrb.mxu2 %v1365_v40 }
 0x197   :  { %670 = vmatpush.msrb.mxu3 %v1317_v26  ;;  %690 = vmatpush.msra.mxu0 %v1319_v27 }
 0x198   :  { %597 = vmatpush.msrb.mxu2 %v1376_v43 }
 0x199   :  { %671 = vmatpush.msrb.mxu3 %v1327_v29  ;;  %691 = vmatpush.msra.mxu0 %v1329_v30 }
 0x19a   :  { %598 = vmatpush.msrb.mxu2 %v1381_v45 }
 0x19b   :  { %672 = vmatpush.msrb.mxu3 %v1337_v32  ;;  %692 = vmatpush.msra.mxu0 %v1339_v33 }
 0x19c   :  { %599 = vmatpush.msrb.mxu2 %v1385_v46 }
 0x19d   :  { %673 = vmatpush.msrb.mxu3 %v1347_v35  ;;  %693 = vmatpush.msra.mxu0 %v1349_v36 }
 0x19e   :  { %600 = vmatpush.msrb.mxu2 %v1891_v47 }
 0x19f   :  { %674 = vmatpush.msrb.mxu3 %v1892_v56  ;;  %694 = vmatpush.msra.mxu0 %v1893_v38 }
 0x1a0   :  { %601 = vmatpush.msrb.mxu2 %v1894_v51 }
 0x1a1   :  { %675 = vmatpush.msrb.mxu3 %v1895_v54  ;;  %695 = vmatpush.msra.mxu0 %v1896_v50 }
 0x204   :  { %v335_v61 = vpop.f32.mrf.mxu2  ;;  %v355_v55 = vpop.f32.mrf.mxu3 }
 0x205   :  { %v378_v62 = vadd.f32 %v1012_v59, %v335_v61  ;;  %v398_v58 = vadd.f32 %v1013_v53, %v355_v55  ;;  %v375_v53 = vpop.f32.mrf.mxu0 }
 0x207   :  { %v1015_v57 = vmul.f32 -1.442695, %v378_v62  ;;  %v1016_v41 = vmul.f32 -1.442695, %v398_v58  ;;  %v418_v58 = vadd.f32 %v1516_v49, %v375_v53 }
 0x209   :  { %1073 = vpow2.f32 %v1015_v57 }
 0x20a   :  { %1075 = vpow2.f32 %v1016_v41 }
 0x20f   :  { %v1074_v52 = vpop.eup %1073 }
 0x210   :  { %v1076_v48 = vpop.eup %1075  ;;  %v382_v60 = vadd.f32 1.0, %v1074_v52 }
 0x211   :  { %v402_v63 = vadd.f32 1.0, %v1076_v48 }
 0x212   :  { %1077 = vrcp.f32 %v382_v60  ;;  %v394_v38 = vand.u32 2147483648, %v382_v60  ;;  %v392_v59 = vand.u32 2147483647, %v382_v60  ;;  %vm388_vm1 = vweird.f32 %v382_v60 }
 0x213   :  { %1079 = vrcp.f32 %v402_v63  ;;  %vm408_vm5 = vweird.f32 %v402_v63  ;;  %v412_v48 = vand.u32 2147483647, %v402_v63 }
 0x214   :  { %v395_v62 = vor.u32 1.1754944e-38, %v394_v38  ;;  %vm393_vm3 = vcmp.eq.f32.partialorder %v392_v59, 8.507059e+37 }
 0x215   :  { %vm413_vm7 = vcmp.eq.f32.partialorder %v412_v48, 8.507059e+37  ;;  %v1138_v48 = vld [vmem:[#allocation3 + $0x158] sm:$0xff] }
 0x218   :  { %v1078_v39 = vpop.eup %1077 }
 0x219   :  { %v1080_v44 = vpop.eup %1079  ;;  %v384_v50 = vmul.f32 %v1078_v39, %v382_v60  ;;  %vm389_vm0 = vweird.f32 %v1078_v39 }
 0x21a   :  { %v404_v54 = vmul.f32 %v1080_v44, %v402_v63  ;;  %vm390_vm2 = vmor %vm388_vm1, %vm389_vm0  ;;  %vm409_vm4 = vweird.f32 %v1080_v44 }
 0x21b   :  { %v385_v51 = vsub.f32 1.0, %v384_v50  ;;  %v414_v50 = vand.u32 2147483648, %v402_v63  ;;  %vm410_vm6 = vmor %vm408_vm5, %vm409_vm4 }
 0x21c   :  { %v405_v56 = vsub.f32 1.0, %v404_v54  ;;  %v1014_v54 = vld [vmem:[%s1864_s0 + $0x40] sm:$0xff] }
 0x21d   :  { %v386_v47 = vmul.f32 %v1078_v39, %v385_v51  ;;  %v415_v60 = vor.u32 1.1754944e-38, %v414_v50  ;;  %v1137_v50 = vld [vmem:[#allocation3 + $0x150] sm:$0xff] }
 0x21e   :  { %v406_v61 = vmul.f32 %v1080_v44, %v405_v56 }
 0x21f   :  { %v387_v55 = vadd.f32 %v1078_v39, %v386_v47 }
 0x220   :  { %v407_v52 = vadd.f32 %v1080_v44, %v406_v61 }
 0x221   :  { %v391_v57 = vsel %vm390_vm2, %v1078_v39, %v387_v55 }
 0x222   :  { %v396_v41 = vsel %vm393_vm3, %v395_v62, %v391_v57  ;;  %v411_v56 = vsel %vm410_vm6, %v1080_v44, %v407_v52  ;;  %v1134_v52 = vld [vmem:[#allocation3 + $0x168] sm:$0xff] }
 0x223   :  { %v419_v51 = vmul.f32 %v418_v58, %v396_v41  ;;  %v416_v38 = vsel %vm413_vm7, %v415_v60, %v411_v56  ;;  %v1735_v41 = vld [vmem:[#allocation3 + $0x178] sm:$0xff]  ;;  %v1141_v60 = vld [vmem:[#allocation3 + $0x140] sm:$0xff] }
 0x224   :  { %v422_v39 = vsub.f32 1.0, %v416_v38  ;;  %v424_v61 = vmul.f32 %v416_v38, %v1590_v42  ;;  %v1140_v56 = vld [vmem:[#allocation3 + $0x138] sm:$0xff]  ;;  %v1744_v38 = vld [vmem:[#allocation3 + $0x130] sm:$0xff] }
 0x225   :  { %v420_v47 = vadd.f32 %v1014_v54, %v419_v51  ;;  %v1135_v54 = vld [vmem:[#allocation3 + $0x170] sm:$0xff]  ;;  %v1738_v51 = vld [vmem:[#allocation3 + $0x160] sm:$0xff] }
 0x227   :  { %1081 = vtanh.f32 %v420_v47  ;;  %v1741_v47 = vld [vmem:[#allocation3 + $0x148] sm:$0xff] }
 0x22d   :  { %v1082_v59 = vpop.eup %1081 }
 0x22e   :  { %v423_v53 = vmul.f32 %v1082_v59, %v422_v39  ;;  %v1143_v39 = vld [vmem:[#allocation3 + $0x120] sm:$0xff]  ;;  %v1144_v59 = vld [vmem:[#allocation3 + $0x128] sm:$0xff] }
 0x230   :  { %v1658_v55 = vadd.f32 %v424_v61, %v423_v53  ;;  %v1747_v53 = vld [vmem:[#allocation3 + $0x118] sm:$0xff]  ;;  %v1146_v61 = vld [vmem:[#allocation3 + $0x108] sm:$0xff] }
 0x232   :  { %1017 = vst [vmem:[%s1867_s3 + $0x10] sm:$0xff] %v1658_v55  ;;  %448 = vmatmul.f32.vlgmr.msra.gmra.mxu1 %v1658_v55  ;;  %468 = vmatmul.f32.vlgmr.msra.gmra.mxu2 %v1658_v55 }
 0x233   :  { %488 = vmatmul.f32.vlgmr.msra.gmra.mxu3 %v1658_v55  ;;  %700 = vmatpush.msra.mxu1 %v1270_v12 }
 0x234   :  { %774 = vmatpush.msra.mxu2 %v1235_v0  ;;  %794 = vmatpush.msra.mxu3 %v1237_v1  ;;  %v1897_v0 = vld [vmem:[#allocation10_spill] sm:$0xff] }
 0x235   :  { %701 = vmatpush.msra.mxu1 %v1275_v13  ;;  %v1898_v1 = vld [vmem:[#allocation6_spill] sm:$0xff] }
 0x236   :  { %775 = vmatpush.msra.mxu2 %v1239_v2  ;;  %795 = vmatpush.msra.mxu3 %v1243_v3  ;;  %v1899_v2 = vld [vmem:[#allocation7_spill] sm:$0xff] }
 0x237   :  { %702 = vmatpush.msra.mxu1 %v1285_v16  ;;  %v1900_v3 = vld [vmem:[#allocation11_spill] sm:$0xff] }
 0x238   :  { %776 = vmatpush.msra.mxu2 %v1245_v4  ;;  %796 = vmatpush.msra.mxu3 %v1247_v5  ;;  %v1901_v4 = vld [vmem:[#allocation8_spill] sm:$0xff]  ;;  %v1902_v5 = vld [vmem:[#allocation9_spill] sm:$0xff] }
 0x239   :  { %703 = vmatpush.msra.mxu1 %v1295_v19 }
 0x23a   :  { %777 = vmatpush.msra.mxu2 %v1252_v6  ;;  %797 = vmatpush.msra.mxu3 %v1254_v7  ;;  %v1018_v6 = vld [vmem:[%s1864_s0 + $0x48] sm:$0xff] }
 0x23b   :  { %704 = vmatpush.msra.mxu1 %v1305_v22 }
 0x23c   :  { %778 = vmatpush.msra.mxu2 %v1259_v8  ;;  %798 = vmatpush.msra.mxu3 %v1261_v9 }
 0x23d   :  { %705 = vmatpush.msra.mxu1 %v1315_v25 }
 0x23e   :  { %779 = vmatpush.msra.mxu2 %v1266_v10  ;;  %799 = vmatpush.msra.mxu3 %v1268_v11  ;;  %v1019_v10 = vld [vmem:[%s1864_s0 + $0x50] sm:$0xff] }
 0x23f   :  { %706 = vmatpush.msra.mxu1 %v1325_v28 }
 0x240   :  { %780 = vmatpush.msra.mxu2 %v1277_v14  ;;  %800 = vmatpush.msra.mxu3 %v1279_v15 }
 0x241   :  { %707 = vmatpush.msra.mxu1 %v1335_v31 }
 0x242   :  { %781 = vmatpush.msra.mxu2 %v1287_v17  ;;  %801 = vmatpush.msra.mxu3 %v1289_v18 }
 0x243   :  { %708 = vmatpush.msra.mxu1 %v1345_v34 }
 0x244   :  { %782 = vmatpush.msra.mxu2 %v1297_v20  ;;  %802 = vmatpush.msra.mxu3 %v1299_v21 }
 0x245   :  { %709 = vmatpush.msra.mxu1 %v1355_v37 }
 0x246   :  { %783 = vmatpush.msra.mxu2 %v1307_v23  ;;  %803 = vmatpush.msra.mxu3 %v1309_v24 }
 0x247   :  { %710 = vmatpush.msra.mxu1 %v1365_v40 }
 0x248   :  { %784 = vmatpush.msra.mxu2 %v1317_v26  ;;  %804 = vmatpush.msra.mxu3 %v1319_v27 }
 0x249   :  { %711 = vmatpush.msra.mxu1 %v1376_v43 }
 0x24a   :  { %785 = vmatpush.msra.mxu2 %v1327_v29  ;;  %805 = vmatpush.msra.mxu3 %v1329_v30 }
 0x24b   :  { %712 = vmatpush.msra.mxu1 %v1381_v45 }
 0x24c   :  { %786 = vmatpush.msra.mxu2 %v1337_v32  ;;  %806 = vmatpush.msra.mxu3 %v1339_v33  ;;  %v1020_v32 = vld [vmem:[%s1864_s0 + $0x58] sm:$0xff] }
 0x24d   :  { %713 = vmatpush.msra.mxu1 %v1385_v46 }
 0x24e   :  { %787 = vmatpush.msra.mxu2 %v1347_v35  ;;  %807 = vmatpush.msra.mxu3 %v1349_v36 }
 0x24f   :  { %714 = vmatpush.msra.mxu1 %v1897_v0  ;;  %v1750_v0 = vld [vmem:[#allocation3 + $0x100] sm:$0xff] }
 0x250   :  { %788 = vmatpush.msra.mxu2 %v1898_v1  ;;  %808 = vmatpush.msra.mxu3 %v1899_v2  ;;  %v1149_v1 = vld [vmem:[#allocation3 + $0xf0] sm:$0xff]  ;;  %v1150_v2 = vld [vmem:[#allocation3 + $0xf8] sm:$0xff] }
 0x251   :  { %715 = vmatpush.msra.mxu1 %v1900_v3  ;;  %v1753_v3 = vld [vmem:[#allocation3 + $0xe8] sm:$0xff] }
 0x252   :  { %789 = vmatpush.msra.mxu2 %v1901_v4  ;;  %809 = vmatpush.msra.mxu3 %v1902_v5  ;;  %v1152_v4 = vld [vmem:[#allocation3 + $0xd8] sm:$0xff]  ;;  %v1153_v5 = vld [vmem:[#allocation3 + $0xe0] sm:$0xff] }
 0x2af   :  { %v449_v7 = vpop.f32.mrf.mxu1 }
 0x2b0   :  { %v492_v8 = vadd.f32 %v1018_v6, %v449_v7  ;;  %v1756_v6 = vld [vmem:[#allocation3 + $0xd0] sm:$0xff]  ;;  %v1155_v7 = vld [vmem:[#allocation3 + $0xc0] sm:$0xff] }
 0x2b2   :  { %v1021_v9 = vmul.f32 -1.442695, %v492_v8  ;;  %v1156_v8 = vld [vmem:[#allocation3 + $0xc8] sm:$0xff] }
 0x2b4   :  { %1083 = vpow2.f32 %v1021_v9  ;;  %v1759_v9 = vld [vmem:[#allocation3 + $0xb8] sm:$0xff] }
 0x2b5   :  { %v469_v11 = vpop.f32.mrf.mxu2 }
 0x2b6   :  { %v512_v12 = vadd.f32 %v1019_v10, %v469_v11  ;;  %v489_v25 = vpop.f32.mrf.mxu3  ;;  %v1158_v10 = vld [vmem:[#allocation3 + $0xa8] sm:$0xff]  ;;  %v1159_v11 = vld [vmem:[#allocation3 + $0xb0] sm:$0xff] }
 0x2b7   :  { %v532_v31 = vadd.f32 %v1516_v49, %v489_v25  ;;  %v1173_v25 = vld [vmem:[#allocation3 + $0x30] sm:$0xff] }
 0x2b8   :  { %v1022_v13 = vmul.f32 -1.442695, %v512_v12  ;;  %v1762_v12 = vld [vmem:[#allocation3 + $0xa0] sm:$0xff] }
 0x2ba   :  { %v1084_v14 = vpop.eup %1083  ;;  %1085 = vpow2.f32 %v1022_v13  ;;  %v1161_v13 = vld [vmem:[#allocation3 + $0x90] sm:$0xff] }
 0x2bb   :  { %v496_v15 = vadd.f32 1.0, %v1084_v14  ;;  %v1162_v14 = vld [vmem:[#allocation3 + $0x98] sm:$0xff] }
 0x2bd   :  { %1087 = vrcp.f32 %v496_v15  ;;  %v508_v21 = vand.u32 2147483648, %v496_v15  ;;  %v506_v23 = vand.u32 2147483647, %v496_v15  ;;  %vm502_vm9 = vweird.f32 %v496_v15 }
 0x2bf   :  { %v509_v28 = vor.u32 1.1754944e-38, %v508_v21  ;;  %vm507_vm11 = vcmp.eq.f32.partialorder %v506_v23, 8.507059e+37  ;;  %v1771_v21 = vld [vmem:[#allocation3 + $0x58] sm:$0xff]  ;;  %v1171_v23 = vld [vmem:[#allocation3 + $0x50] sm:$0xff] }
 0x2c0   :  { %v1086_v16 = vpop.eup %1085 }
 0x2c1   :  { %v516_v17 = vadd.f32 1.0, %v1086_v16  ;;  %v1164_v16 = vld [vmem:[#allocation3 + $0x78] sm:$0xff] }
 0x2c3   :  { %v1088_v18 = vpop.eup %1087  ;;  %1089 = vrcp.f32 %v516_v17  ;;  %v528_v35 = vand.u32 2147483648, %v516_v17  ;;  %v526_v37 = vand.u32 2147483647, %v516_v17  ;;  %vm522_vm13 = vweird.f32 %v516_v17 }
 0x2c4   :  { %v498_v19 = vmul.f32 %v1088_v18, %v496_v15  ;;  %vm503_vm8 = vweird.f32 %v1088_v18  ;;  %v1765_v15 = vld [vmem:[#allocation3 + $0x88] sm:$0xff] }
 0x2c5   :  { %vm504_vm10 = vmor %vm502_vm9, %vm503_vm8  ;;  %v529_v45 = vor.u32 1.1754944e-38, %v528_v35  ;;  %vm527_vm15 = vcmp.eq.f32.partialorder %v526_v37, 8.507059e+37 }
 0x2c6   :  { %v499_v20 = vsub.f32 1.0, %v498_v19  ;;  %v1167_v19 = vld [vmem:[#allocation3 + $0x60] sm:$0xff] }
 0x2c8   :  { %v500_v22 = vmul.f32 %v1088_v18, %v499_v20  ;;  %v1168_v20 = vld [vmem:[#allocation3 + $0x68] sm:$0xff] }
 0x2c9   :  { %v1090_v24 = vpop.eup %1089 }
 0x2ca   :  { %v518_v26 = vmul.f32 %v1090_v24, %v516_v17  ;;  %v501_v27 = vadd.f32 %v1088_v18, %v500_v22  ;;  %vm523_vm12 = vweird.f32 %v1090_v24  ;;  %v1165_v17 = vld [vmem:[#allocation3 + $0x80] sm:$0xff]  ;;  %v1170_v22 = vld [vmem:[#allocation3 + $0x48] sm:$0xff] }
 0x2cb   :  { %vm524_vm14 = vmor %vm522_vm13, %vm523_vm12 }
 0x2cc   :  { %v519_v29 = vsub.f32 1.0, %v518_v26  ;;  %v505_v30 = vsel %vm504_vm10, %v1088_v18, %v501_v27  ;;  %v1768_v18 = vld [vmem:[#allocation3 + $0x70] sm:$0xff]  ;;  %v1174_v26 = vld [vmem:[#allocation3 + $0x38] sm:$0xff]  ;;  %v1777_v27 = vld [vmem:[#allocation3 + $0x28] sm:$0xff] }
 0x2cd   :  { %v510_v33 = vsel %vm507_vm11, %v509_v28, %v505_v30  ;;  %v1176_v28 = vld [vmem:[#allocation3 + $0x18] sm:$0xff]  ;;  %v1780_v30 = vld [vmem:[#allocation3 + $0x10] sm:$0xff] }
 0x2ce   :  { %v520_v34 = vmul.f32 %v1090_v24, %v519_v29  ;;  %v533_v36 = vmul.f32 %v532_v31, %v510_v33  ;;  %v1177_v29 = vld [vmem:[#allocation3 + $0x20] sm:$0xff] }
 0x2cf   :  { %v1179_v31 = vld [vmem:[#allocation3] sm:$0xff] }
 0x2d0   :  { %v521_v40 = vadd.f32 %v1090_v24, %v520_v34  ;;  %v534_v43 = vadd.f32 %v1020_v32, %v533_v36  ;;  %v1180_v32 = vld [vmem:[#allocation3 + $0x8] sm:$0xff]  ;;  %v1024_v33 = vld [vmem:[%s1864_s0 + $0x60] sm:$0xff] }
 0x2d1   :  { %v1025_v34 = vld [vmem:[%s1864_s0 + $0x68] sm:$0xff] }
 0x2d2   :  { %v525_v46 = vsel %vm524_vm14, %v1090_v24, %v521_v40  ;;  %1091 = vtanh.f32 %v534_v43  ;;  %v1774_v24 = vld [vmem:[#allocation3 + $0x40] sm:$0xff] }
 0x2d3   :  { %v530_v42 = vsel %vm527_vm15, %v529_v45, %v525_v46 }
 0x2d4   :  { %v536_v63 = vsub.f32 1.0, %v530_v42  ;;  %v538_v58 = vmul.f32 %v530_v42, %v1658_v55  ;;  %v1147_v55 = vld [vmem:[#allocation3 + $0x110] sm:$0xff] }
 0x2d8   :  { %v1092_v44 = vpop.eup %1091 }
 0x2d9   :  { %v537_v62 = vmul.f32 %v1092_v44, %v536_v63 }
 0x2db   :  { %v1726_v57 = vadd.f32 %v538_v58, %v537_v62 }
 0x2dd   :  { %1023 = vst [vmem:[%s1867_s3 + $0x18] sm:$0xff] %v1726_v57  ;;  %562 = vmatmul.f32.vlgmr.msrb.gmra.mxu0 %v1726_v57  ;;  %582 = vmatmul.f32.vlgmr.msrb.gmra.mxu1 %v1726_v57 }
 0x2de   :  { %602 = vmatmul.f32.vlgmr.msrb.gmra.mxu2 %v1726_v57  ;;  %814 = vmatpush.msrb.mxu0 %v1735_v41 }
 0x2df   :  { %888 = vmatpush.msrb.mxu1 %v1134_v52  ;;  %908 = vmatpush.msrb.mxu2 %v1135_v54 }
 0x2e0   :  { %815 = vmatpush.msrb.mxu0 %v1738_v51 }
 0x2e1   :  { %889 = vmatpush.msrb.mxu1 %v1137_v50  ;;  %909 = vmatpush.msrb.mxu2 %v1138_v48 }
 0x2e2   :  { %816 = vmatpush.msrb.mxu0 %v1741_v47 }
 0x2e3   :  { %890 = vmatpush.msrb.mxu1 %v1140_v56  ;;  %910 = vmatpush.msrb.mxu2 %v1141_v60 }
 0x2e4   :  { %817 = vmatpush.msrb.mxu0 %v1744_v38 }
 0x2e5   :  { %891 = vmatpush.msrb.mxu1 %v1143_v39  ;;  %911 = vmatpush.msrb.mxu2 %v1144_v59 }
 0x2e6   :  { %818 = vmatpush.msrb.mxu0 %v1747_v53 }
 0x2e7   :  { %892 = vmatpush.msrb.mxu1 %v1146_v61  ;;  %912 = vmatpush.msrb.mxu2 %v1147_v55 }
 0x2e8   :  { %819 = vmatpush.msrb.mxu0 %v1750_v0 }
 0x2e9   :  { %893 = vmatpush.msrb.mxu1 %v1149_v1  ;;  %913 = vmatpush.msrb.mxu2 %v1150_v2 }
 0x2ea   :  { %820 = vmatpush.msrb.mxu0 %v1753_v3 }
 0x2eb   :  { %894 = vmatpush.msrb.mxu1 %v1152_v4  ;;  %914 = vmatpush.msrb.mxu2 %v1153_v5 }
 0x2ec   :  { %821 = vmatpush.msrb.mxu0 %v1756_v6 }
 0x2ed   :  { %895 = vmatpush.msrb.mxu1 %v1155_v7  ;;  %915 = vmatpush.msrb.mxu2 %v1156_v8  ;;  %v1026_v7 = vld [vmem:[%s1864_s0 + $0x70] sm:$0xff] }
 0x2ee   :  { %822 = vmatpush.msrb.mxu0 %v1759_v9 }
 0x2ef   :  { %896 = vmatpush.msrb.mxu1 %v1158_v10  ;;  %916 = vmatpush.msrb.mxu2 %v1159_v11 }
 0x2f0   :  { %823 = vmatpush.msrb.mxu0 %v1762_v12 }
 0x2f1   :  { %897 = vmatpush.msrb.mxu1 %v1161_v13  ;;  %917 = vmatpush.msrb.mxu2 %v1162_v14 }
 0x2f2   :  { %824 = vmatpush.msrb.mxu0 %v1765_v15 }
 0x2f3   :  { %898 = vmatpush.msrb.mxu1 %v1164_v16  ;;  %918 = vmatpush.msrb.mxu2 %v1165_v17 }
 0x2f4   :  { %825 = vmatpush.msrb.mxu0 %v1768_v18 }
 0x2f5   :  { %899 = vmatpush.msrb.mxu1 %v1167_v19  ;;  %919 = vmatpush.msrb.mxu2 %v1168_v20 }
 0x2f6   :  { %826 = vmatpush.msrb.mxu0 %v1771_v21 }
 0x2f7   :  { %900 = vmatpush.msrb.mxu1 %v1170_v22  ;;  %920 = vmatpush.msrb.mxu2 %v1171_v23 }
 0x2f8   :  { %827 = vmatpush.msrb.mxu0 %v1774_v24 }
 0x2f9   :  { %901 = vmatpush.msrb.mxu1 %v1173_v25  ;;  %921 = vmatpush.msrb.mxu2 %v1174_v26 }
 0x2fa   :  { %828 = vmatpush.msrb.mxu0 %v1777_v27 }
 0x2fb   :  { %902 = vmatpush.msrb.mxu1 %v1176_v28  ;;  %922 = vmatpush.msrb.mxu2 %v1177_v29 }
 0x2fc   :  { %829 = vmatpush.msrb.mxu0 %v1780_v30 }
 0x2fd   :  { %903 = vmatpush.msrb.mxu1 %v1179_v31  ;;  %923 = vmatpush.msrb.mxu2 %v1180_v32 }
 0x35a   :  { %v563_v35 = vpop.f32.mrf.mxu0  ;;  %v583_v36 = vpop.f32.mrf.mxu1 }
 0x35b   :  { %v606_v37 = vadd.f32 %v1024_v33, %v563_v35  ;;  %v626_v40 = vadd.f32 %v1025_v34, %v583_v36  ;;  %v1828_v36 = vld [vmem:[%s1866_s2] ss:$0 sm:$0xff] }
 0x35d   :  { %v1027_v43 = vmul.f32 -1.442695, %v606_v37  ;;  %v1028_v45 = vmul.f32 -1.442695, %v626_v40 }
 0x35f   :  { %1093 = vpow2.f32 %v1027_v43 }
 0x360   :  { %1095 = vpow2.f32 %v1028_v45 }
 0x361   :  { %v603_v61 = vpop.f32.mrf.mxu2 }
 0x362   :  { %v646_v4 = vadd.f32 %v1516_v49, %v603_v61  ;;  %v1037_v61 = vld [vmem:[%s1864_s0 + $0x98] sm:$0xff] }
 0x365   :  { %v1094_v46 = vpop.eup %1093 }
 0x366   :  { %v1096_v42 = vpop.eup %1095  ;;  %v610_v63 = vadd.f32 1.0, %v1094_v46  ;;  %v1032_v46 = vld [vmem:[%s1864_s0 + $0x88] sm:$0xff] }
 0x367   :  { %v630_v44 = vadd.f32 1.0, %v1096_v42 }
 0x368   :  { %1097 = vrcp.f32 %v610_v63  ;;  %v622_v56 = vand.u32 2147483648, %v610_v63  ;;  %v620_v39 = vand.u32 2147483647, %v610_v63  ;;  %vm616_vm1 = vweird.f32 %v610_v63 }
 0x369   :  { %1099 = vrcp.f32 %v630_v44  ;;  %v642_v10 = vand.u32 2147483648, %v630_v44  ;;  %vm636_vm5 = vweird.f32 %v630_v44  ;;  %v640_v13 = vand.u32 2147483647, %v630_v44 }
 0x36a   :  { %v623_v1 = vor.u32 1.1754944e-38, %v622_v56  ;;  %vm621_vm3 = vcmp.eq.f32.partialorder %v620_v39, 8.507059e+37 }
 0x36b   :  { %v643_v17 = vor.u32 1.1754944e-38, %v642_v10  ;;  %vm641_vm7 = vcmp.eq.f32.partialorder %v640_v13, 8.507059e+37 }
 0x36e   :  { %v1098_v62 = vpop.eup %1097 }
 0x36f   :  { %v1100_v58 = vpop.eup %1099  ;;  %v612_v52 = vmul.f32 %v1098_v62, %v610_v63  ;;  %vm617_vm0 = vweird.f32 %v1098_v62 }
 0x370   :  { %v632_v54 = vmul.f32 %v1100_v58, %v630_v44  ;;  %vm618_vm2 = vmor %vm616_vm1, %vm617_vm0  ;;  %vm637_vm4 = vweird.f32 %v1100_v58 }
 0x371   :  { %v613_v50 = vsub.f32 1.0, %v612_v52  ;;  %vm638_vm6 = vmor %vm636_vm5, %vm637_vm4 }
 0x372   :  { %v633_v48 = vsub.f32 1.0, %v632_v54 }
 0x373   :  { %v614_v60 = vmul.f32 %v1098_v62, %v613_v50 }
 0x374   :  { %v634_v59 = vmul.f32 %v1100_v58, %v633_v48 }
 0x375   :  { %v615_v55 = vadd.f32 %v1098_v62, %v614_v60 }
 0x376   :  { %v635_v5 = vadd.f32 %v1100_v58, %v634_v59  ;;  %v1036_v59 = vld [vmem:[%s1864_s0 + $0x90] sm:$0xff] }
 0x377   :  { %v619_v2 = vsel %vm618_vm2, %v1098_v62, %v615_v55 }
 0x378   :  { %v624_v8 = vsel %vm621_vm3, %v623_v1, %v619_v2  ;;  %v639_v16 = vsel %vm638_vm6, %v1100_v58, %v635_v5 }
 0x379   :  { %v647_v11 = vmul.f32 %v646_v4, %v624_v8  ;;  %v644_v19 = vsel %vm641_vm7, %v643_v17, %v639_v16 }
 0x37a   :  { %v650_v20 = vsub.f32 1.0, %v644_v19  ;;  %v652_v23 = vmul.f32 %v644_v19, %v1726_v57  ;;  %v1031_v57 = vld [vmem:[%s1864_s0 + $0x80] sm:$0xff] }
 0x37b   :  { %v648_v14 = vadd.f32 %v1026_v7, %v647_v11 }
 0x37d   :  { %1101 = vtanh.f32 %v648_v14 }
 0x383   :  { %v1102_v49 = vpop.eup %1101 }
 0x384   :  { %v651_v22 = vmul.f32 %v1102_v49, %v650_v20 }
 0x386   :  { %v1794_v25 = vadd.f32 %v652_v23, %v651_v22 }
 0x388   :  { %1029 = vst [vmem:[%s1867_s3 + $0x20] sm:$0xff] %v1794_v25  ;;  %676 = vmatmul.f32.vlgmr.msrb.gmra.mxu3 %v1794_v25  ;;  %696 = vmatmul.f32.vlgmr.msra.gmra.mxu0 %v1794_v25 }
 0x389   :  { %716 = vmatmul.f32.vlgmr.msra.gmra.mxu1 %v1794_v25  ;;  %928 = vmatpush.msrb.mxu3 %v1735_v41 }
 0x38b   :  { %929 = vmatpush.msrb.mxu3 %v1738_v51 }
 0x38d   :  { %930 = vmatpush.msrb.mxu3 %v1741_v47 }
 0x38f   :  { %931 = vmatpush.msrb.mxu3 %v1744_v38  ;;  %v1030_v38 = vld [vmem:[%s1864_s0 + $0x78] sm:$0xff] }
 0x391   :  { %932 = vmatpush.msrb.mxu3 %v1747_v53 }
 0x393   :  { %933 = vmatpush.msrb.mxu3 %v1750_v0 }
 0x395   :  { %934 = vmatpush.msrb.mxu3 %v1753_v3 }
 0x397   :  { %935 = vmatpush.msrb.mxu3 %v1756_v6 }
 0x399   :  { %936 = vmatpush.msrb.mxu3 %v1759_v9 }
 0x39b   :  { %937 = vmatpush.msrb.mxu3 %v1762_v12 }
 0x39d   :  { %938 = vmatpush.msrb.mxu3 %v1765_v15 }
 0x39f   :  { %939 = vmatpush.msrb.mxu3 %v1768_v18 }
 0x3a1   :  { %940 = vmatpush.msrb.mxu3 %v1771_v21 }
 0x3a3   :  { %941 = vmatpush.msrb.mxu3 %v1774_v24 }
 0x3a5   :  { %942 = vmatpush.msrb.mxu3 %v1777_v27 }
 0x3a7   :  { %943 = vmatpush.msrb.mxu3 %v1780_v30 }
 0x405   :  { %v697_v41 = vpop.f32.mrf.mxu0 }
 0x406   :  { %v740_v51 = vadd.f32 %v1031_v57, %v697_v41  ;;  %v717_v33 = vpop.f32.mrf.mxu1 }
 0x407   :  { %v760_v37 = vadd.f32 %v1828_v36, %v717_v33 }
 0x408   :  { %v1034_v47 = vmul.f32 -1.442695, %v740_v51 }
 0x40a   :  { %1103 = vpow2.f32 %v1034_v47 }
 0x40b   :  { %v677_v53 = vpop.f32.mrf.mxu3 }
 0x40c   :  { %v720_v0 = vadd.f32 %v1030_v38, %v677_v53 }
 0x40e   :  { %v1033_v3 = vmul.f32 -1.442695, %v720_v0 }
 0x410   :  { %v1104_v6 = vpop.eup %1103  ;;  %1105 = vpow2.f32 %v1033_v3 }
 0x411   :  { %v744_v9 = vadd.f32 1.0, %v1104_v6  ;;  %v1038_v6 = vld [vmem:[%s1864_s0 + $0xa0] sm:$0xff] }
 0x413   :  { %1107 = vrcp.f32 %v744_v9  ;;  %v756_v42 = vand.u32 2147483648, %v744_v9  ;;  %vm750_vm13 = vweird.f32 %v744_v9  ;;  %v754_v44 = vand.u32 2147483647, %v744_v9 }
 0x415   :  { %v757_v52 = vor.u32 1.1754944e-38, %v756_v42  ;;  %vm755_vm15 = vcmp.eq.f32.partialorder %v754_v44, 8.507059e+37 }
 0x416   :  { %v1106_v12 = vpop.eup %1105 }
 0x417   :  { %v724_v15 = vadd.f32 1.0, %v1106_v12 }
 0x419   :  { %1109 = vrcp.f32 %v724_v15  ;;  %v1108_v18 = vpop.eup %1107  ;;  %v736_v29 = vand.u32 2147483648, %v724_v15  ;;  %v734_v31 = vand.u32 2147483647, %v724_v15  ;;  %vm730_vm9 = vweird.f32 %v724_v15 }
 0x41a   :  { %v746_v21 = vmul.f32 %v1108_v18, %v744_v9  ;;  %vm751_vm12 = vweird.f32 %v1108_v18 }
 0x41b   :  { %v737_v35 = vor.u32 1.1754944e-38, %v736_v29  ;;  %vm735_vm11 = vcmp.eq.f32.partialorder %v734_v31, 8.507059e+37  ;;  %vm752_vm14 = vmor %vm750_vm13, %vm751_vm12 }
 0x41c   :  { %v747_v27 = vsub.f32 1.0, %v746_v21 }
 0x41e   :  { %v748_v32 = vmul.f32 %v1108_v18, %v747_v27 }
 0x41f   :  { %v1110_v24 = vpop.eup %1109 }
 0x420   :  { %v726_v26 = vmul.f32 %v1110_v24, %v724_v15  ;;  %vm731_vm8 = vweird.f32 %v1110_v24  ;;  %v749_v43 = vadd.f32 %v1108_v18, %v748_v32  ;;  %v1042_v32 = vld [vmem:[%s1864_s0 + $0xa8] sm:$0xff] }
 0x421   :  { %vm732_vm10 = vmor %vm730_vm9, %vm731_vm8 }
 0x422   :  { %v727_v28 = vsub.f32 1.0, %v726_v26  ;;  %v753_v58 = vsel %vm752_vm14, %v1108_v18, %v749_v43 }
 0x423   :  { %v758_v54 = vsel %vm755_vm15, %v757_v52, %v753_v58 }
 0x424   :  { %v728_v30 = vmul.f32 %v1110_v24, %v727_v28  ;;  %v764_v50 = vsub.f32 1.0, %v758_v54  ;;  %v766_v60 = vmul.f32 %v758_v54, %v1794_v25 }
 0x426   :  { %v729_v34 = vadd.f32 %v1110_v24, %v728_v30 }
 0x428   :  { %v733_v40 = vsel %vm732_vm10, %v1110_v24, %v729_v34 }
 0x429   :  { %v738_v45 = vsel %vm735_vm11, %v737_v35, %v733_v40 }
 0x42a   :  { %v761_v63 = vmul.f32 %v760_v37, %v738_v45  ;;  %v1043_v37 = vld [vmem:[%s1864_s0 + $0xb0] sm:$0xff] }
 0x42c   :  { %v762_v62 = vadd.f32 %v1032_v46, %v761_v63 }
 0x42e   :  { %1111 = vtanh.f32 %v762_v62 }
 0x434   :  { %v1112_v48 = vpop.eup %1111 }
 0x435   :  { %v765_v56 = vmul.f32 %v1112_v48, %v764_v50 }
 0x437   :  { %v767_v39 = vadd.f32 %v766_v60, %v765_v56 }
 0x439   :  { %1035 = vst [vmem:[%s1867_s3 + $0x28] sm:$0xff] %v767_v39  ;;  %790 = vmatmul.f32.vlgmr.msra.gmra.mxu2 %v767_v39  ;;  %810 = vmatmul.f32.vlgmr.msra.gmra.mxu3 %v767_v39 }
 0x43a   :  { %830 = vmatmul.f32.vlgmr.msrb.gmra.mxu0 %v767_v39 }
 0x4b7   :  { %v831_v57 = vpop.f32.mrf.mxu0 }
 0x4b8   :  { %v874_v38 = vadd.f32 %v1828_v36, %v831_v57 }
 0x4bc   :  { %v791_v55 = vpop.f32.mrf.mxu2  ;;  %v811_v1 = vpop.f32.mrf.mxu3 }
 0x4bd   :  { %v834_v2 = vadd.f32 %v1036_v59, %v791_v55  ;;  %v854_v4 = vadd.f32 %v1037_v61, %v811_v1 }
 0x4bf   :  { %v1039_v5 = vmul.f32 -1.442695, %v834_v2  ;;  %v1040_v7 = vmul.f32 -1.442695, %v854_v4  ;;  %v1044_v4 = vld [vmem:[%s1864_s0 + $0xb8] sm:$0xff] }
 0x4c1   :  { %1113 = vpow2.f32 %v1039_v5 }
 0x4c2   :  { %1115 = vpow2.f32 %v1040_v7 }
 0x4c7   :  { %v1114_v8 = vpop.eup %1113 }
 0x4c8   :  { %v1116_v10 = vpop.eup %1115  ;;  %v838_v11 = vadd.f32 1.0, %v1114_v8 }
 0x4c9   :  { %v858_v13 = vadd.f32 1.0, %v1116_v10 }
 0x4ca   :  { %1117 = vrcp.f32 %v838_v11  ;;  %v850_v49 = vand.u32 2147483648, %v838_v11  ;;  %v848_v25 = vand.u32 2147483647, %v838_v11  ;;  %vm844_vm1 = vweird.f32 %v838_v11 }
 0x4cb   :  { %1119 = vrcp.f32 %v858_v13  ;;  %v870_v12 = vand.u32 2147483648, %v858_v13  ;;  %vm864_vm5 = vweird.f32 %v858_v13  ;;  %v868_v15 = vand.u32 2147483647, %v858_v13 }
 0x4cc   :  { %v851_v47 = vor.u32 1.1754944e-38, %v850_v49  ;;  %vm849_vm3 = vcmp.eq.f32.partialorder %v848_v25, 8.507059e+37 }
 0x4cd   :  { %v871_v24 = vor.u32 1.1754944e-38, %v870_v12  ;;  %vm869_vm7 = vcmp.eq.f32.partialorder %v868_v15, 8.507059e+37 }
 0x4d0   :  { %v1118_v14 = vpop.eup %1117 }
 0x4d1   :  { %v1120_v16 = vpop.eup %1119  ;;  %v840_v17 = vmul.f32 %v1118_v14, %v838_v11  ;;  %vm845_vm0 = vweird.f32 %v1118_v14 }
 0x4d2   :  { %v860_v19 = vmul.f32 %v1120_v16, %v858_v13  ;;  %vm846_vm2 = vmor %vm844_vm1, %vm845_vm0  ;;  %vm865_vm4 = vweird.f32 %v1120_v16 }
 0x4d3   :  { %v841_v20 = vsub.f32 1.0, %v840_v17  ;;  %vm866_vm6 = vmor %vm864_vm5, %vm865_vm4 }
 0x4d4   :  { %v861_v22 = vsub.f32 1.0, %v860_v19 }
 0x4d5   :  { %v842_v23 = vmul.f32 %v1118_v14, %v841_v20 }
 0x4d6   :  { %v862_v41 = vmul.f32 %v1120_v16, %v861_v22 }
 0x4d7   :  { %v843_v51 = vadd.f32 %v1118_v14, %v842_v23 }
 0x4d8   :  { %v863_v3 = vadd.f32 %v1120_v16, %v862_v41 }
 0x4d9   :  { %v847_v53 = vsel %vm846_vm2, %v1118_v14, %v843_v51 }
 0x4da   :  { %v852_v0 = vsel %vm849_vm3, %v851_v47, %v847_v53  ;;  %v867_v21 = vsel %vm866_vm6, %v1120_v16, %v863_v3 }
 0x4db   :  { %v875_v9 = vmul.f32 %v874_v38, %v852_v0  ;;  %v872_v26 = vsel %vm869_vm7, %v871_v24, %v867_v21 }
 0x4dc   :  { %v878_v27 = vsub.f32 1.0, %v872_v26  ;;  %v880_v30 = vmul.f32 %v872_v26, %v767_v39 }
 0x4dd   :  { %v876_v18 = vadd.f32 %v1038_v6, %v875_v9 }
 0x4df   :  { %1121 = vtanh.f32 %v876_v18 }
 0x4e5   :  { %v1122_v28 = vpop.eup %1121 }
 0x4e6   :  { %v879_v29 = vmul.f32 %v1122_v28, %v878_v27 }
 0x4e8   :  { %v881_v31 = vadd.f32 %v880_v30, %v879_v29 }
 0x4ea   :  { %1041 = vst [vmem:[%s1867_s3 + $0x30] sm:$0xff] %v881_v31  ;;  %904 = vmatmul.f32.vlgmr.msrb.gmra.mxu1 %v881_v31  ;;  %924 = vmatmul.f32.vlgmr.msrb.gmra.mxu2 %v881_v31 }
 0x4eb   :  { %944 = vmatmul.f32.vlgmr.msrb.gmra.mxu3 %v881_v31 }
 0x567   :  { %v905_v33 = vpop.f32.mrf.mxu1 }
 0x568   :  { %v948_v34 = vadd.f32 %v1042_v32, %v905_v33 }
 0x56a   :  { %v1045_v35 = vmul.f32 -1.442695, %v948_v34 }
 0x56c   :  { %1123 = vpow2.f32 %v1045_v35 }
 0x56d   :  { %v925_v40 = vpop.f32.mrf.mxu2 }
 0x56e   :  { %v968_v43 = vadd.f32 %v1043_v37, %v925_v40  ;;  %v945_v60 = vpop.f32.mrf.mxu3 }
 0x56f   :  { %v988_v2 = vadd.f32 %v1828_v36, %v945_v60 }
 0x570   :  { %v1046_v45 = vmul.f32 -1.442695, %v968_v43 }
 0x572   :  { %v1124_v46 = vpop.eup %1123  ;;  %1125 = vpow2.f32 %v1046_v45 }
 0x573   :  { %v952_v42 = vadd.f32 1.0, %v1124_v46 }
 0x575   :  { %1127 = vrcp.f32 %v952_v42  ;;  %v964_v54 = vand.u32 2147483648, %v952_v42  ;;  %v962_v48 = vand.u32 2147483647, %v952_v42  ;;  %vm958_vm9 = vweird.f32 %v952_v42 }
 0x577   :  { %v965_v61 = vor.u32 1.1754944e-38, %v964_v54  ;;  %vm963_vm11 = vcmp.eq.f32.partialorder %v962_v48, 8.507059e+37 }
 0x578   :  { %v1126_v63 = vpop.eup %1125 }
 0x579   :  { %v972_v44 = vadd.f32 1.0, %v1126_v63 }
 0x57b   :  { %v1128_v62 = vpop.eup %1127  ;;  %1129 = vrcp.f32 %v972_v44  ;;  %v984_v8 = vand.u32 2147483648, %v972_v44  ;;  %v982_v11 = vand.u32 2147483647, %v972_v44  ;;  %vm978_vm13 = vweird.f32 %v972_v44 }
 0x57c   :  { %v954_v58 = vmul.f32 %v1128_v62, %v952_v42  ;;  %vm959_vm8 = vweird.f32 %v1128_v62 }
 0x57d   :  { %vm960_vm10 = vmor %vm958_vm9, %vm959_vm8  ;;  %v985_v16 = vor.u32 1.1754944e-38, %v984_v8  ;;  %vm983_vm15 = vcmp.eq.f32.partialorder %v982_v11, 8.507059e+37 }
 0x57e   :  { %v955_v52 = vsub.f32 1.0, %v954_v58 }
 0x580   :  { %v956_v50 = vmul.f32 %v1128_v62, %v955_v52 }
 0x581   :  { %v1130_v56 = vpop.eup %1129 }
 0x582   :  { %v974_v39 = vmul.f32 %v1130_v56, %v972_v44  ;;  %v957_v59 = vadd.f32 %v1128_v62, %v956_v50  ;;  %vm979_vm12 = vweird.f32 %v1130_v56 }
 0x583   :  { %vm980_vm14 = vmor %vm978_vm13, %vm979_vm12 }
 0x584   :  { %v975_v55 = vsub.f32 1.0, %v974_v39  ;;  %v961_v1 = vsel %vm960_vm10, %v1128_v62, %v957_v59 }
 0x585   :  { %v966_v5 = vsel %vm963_vm11, %v965_v61, %v961_v1 }
 0x586   :  { %v976_v7 = vmul.f32 %v1130_v56, %v975_v55  ;;  %v989_v10 = vmul.f32 %v988_v2, %v966_v5 }
 0x588   :  { %v977_v13 = vadd.f32 %v1130_v56, %v976_v7  ;;  %v990_v14 = vadd.f32 %v1044_v4, %v989_v10 }
 0x58a   :  { %v981_v17 = vsel %vm980_vm14, %v1130_v56, %v977_v13  ;;  %1131 = vtanh.f32 %v990_v14 }
 0x58b   :  { %v986_v19 = vsel %vm983_vm15, %v985_v16, %v981_v17 }
 0x58c   :  { %v992_v36 = vsub.f32 1.0, %v986_v19  ;;  %v994_v22 = vmul.f32 %v986_v19, %v881_v31 }
 0x590   :  { %v1132_v20 = vpop.eup %1131 }
 0x591   :  { %v993_v49 = vmul.f32 %v1132_v20, %v992_v36 }
 0x593   :  { %v995_v23 = vadd.f32 %v994_v22, %v993_v49 }
 0x595   :  { %1047 = vst [vmem:[%s1867_s3 + $0x38] sm:$0xff] %v995_v23 }
 0x596   :  { %1003 = vsyncpa [#allocation4], 1 }

// kernel: gru_forward.7
= control target key start
LH: loop header
LB: loop body
LE: loop exit
PB: predicated region body
PF: predicated region fallthrough
CT: control target
= control target key end

     0   :  { %10 = vsyncpa [#allocation4], 0  ;;  %s1976_s0 = inlined_call_operand.vmem [shape: f32[8,8,384], index: 0, kind: input, shape index: {}]   ;;  %s1977_s1 = inlined_call_operand.hbm [shape: f32[128,384], index: 1, kind: input, shape index: {}]   ;;  %s1978_s2 = inlined_call_operand.vmem [shape: f32[1,128], index: 2, kind: input, shape index: {}]   ;;  %s1979_s3 = inlined_call_operand.vmem [shape: f32[128,5], index: 3, kind: input, shape index: {}]   ;;  %s1980_s4 = inlined_call_operand.vmem [shape: f32[1,5], index: 4, kind: input, shape index: {}]   ;;  %s1981_s5 = inlined_call_operand.hbm [shape: f32[8,5], index: 5, kind: output, shape index: {}]  }
   0x1   :  { %11 = vsyncpa [#allocation5], 0  ;;  %s18_s20 = sshll.u32 %s1977_s1, 4  ;;  %s1278_s21 = smov [#allocation3]   ;;  %s19_s20 = int_to_ptr.hbm [resolvable:$true] %s18_s20 }
   0x2   :  { %s20_s22 = sshll.u32 %s1278_s21, 4  ;;  %s1279_s23 = smov 384   ;;  %s21_s22 = int_to_ptr.vmem [resolvable:$true] %s20_s22 }
   0x3   :  { %s1280_s24 = smov 24  }
   0x4   :  { %26 = dma.hbm_to_vmem [thread:$0]  %s19_s20, 6144, %s21_s22, [#allocation4], %s1279_s23, %s1279_s23, %s1280_s24  }
   0x5   :  { %1274 = dma.done.wait [#allocation4], 6144  }
   0x6   :  { %1275 = vsyncadd [#allocation4], 4294961152  ;;  %v1316_v0 = vld [vmem:[#allocation3 + $0x168] sm:$0xff]  ;;  %v1318_v1 = vld [vmem:[#allocation3 + $0x170] sm:$0xff]  ;;  %v1281_v44 = vmov 0.0   ;;  %s1282_s28 = smov [#allocation6]  }
   0x7   :  { %v1320_v2 = vld [vmem:[#allocation3 + $0x150] sm:$0xff]  ;;  %95 = vmatpush.msra.mxu0 %v1316_v0  ;;  %115 = vmatpush.msra.mxu1 %v1318_v1  ;;  %v1324_v3 = vld [vmem:[#allocation3 + $0x158] sm:$0xff]  ;;  %v1328_v5 = vld [vmem:[#allocation3 + $0x140] sm:$0xff]  ;;  %s1041_s29 = sshll.u32 %s1282_s28, 4  ;;  %s1043_s7 = sshll.u32 %s1981_s5, 4  ;;  %s1042_s29 = int_to_ptr.vmem [resolvable:$true] %s1041_s29  ;;  %s1044_s7 = int_to_ptr.hbm [resolvable:$true] %s1043_s7 }
   0x8   :  { %v1326_v4 = vld [vmem:[#allocation3 + $0x138] sm:$0xff]  ;;  %210 = vmatpush.msra.mxu3 %v1316_v0  ;;  %v1333_v6 = vld [vmem:[#allocation3 + $0x120] sm:$0xff]  ;;  %v1335_v7 = vld [vmem:[#allocation3 + $0x128] sm:$0xff] }
   0x9   :  { %96 = vmatpush.msra.mxu0 %v1320_v2  ;;  %116 = vmatpush.msra.mxu1 %v1324_v3  ;;  %v1340_v8 = vld [vmem:[#allocation3 + $0x108] sm:$0xff]  ;;  %v1342_v9 = vld [vmem:[#allocation3 + $0x110] sm:$0xff]  ;;  %v1349_v11 = vld [vmem:[#allocation3 + $0xf8] sm:$0xff] }
   0xa   :  { %211 = vmatpush.msra.mxu3 %v1320_v2  ;;  %v1347_v10 = vld [vmem:[#allocation3 + $0xf0] sm:$0xff]  ;;  %v1351_v12 = vld [vmem:[#allocation3 + $0x178] sm:$0xff]  ;;  %v1356_v13 = vld [vmem:[#allocation3 + $0x160] sm:$0xff] }
   0xb   :  { %97 = vmatpush.msra.mxu0 %v1326_v4  ;;  %117 = vmatpush.msra.mxu1 %v1328_v5  ;;  %v1358_v14 = vld [vmem:[#allocation3 + $0xd8] sm:$0xff]  ;;  %v1360_v15 = vld [vmem:[#allocation3 + $0xe0] sm:$0xff]  ;;  %v1366_v16 = vld [vmem:[#allocation3 + $0x148] sm:$0xff] }
   0xc   :  { %212 = vmatpush.msra.mxu3 %v1326_v4  ;;  %135 = vmatpush.msra.mxu2 %v1351_v12  ;;  %v1368_v17 = vld [vmem:[#allocation3 + $0xc0] sm:$0xff]  ;;  %v1370_v18 = vld [vmem:[#allocation3 + $0xc8] sm:$0xff]  ;;  %v1376_v19 = vld [vmem:[#allocation3 + $0x130] sm:$0xff] }
   0xd   :  { %98 = vmatpush.msra.mxu0 %v1333_v6  ;;  %118 = vmatpush.msra.mxu1 %v1335_v7  ;;  %v1378_v20 = vld [vmem:[#allocation3 + $0xa8] sm:$0xff]  ;;  %v1380_v21 = vld [vmem:[#allocation3 + $0xb0] sm:$0xff]  ;;  %v1388_v23 = vld [vmem:[#allocation3 + $0x118] sm:$0xff] }
   0xe   :  { %213 = vmatpush.msra.mxu3 %v1333_v6  ;;  %136 = vmatpush.msra.mxu2 %v1356_v13  ;;  %v1386_v22 = vld [vmem:[#allocation3 + $0x90] sm:$0xff]  ;;  %v1390_v24 = vld [vmem:[#allocation3 + $0x98] sm:$0xff]  ;;  %v1396_v25 = vld [vmem:[#allocation3 + $0x100] sm:$0xff] }
   0xf   :  { %99 = vmatpush.msra.mxu0 %v1340_v8  ;;  %119 = vmatpush.msra.mxu1 %v1342_v9  ;;  %v1398_v26 = vld [vmem:[#allocation3 + $0x78] sm:$0xff]  ;;  %v1400_v27 = vld [vmem:[#allocation3 + $0x80] sm:$0xff]  ;;  %v1406_v28 = vld [vmem:[#allocation3 + $0xe8] sm:$0xff] }
  0x10   :  { %214 = vmatpush.msra.mxu3 %v1340_v8  ;;  %137 = vmatpush.msra.mxu2 %v1366_v16  ;;  %v1408_v29 = vld [vmem:[#allocation3 + $0x60] sm:$0xff]  ;;  %v1410_v30 = vld [vmem:[#allocation3 + $0x68] sm:$0xff]  ;;  %v1416_v31 = vld [vmem:[#allocation3 + $0xd0] sm:$0xff] }
  0x11   :  { %100 = vmatpush.msra.mxu0 %v1347_v10  ;;  %120 = vmatpush.msra.mxu1 %v1349_v11  ;;  %v1418_v32 = vld [vmem:[#allocation3 + $0x48] sm:$0xff]  ;;  %v1420_v33 = vld [vmem:[#allocation3 + $0x50] sm:$0xff]  ;;  %v1426_v34 = vld [vmem:[#allocation3 + $0xb8] sm:$0xff] }
  0x12   :  { %215 = vmatpush.msra.mxu3 %v1347_v10  ;;  %138 = vmatpush.msra.mxu2 %v1376_v19  ;;  %v1428_v35 = vld [vmem:[#allocation3 + $0x30] sm:$0xff]  ;;  %v1430_v36 = vld [vmem:[#allocation3 + $0x38] sm:$0xff]  ;;  %v1436_v37 = vld [vmem:[#allocation3 + $0xa0] sm:$0xff] }
  0x13   :  { %101 = vmatpush.msra.mxu0 %v1358_v14  ;;  %121 = vmatpush.msra.mxu1 %v1360_v15  ;;  %v1438_v38 = vld [vmem:[#allocation3 + $0x18] sm:$0xff]  ;;  %v1440_v39 = vld [vmem:[#allocation3 + $0x20] sm:$0xff]  ;;  %v1446_v40 = vld [vmem:[#allocation3 + $0x88] sm:$0xff] }
  0x14   :  { %216 = vmatpush.msra.mxu3 %v1358_v14  ;;  %139 = vmatpush.msra.mxu2 %v1388_v23  ;;  %1996 = vst [vmem:[#allocation9_spill] sm:$0xff] %v1438_v38  ;;  %v1448_v41 = vld [vmem:[#allocation3] sm:$0xff]  ;;  %v1450_v42 = vld [vmem:[#allocation3 + $0x8] sm:$0xff]  ;;  %v1457_v43 = vld [vmem:[#allocation3 + $0x70] sm:$0xff] }
  0x15   :  { %102 = vmatpush.msra.mxu0 %v1368_v17  ;;  %122 = vmatpush.msra.mxu1 %v1370_v18  ;;  %1997 = vst [vmem:[#allocation10_spill] sm:$0xff] %v1440_v39  ;;  %v1462_v45 = vld [vmem:[#allocation3 + $0x58] sm:$0xff]  ;;  %v1466_v46 = vld [vmem:[#allocation3 + $0x40] sm:$0xff]  ;;  %v1472_v47 = vld [vmem:[#allocation3 + $0x28] sm:$0xff] }
  0x16   :  { %217 = vmatpush.msra.mxu3 %v1368_v17  ;;  %140 = vmatpush.msra.mxu2 %v1396_v25  ;;  %1998 = vst [vmem:[#allocation11_spill] sm:$0xff] %v1448_v41  ;;  %v1478_v48 = vld [vmem:[#allocation3 + $0x10] sm:$0xff]  ;;  %v92_v49 = vld [vmem:[%s1976_s0] sm:$0xff]  ;;  %v93_v50 = vld [vmem:[%s1976_s0 + $0x8] sm:$0xff] }
  0x17   :  { %103 = vmatpush.msra.mxu0 %v1378_v20  ;;  %123 = vmatpush.msra.mxu1 %v1380_v21  ;;  %1999 = vst [vmem:[#allocation12_spill] sm:$0xff] %v1450_v42 }
  0x18   :  { %218 = vmatpush.msra.mxu3 %v1378_v20  ;;  %141 = vmatpush.msra.mxu2 %v1406_v28  ;;  %2000 = vst [vmem:[#allocation13_spill] sm:$0xff] %v1472_v47 }
  0x19   :  { %104 = vmatpush.msra.mxu0 %v1386_v22  ;;  %124 = vmatpush.msra.mxu1 %v1390_v24  ;;  %2001 = vst [vmem:[#allocation14_spill] sm:$0xff] %v1478_v48 }
  0x1a   :  { %219 = vmatpush.msra.mxu3 %v1386_v22  ;;  %142 = vmatpush.msra.mxu2 %v1416_v31 }
  0x1b   :  { %105 = vmatpush.msra.mxu0 %v1398_v26  ;;  %125 = vmatpush.msra.mxu1 %v1400_v27 }
  0x1c   :  { %220 = vmatpush.msra.mxu3 %v1398_v26  ;;  %143 = vmatpush.msra.mxu2 %v1426_v34 }
  0x1d   :  { %106 = vmatpush.msra.mxu0 %v1408_v29  ;;  %126 = vmatpush.msra.mxu1 %v1410_v30 }
  0x1e   :  { %221 = vmatpush.msra.mxu3 %v1408_v29  ;;  %144 = vmatpush.msra.mxu2 %v1436_v37 }
  0x1f   :  { %107 = vmatpush.msra.mxu0 %v1418_v32  ;;  %127 = vmatpush.msra.mxu1 %v1420_v33 }
  0x20   :  { %222 = vmatpush.msra.mxu3 %v1418_v32  ;;  %145 = vmatpush.msra.mxu2 %v1446_v40 }
  0x21   :  { %108 = vmatpush.msra.mxu0 %v1428_v35  ;;  %128 = vmatpush.msra.mxu1 %v1430_v36 }
  0x22   :  { %223 = vmatpush.msra.mxu3 %v1428_v35  ;;  %146 = vmatpush.msra.mxu2 %v1457_v43 }
  0x23   :  { %109 = vmatpush.msra.mxu0 %v1438_v38  ;;  %129 = vmatpush.msra.mxu1 %v1440_v39 }
  0x24   :  { %224 = vmatpush.msra.mxu3 %v1438_v38  ;;  %147 = vmatpush.msra.mxu2 %v1462_v45 }
  0x25   :  { %110 = vmatpush.msra.mxu0 %v1448_v41  ;;  %130 = vmatpush.msra.mxu1 %v1450_v42 }
  0x26   :  { %111 = vmatmul.f32.vlgmr.msra.gmra.mxu0 %v1281_v44  ;;  %131 = vmatmul.f32.vlgmr.msra.gmra.mxu1 %v1281_v44 }
  0x27   :  { %230 = vmatpush.msrb.mxu0 %v1318_v1  ;;  %250 = vmatpush.msrb.mxu1 %v1351_v12 }
  0x28   :  { %225 = vmatpush.msra.mxu3 %v1448_v41  ;;  %148 = vmatpush.msra.mxu2 %v1466_v46 }
  0x29   :  { %231 = vmatpush.msrb.mxu0 %v1324_v3  ;;  %251 = vmatpush.msrb.mxu1 %v1356_v13 }
  0x2a   :  { %342 = vmatpush.msrb.mxu3 %v1318_v1  ;;  %149 = vmatpush.msra.mxu2 %v1472_v47 }
  0x2b   :  { %232 = vmatpush.msrb.mxu0 %v1328_v5  ;;  %252 = vmatpush.msrb.mxu1 %v1366_v16 }
  0x2c   :  { %343 = vmatpush.msrb.mxu3 %v1324_v3  ;;  %150 = vmatpush.msra.mxu2 %v1478_v48 }
  0x2d   :  { %233 = vmatpush.msrb.mxu0 %v1335_v7  ;;  %253 = vmatpush.msrb.mxu1 %v1376_v19 }
  0x2e   :  { %344 = vmatpush.msrb.mxu3 %v1328_v5  ;;  %151 = vmatmul.f32.vlgmr.msra.gmra.mxu2 %v1281_v44 }
  0x2f   :  { %234 = vmatpush.msrb.mxu0 %v1342_v9  ;;  %254 = vmatpush.msrb.mxu1 %v1388_v23 }
  0x30   :  { %322 = vmatpush.msrb.mxu2 %v1316_v0  ;;  %345 = vmatpush.msrb.mxu3 %v1335_v7 }
  0x31   :  { %235 = vmatpush.msrb.mxu0 %v1349_v11  ;;  %255 = vmatpush.msrb.mxu1 %v1396_v25 }
  0x32   :  { %323 = vmatpush.msrb.mxu2 %v1320_v2  ;;  %346 = vmatpush.msrb.mxu3 %v1342_v9 }
  0x33   :  { %236 = vmatpush.msrb.mxu0 %v1360_v15  ;;  %256 = vmatpush.msrb.mxu1 %v1406_v28 }
  0x34   :  { %324 = vmatpush.msrb.mxu2 %v1326_v4  ;;  %347 = vmatpush.msrb.mxu3 %v1349_v11 }
  0x35   :  { %237 = vmatpush.msrb.mxu0 %v1370_v18  ;;  %257 = vmatpush.msrb.mxu1 %v1416_v31 }
  0x36   :  { %325 = vmatpush.msrb.mxu2 %v1333_v6  ;;  %348 = vmatpush.msrb.mxu3 %v1360_v15 }
  0x37   :  { %238 = vmatpush.msrb.mxu0 %v1380_v21  ;;  %258 = vmatpush.msrb.mxu1 %v1426_v34 }
  0x38   :  { %326 = vmatpush.msrb.mxu2 %v1340_v8  ;;  %349 = vmatpush.msrb.mxu3 %v1370_v18 }
  0x39   :  { %239 = vmatpush.msrb.mxu0 %v1390_v24  ;;  %259 = vmatpush.msrb.mxu1 %v1436_v37 }
  0x3a   :  { %327 = vmatpush.msrb.mxu2 %v1347_v10  ;;  %350 = vmatpush.msrb.mxu3 %v1380_v21 }
  0x3b   :  { %240 = vmatpush.msrb.mxu0 %v1400_v27  ;;  %260 = vmatpush.msrb.mxu1 %v1446_v40 }
  0x3c   :  { %328 = vmatpush.msrb.mxu2 %v1358_v14  ;;  %351 = vmatpush.msrb.mxu3 %v1390_v24 }
  0x3d   :  { %241 = vmatpush.msrb.mxu0 %v1410_v30  ;;  %261 = vmatpush.msrb.mxu1 %v1457_v43 }
  0x3e   :  { %329 = vmatpush.msrb.mxu2 %v1368_v17  ;;  %352 = vmatpush.msrb.mxu3 %v1400_v27 }
  0x3f   :  { %242 = vmatpush.msrb.mxu0 %v1420_v33  ;;  %262 = vmatpush.msrb.mxu1 %v1462_v45 }
  0x40   :  { %330 = vmatpush.msrb.mxu2 %v1378_v20  ;;  %353 = vmatpush.msrb.mxu3 %v1410_v30 }
  0x41   :  { %243 = vmatpush.msrb.mxu0 %v1430_v36  ;;  %263 = vmatpush.msrb.mxu1 %v1466_v46 }
  0x42   :  { %331 = vmatpush.msrb.mxu2 %v1386_v22  ;;  %354 = vmatpush.msrb.mxu3 %v1420_v33 }
  0x43   :  { %244 = vmatpush.msrb.mxu0 %v1440_v39  ;;  %264 = vmatpush.msrb.mxu1 %v1472_v47 }
  0x44   :  { %332 = vmatpush.msrb.mxu2 %v1398_v26  ;;  %355 = vmatpush.msrb.mxu3 %v1430_v36 }
  0x45   :  { %245 = vmatpush.msrb.mxu0 %v1450_v42  ;;  %265 = vmatpush.msrb.mxu1 %v1478_v48 }
  0x46   :  { %333 = vmatpush.msrb.mxu2 %v1408_v29  ;;  %356 = vmatpush.msrb.mxu3 %v1440_v39 }
  0x47   :  { %362 = vmatpush.msra.mxu0 %v1351_v12  ;;  %434 = vmatpush.msra.mxu1 %v1316_v0 }
  0x48   :  { %334 = vmatpush.msrb.mxu2 %v1418_v32  ;;  %357 = vmatpush.msrb.mxu3 %v1450_v42 }
  0x49   :  { %363 = vmatpush.msra.mxu0 %v1356_v13  ;;  %435 = vmatpush.msra.mxu1 %v1320_v2 }
  0x4a   :  { %335 = vmatpush.msrb.mxu2 %v1428_v35 }
  0x4b   :  { %364 = vmatpush.msra.mxu0 %v1366_v16  ;;  %436 = vmatpush.msra.mxu1 %v1326_v4 }
  0x4c   :  { %336 = vmatpush.msrb.mxu2 %v1438_v38 }
  0x4d   :  { %365 = vmatpush.msra.mxu0 %v1376_v19  ;;  %437 = vmatpush.msra.mxu1 %v1333_v6 }
  0x4e   :  { %337 = vmatpush.msrb.mxu2 %v1448_v41 }
  0x4f   :  { %366 = vmatpush.msra.mxu0 %v1388_v23  ;;  %438 = vmatpush.msra.mxu1 %v1340_v8 }
  0x50   :  { %454 = vmatpush.msra.mxu2 %v1318_v1 }
  0x51   :  { %367 = vmatpush.msra.mxu0 %v1396_v25  ;;  %439 = vmatpush.msra.mxu1 %v1347_v10 }
  0x52   :  { %455 = vmatpush.msra.mxu2 %v1324_v3 }
  0x53   :  { %368 = vmatpush.msra.mxu0 %v1406_v28  ;;  %440 = vmatpush.msra.mxu1 %v1358_v14 }
  0x54   :  { %456 = vmatpush.msra.mxu2 %v1328_v5 }
  0x55   :  { %369 = vmatpush.msra.mxu0 %v1416_v31  ;;  %441 = vmatpush.msra.mxu1 %v1368_v17 }
  0x56   :  { %457 = vmatpush.msra.mxu2 %v1335_v7 }
  0x57   :  { %370 = vmatpush.msra.mxu0 %v1426_v34  ;;  %442 = vmatpush.msra.mxu1 %v1378_v20 }
  0x58   :  { %458 = vmatpush.msra.mxu2 %v1342_v9 }
  0x59   :  { %371 = vmatpush.msra.mxu0 %v1436_v37  ;;  %443 = vmatpush.msra.mxu1 %v1386_v22 }
  0x5a   :  { %459 = vmatpush.msra.mxu2 %v1349_v11 }
  0x5b   :  { %372 = vmatpush.msra.mxu0 %v1446_v40  ;;  %444 = vmatpush.msra.mxu1 %v1398_v26 }
  0x5c   :  { %460 = vmatpush.msra.mxu2 %v1360_v15 }
  0x5d   :  { %373 = vmatpush.msra.mxu0 %v1457_v43  ;;  %445 = vmatpush.msra.mxu1 %v1408_v29 }
  0x5e   :  { %461 = vmatpush.msra.mxu2 %v1370_v18 }
  0x5f   :  { %374 = vmatpush.msra.mxu0 %v1462_v45  ;;  %446 = vmatpush.msra.mxu1 %v1418_v32 }
  0x60   :  { %462 = vmatpush.msra.mxu2 %v1380_v21 }
  0x61   :  { %375 = vmatpush.msra.mxu0 %v1466_v46  ;;  %447 = vmatpush.msra.mxu1 %v1428_v35 }
  0x62   :  { %463 = vmatpush.msra.mxu2 %v1390_v24 }
  0x63   :  { %376 = vmatpush.msra.mxu0 %v1472_v47  ;;  %448 = vmatpush.msra.mxu1 %v1438_v38 }
  0x64   :  { %464 = vmatpush.msra.mxu2 %v1400_v27 }
  0x65   :  { %377 = vmatpush.msra.mxu0 %v1478_v48  ;;  %449 = vmatpush.msra.mxu1 %v1448_v41 }
  0x66   :  { %465 = vmatpush.msra.mxu2 %v1410_v30 }
  0x68   :  { %466 = vmatpush.msra.mxu2 %v1420_v33 }
  0x6a   :  { %467 = vmatpush.msra.mxu2 %v1430_v36 }
  0x6c   :  { %468 = vmatpush.msra.mxu2 %v1440_v39 }
  0x6e   :  { %469 = vmatpush.msra.mxu2 %v1450_v42 }
  0xa3   :  { %v112_v51 = vpop.f32.mrf.mxu0  ;;  %v132_v52 = vpop.f32.mrf.mxu1 }
  0xa4   :  { %v155_v53 = vadd.f32 %v112_v51, %v92_v49  ;;  %v175_v54 = vadd.f32 %v132_v52, %v93_v50  ;;  %v1597_v49 = vld [vmem:[%s1978_s2] ss:$0 sm:$0xff] }
  0xa5   :  { %2002 = vst [vmem:[#allocation15_spill] sm:$0xff] %v1597_v49 }
  0xa6   :  { %v1053_v55 = vmul.f32 -1.442695, %v155_v53  ;;  %v1054_v56 = vmul.f32 -1.442695, %v175_v54 }
  0xa8   :  { %1097 = vpow2.f32 %v1053_v55 }
  0xa9   :  { %1099 = vpow2.f32 %v1054_v56 }
  0xae   :  { %v1098_v57 = vpop.eup %1097 }
  0xaf   :  { %v1100_v58 = vpop.eup %1099  ;;  %v159_v59 = vadd.f32 1.0, %v1098_v57 }
  0xb0   :  { %v179_v60 = vadd.f32 1.0, %v1100_v58 }
  0xb1   :  { %1101 = vrcp.f32 %v159_v59  ;;  %v152_v51 = vpop.f32.mrf.mxu2  ;;  %v171_v52 = vand.u32 2147483648, %v159_v59  ;;  %v169_v54 = vand.u32 2147483647, %v159_v59  ;;  %vm165_vm1 = vweird.f32 %v159_v59 }
  0xb2   :  { %1103 = vrcp.f32 %v179_v60  ;;  %v198_v57 = vadd.f32 %v1597_v49, %v152_v51  ;;  %vm185_vm4 = vweird.f32 %v179_v60  ;;  %v191_v39 = vand.u32 2147483648, %v179_v60 }
  0xb3   :  { %v172_v58 = vor.u32 1.1754944e-38, %v171_v52  ;;  %vm170_vm3 = vcmp.eq.f32.partialorder %v169_v54, 8.507059e+37  ;;  %v189_v38 = vand.u32 2147483647, %v179_v60 }
  0xb4   :  { %v192_v51 = vor.u32 1.1754944e-38, %v191_v39  ;;  %v2004_v39 = vld [vmem:[#allocation10_spill] sm:$0xff] }
  0xb5   :  { %vm190_vm7 = vcmp.eq.f32.partialorder %v189_v38, 8.507059e+37  ;;  %v2003_v38 = vld [vmem:[#allocation9_spill] sm:$0xff] }
  0xb7   :  { %v1102_v61 = vpop.eup %1101 }
  0xb8   :  { %v1104_v62 = vpop.eup %1103  ;;  %v161_v63 = vmul.f32 %v1102_v61, %v159_v59  ;;  %vm166_vm0 = vweird.f32 %v1102_v61 }
  0xb9   :  { %v181_v44 = vmul.f32 %v1104_v62, %v179_v60  ;;  %vm167_vm2 = vmor %vm165_vm1, %vm166_vm0  ;;  %vm186_vm5 = vweird.f32 %v1104_v62  ;;  %v2007_v60 = vld [vmem:[#allocation12_spill] sm:$0xff] }
  0xba   :  { %v162_v42 = vsub.f32 1.0, %v161_v63  ;;  %v94_v63 = vld [vmem:[%s1976_s0 + $0x10] sm:$0xff]  ;;  %vm187_vm6 = vmor %vm185_vm4, %vm186_vm5 }
  0xbb   :  { %v182_v50 = vsub.f32 1.0, %v181_v44 }
  0xbc   :  { %v163_v53 = vmul.f32 %v1102_v61, %v162_v42 }
  0xbd   :  { %v183_v55 = vmul.f32 %v1104_v62, %v182_v50 }
  0xbe   :  { %v164_v56 = vadd.f32 %v1102_v61, %v163_v53 }
  0xbf   :  { %v184_v48 = vadd.f32 %v1104_v62, %v183_v55 }
  0xc0   :  { %v168_v41 = vsel %vm167_vm2, %v1102_v61, %v164_v56 }
  0xc1   :  { %v173_v44 = vsel %vm170_vm3, %v172_v58, %v168_v41  ;;  %v188_v59 = vsel %vm187_vm6, %v1104_v62, %v184_v48  ;;  %v2005_v41 = vld [vmem:[#allocation14_spill] sm:$0xff]  ;;  %v2006_v48 = vld [vmem:[#allocation11_spill] sm:$0xff]  ;;  %v1056_v62 = vld [vmem:[%s1976_s0 + $0x20] sm:$0xff] }
  0xc2   :  { %v199_v42 = vmul.f32 %v198_v57, %v173_v44  ;;  %v193_v52 = vsel %vm190_vm7, %v192_v51, %v188_v59 }
  0xc3   :  { %v202_v61 = vsub.f32 1.0, %v193_v52  ;;  %v204_v56 = vmul.f32 0.0, %v193_v52 }
  0xc4   :  { %v200_v50 = vadd.f32 %v199_v42, %v94_v63  ;;  %v1055_v63 = vld [vmem:[%s1976_s0 + $0x18] sm:$0xff] }
  0xc6   :  { %1105 = vtanh.f32 %v200_v50 }
  0xcc   :  { %v1106_v53 = vpop.eup %1105 }
  0xcd   :  { %v203_v54 = vmul.f32 %v1106_v53, %v202_v61 }
  0xcf   :  { %v1603_v49 = vadd.f32 %v204_v56, %v203_v54 }
  0xd1   :  { %226 = vmatmul.f32.vlgmr.msra.gmra.mxu3 %v1603_v49  ;;  %246 = vmatmul.f32.vlgmr.msrb.gmra.mxu0 %v1603_v49 }
  0xd2   :  { %266 = vmatmul.f32.vlgmr.msrb.gmra.mxu1 %v1603_v49  ;;  %474 = vmatpush.msra.mxu3 %v1351_v12 }
  0xd3   :  { %546 = vmatpush.msrb.mxu0 %v1316_v0  ;;  %566 = vmatpush.msrb.mxu1 %v1318_v1 }
  0xd4   :  { %475 = vmatpush.msra.mxu3 %v1356_v13 }
  0xd5   :  { %547 = vmatpush.msrb.mxu0 %v1320_v2  ;;  %567 = vmatpush.msrb.mxu1 %v1324_v3 }
  0xd6   :  { %476 = vmatpush.msra.mxu3 %v1366_v16 }
  0xd7   :  { %548 = vmatpush.msrb.mxu0 %v1326_v4  ;;  %568 = vmatpush.msrb.mxu1 %v1328_v5 }
  0xd8   :  { %477 = vmatpush.msra.mxu3 %v1376_v19 }
  0xd9   :  { %549 = vmatpush.msrb.mxu0 %v1333_v6  ;;  %569 = vmatpush.msrb.mxu1 %v1335_v7 }
  0xda   :  { %478 = vmatpush.msra.mxu3 %v1388_v23 }
  0xdb   :  { %550 = vmatpush.msrb.mxu0 %v1340_v8  ;;  %570 = vmatpush.msrb.mxu1 %v1342_v9 }
  0xdc   :  { %479 = vmatpush.msra.mxu3 %v1396_v25 }
  0xdd   :  { %551 = vmatpush.msrb.mxu0 %v1347_v10  ;;  %571 = vmatpush.msrb.mxu1 %v1349_v11 }
  0xde   :  { %480 = vmatpush.msra.mxu3 %v1406_v28 }
  0xdf   :  { %552 = vmatpush.msrb.mxu0 %v1358_v14  ;;  %572 = vmatpush.msrb.mxu1 %v1360_v15 }
  0xe0   :  { %481 = vmatpush.msra.mxu3 %v1416_v31 }
  0xe1   :  { %553 = vmatpush.msrb.mxu0 %v1368_v17  ;;  %573 = vmatpush.msrb.mxu1 %v1370_v18 }
  0xe2   :  { %482 = vmatpush.msra.mxu3 %v1426_v34 }
  0xe3   :  { %554 = vmatpush.msrb.mxu0 %v1378_v20  ;;  %574 = vmatpush.msrb.mxu1 %v1380_v21 }
  0xe4   :  { %483 = vmatpush.msra.mxu3 %v1436_v37 }
  0xe5   :  { %555 = vmatpush.msrb.mxu0 %v1386_v22  ;;  %575 = vmatpush.msrb.mxu1 %v1390_v24 }
  0xe6   :  { %484 = vmatpush.msra.mxu3 %v1446_v40 }
  0xe7   :  { %556 = vmatpush.msrb.mxu0 %v1398_v26  ;;  %576 = vmatpush.msrb.mxu1 %v1400_v27 }
  0xe8   :  { %485 = vmatpush.msra.mxu3 %v1457_v43 }
  0xe9   :  { %557 = vmatpush.msrb.mxu0 %v1408_v29  ;;  %577 = vmatpush.msrb.mxu1 %v1410_v30 }
  0xea   :  { %486 = vmatpush.msra.mxu3 %v1462_v45 }
  0xeb   :  { %558 = vmatpush.msrb.mxu0 %v1418_v32  ;;  %578 = vmatpush.msrb.mxu1 %v1420_v33 }
  0xec   :  { %487 = vmatpush.msra.mxu3 %v1466_v46 }
  0xed   :  { %559 = vmatpush.msrb.mxu0 %v1428_v35  ;;  %579 = vmatpush.msrb.mxu1 %v1430_v36 }
  0xee   :  { %488 = vmatpush.msra.mxu3 %v1472_v47 }
  0xef   :  { %560 = vmatpush.msrb.mxu0 %v2003_v38  ;;  %580 = vmatpush.msrb.mxu1 %v2004_v39 }
  0xf0   :  { %489 = vmatpush.msra.mxu3 %v2005_v41 }
  0xf1   :  { %561 = vmatpush.msrb.mxu0 %v2006_v48  ;;  %581 = vmatpush.msrb.mxu1 %v2007_v60 }
 0x14e   :  { %v247_v55 = vpop.f32.mrf.mxu0 }
 0x14f   :  { %v290_v57 = vadd.f32 %v1056_v62, %v247_v55 }
 0x151   :  { %v1059_v58 = vmul.f32 -1.442695, %v290_v57 }
 0x153   :  { %1107 = vpow2.f32 %v1059_v58 }
 0x154   :  { %v227_v44 = vpop.f32.mrf.mxu3 }
 0x155   :  { %v270_v42 = vadd.f32 %v1055_v63, %v227_v44  ;;  %v267_v63 = vpop.f32.mrf.mxu1 }
 0x157   :  { %v1058_v50 = vmul.f32 -1.442695, %v270_v42 }
 0x159   :  { %v1108_v59 = vpop.eup %1107  ;;  %1109 = vpow2.f32 %v1058_v50  ;;  %v2008_v50 = vld [vmem:[#allocation15_spill] sm:$0xff] }
 0x15a   :  { %v294_v51 = vadd.f32 1.0, %v1108_v59  ;;  %v310_v59 = vadd.f32 %v2008_v50, %v267_v63 }
 0x15c   :  { %1111 = vrcp.f32 %v294_v51  ;;  %vm300_vm13 = vweird.f32 %v294_v51 }
 0x15f   :  { %v1110_v52 = vpop.eup %1109 }
 0x160   :  { %v274_v61 = vadd.f32 1.0, %v1110_v52 }
 0x162   :  { %1113 = vrcp.f32 %v274_v61  ;;  %v1112_v53 = vpop.eup %1111  ;;  %v286_v60 = vand.u32 2147483648, %v274_v61  ;;  %v284_v58 = vand.u32 2147483647, %v274_v61  ;;  %vm280_vm9 = vweird.f32 %v274_v61 }
 0x163   :  { %v296_v54 = vmul.f32 %v1112_v53, %v294_v51  ;;  %vm301_vm12 = vweird.f32 %v1112_v53 }
 0x164   :  { %v287_v42 = vor.u32 1.1754944e-38, %v286_v60  ;;  %vm285_vm11 = vcmp.eq.f32.partialorder %v284_v58, 8.507059e+37  ;;  %vm302_vm14 = vmor %vm300_vm13, %vm301_vm12 }
 0x165   :  { %v297_v55 = vsub.f32 1.0, %v296_v54  ;;  %v1057_v54 = vld [vmem:[%s1976_s0 + $0x28] sm:$0xff] }
 0x167   :  { %v298_v41 = vmul.f32 %v1112_v53, %v297_v55  ;;  %v304_v55 = vand.u32 2147483647, %v294_v51 }
 0x168   :  { %v1114_v56 = vpop.eup %1113 }
 0x169   :  { %v276_v62 = vmul.f32 %v1114_v56, %v274_v61  ;;  %vm281_vm8 = vweird.f32 %v1114_v56  ;;  %vm305_vm15 = vcmp.eq.f32.partialorder %v304_v55, 8.507059e+37 }
 0x16a   :  { %vm282_vm10 = vmor %vm280_vm9, %vm281_vm8 }
 0x16b   :  { %v277_v57 = vsub.f32 1.0, %v276_v62  ;;  %v299_v62 = vadd.f32 %v1112_v53, %v298_v41  ;;  %v2013_v41 = vld [vmem:[#allocation11_spill] sm:$0xff] }
 0x16d   :  { %v278_v48 = vmul.f32 %v1114_v56, %v277_v57  ;;  %v306_v57 = vand.u32 2147483648, %v294_v51  ;;  %v303_v61 = vsel %vm302_vm14, %v1112_v53, %v299_v62  ;;  %v2014_v51 = vld [vmem:[#allocation12_spill] sm:$0xff]  ;;  %v1060_v53 = vld [vmem:[%s1976_s0 + $0x30] sm:$0xff] }
 0x16f   :  { %v279_v44 = vadd.f32 %v1114_v56, %v278_v48  ;;  %v307_v47 = vor.u32 1.1754944e-38, %v306_v57 }
 0x171   :  { %v283_v52 = vsel %vm282_vm10, %v1114_v56, %v279_v44  ;;  %v308_v60 = vsel %vm305_vm15, %v307_v47, %v303_v61  ;;  %v2009_v47 = vld [vmem:[#allocation13_spill] sm:$0xff] }
 0x172   :  { %v288_v39 = vsel %vm285_vm11, %v287_v42, %v283_v52  ;;  %v314_v56 = vsub.f32 1.0, %v308_v60  ;;  %v316_v44 = vmul.f32 %v308_v60, %v1603_v49  ;;  %v2010_v49 = vld [vmem:[#allocation9_spill] sm:$0xff] }
 0x173   :  { %v311_v38 = vmul.f32 %v310_v59, %v288_v39  ;;  %v2012_v39 = vld [vmem:[#allocation14_spill] sm:$0xff]  ;;  %v1061_v59 = vld [vmem:[%s1976_s0 + $0x38] sm:$0xff] }
 0x175   :  { %v312_v48 = vadd.f32 %v1057_v54, %v311_v38  ;;  %v2011_v38 = vld [vmem:[#allocation10_spill] sm:$0xff] }
 0x177   :  { %1115 = vtanh.f32 %v312_v48 }
 0x17d   :  { %v1116_v58 = vpop.eup %1115 }
 0x17e   :  { %v315_v63 = vmul.f32 %v1116_v58, %v314_v56 }
 0x180   :  { %v1667_v42 = vadd.f32 %v316_v44, %v315_v63 }
 0x182   :  { %338 = vmatmul.f32.vlgmr.msrb.gmra.mxu2 %v1667_v42  ;;  %358 = vmatmul.f32.vlgmr.msrb.gmra.mxu3 %v1667_v42 }
 0x183   :  { %378 = vmatmul.f32.vlgmr.msra.gmra.mxu0 %v1667_v42  ;;  %586 = vmatpush.msrb.mxu2 %v1351_v12 }
 0x184   :  { %658 = vmatpush.msrb.mxu3 %v1316_v0  ;;  %678 = vmatpush.msra.mxu0 %v1318_v1 }
 0x185   :  { %587 = vmatpush.msrb.mxu2 %v1356_v13 }
 0x186   :  { %659 = vmatpush.msrb.mxu3 %v1320_v2  ;;  %679 = vmatpush.msra.mxu0 %v1324_v3 }
 0x187   :  { %588 = vmatpush.msrb.mxu2 %v1366_v16 }
 0x188   :  { %660 = vmatpush.msrb.mxu3 %v1326_v4  ;;  %680 = vmatpush.msra.mxu0 %v1328_v5 }
 0x189   :  { %589 = vmatpush.msrb.mxu2 %v1376_v19 }
 0x18a   :  { %661 = vmatpush.msrb.mxu3 %v1333_v6  ;;  %681 = vmatpush.msra.mxu0 %v1335_v7 }
 0x18b   :  { %590 = vmatpush.msrb.mxu2 %v1388_v23 }
 0x18c   :  { %662 = vmatpush.msrb.mxu3 %v1340_v8  ;;  %682 = vmatpush.msra.mxu0 %v1342_v9 }
 0x18d   :  { %591 = vmatpush.msrb.mxu2 %v1396_v25 }
 0x18e   :  { %663 = vmatpush.msrb.mxu3 %v1347_v10  ;;  %683 = vmatpush.msra.mxu0 %v1349_v11 }
 0x18f   :  { %592 = vmatpush.msrb.mxu2 %v1406_v28 }
 0x190   :  { %664 = vmatpush.msrb.mxu3 %v1358_v14  ;;  %684 = vmatpush.msra.mxu0 %v1360_v15 }
 0x191   :  { %593 = vmatpush.msrb.mxu2 %v1416_v31 }
 0x192   :  { %665 = vmatpush.msrb.mxu3 %v1368_v17  ;;  %685 = vmatpush.msra.mxu0 %v1370_v18 }
 0x193   :  { %594 = vmatpush.msrb.mxu2 %v1426_v34 }
 0x194   :  { %666 = vmatpush.msrb.mxu3 %v1378_v20  ;;  %686 = vmatpush.msra.mxu0 %v1380_v21 }
 0x195   :  { %595 = vmatpush.msrb.mxu2 %v1436_v37 }
 0x196   :  { %667 = vmatpush.msrb.mxu3 %v1386_v22  ;;  %687 = vmatpush.msra.mxu0 %v1390_v24 }
 0x197   :  { %596 = vmatpush.msrb.mxu2 %v1446_v40 }
 0x198   :  { %668 = vmatpush.msrb.mxu3 %v1398_v26  ;;  %688 = vmatpush.msra.mxu0 %v1400_v27 }
 0x199   :  { %597 = vmatpush.msrb.mxu2 %v1457_v43 }
 0x19a   :  { %669 = vmatpush.msrb.mxu3 %v1408_v29  ;;  %689 = vmatpush.msra.mxu0 %v1410_v30 }
 0x19b   :  { %598 = vmatpush.msrb.mxu2 %v1462_v45 }
 0x19c   :  { %670 = vmatpush.msrb.mxu3 %v1418_v32  ;;  %690 = vmatpush.msra.mxu0 %v1420_v33 }
 0x19d   :  { %599 = vmatpush.msrb.mxu2 %v1466_v46 }
 0x19e   :  { %671 = vmatpush.msrb.mxu3 %v1428_v35  ;;  %691 = vmatpush.msra.mxu0 %v1430_v36 }
 0x19f   :  { %600 = vmatpush.msrb.mxu2 %v2009_v47 }
 0x1a0   :  { %672 = vmatpush.msrb.mxu3 %v2010_v49  ;;  %692 = vmatpush.msra.mxu0 %v2011_v38 }
 0x1a1   :  { %601 = vmatpush.msrb.mxu2 %v2012_v39 }
 0x1a2   :  { %673 = vmatpush.msrb.mxu3 %v2013_v41  ;;  %693 = vmatpush.msra.mxu0 %v2014_v51 }
 0x205   :  { %v339_v52 = vpop.f32.mrf.mxu2  ;;  %v359_v54 = vpop.f32.mrf.mxu3 }
 0x206   :  { %v382_v62 = vadd.f32 %v1060_v53, %v339_v52  ;;  %v402_v57 = vadd.f32 %v1061_v59, %v359_v54  ;;  %v379_v59 = vpop.f32.mrf.mxu0 }
 0x208   :  { %v1063_v55 = vmul.f32 -1.442695, %v382_v62  ;;  %v1064_v48 = vmul.f32 -1.442695, %v402_v57  ;;  %v422_v57 = vadd.f32 %v2008_v50, %v379_v59 }
 0x20a   :  { %1117 = vpow2.f32 %v1063_v55 }
 0x20b   :  { %1119 = vpow2.f32 %v1064_v48 }
 0x210   :  { %v1118_v61 = vpop.eup %1117 }
 0x211   :  { %v1120_v60 = vpop.eup %1119  ;;  %v386_v56 = vadd.f32 1.0, %v1118_v61 }
 0x212   :  { %v406_v58 = vadd.f32 1.0, %v1120_v60 }
 0x213   :  { %1121 = vrcp.f32 %v386_v56  ;;  %v398_v38 = vand.u32 2147483648, %v386_v56  ;;  %v396_v53 = vand.u32 2147483647, %v386_v56  ;;  %vm392_vm1 = vweird.f32 %v386_v56 }
 0x214   :  { %1123 = vrcp.f32 %v406_v58  ;;  %vm412_vm5 = vweird.f32 %v406_v58  ;;  %v416_v60 = vand.u32 2147483647, %v406_v58 }
 0x215   :  { %v399_v62 = vor.u32 1.1754944e-38, %v398_v38  ;;  %vm397_vm3 = vcmp.eq.f32.partialorder %v396_v53, 8.507059e+37 }
 0x216   :  { %vm417_vm7 = vcmp.eq.f32.partialorder %v416_v60, 8.507059e+37  ;;  %v1182_v60 = vld [vmem:[#allocation3 + $0x158] sm:$0xff] }
 0x219   :  { %v1122_v63 = vpop.eup %1121 }
 0x21a   :  { %v1124_v44 = vpop.eup %1123  ;;  %v388_v51 = vmul.f32 %v1122_v63, %v386_v56  ;;  %vm393_vm0 = vweird.f32 %v1122_v63 }
 0x21b   :  { %v408_v41 = vmul.f32 %v1124_v44, %v406_v58  ;;  %vm394_vm2 = vmor %vm392_vm1, %vm393_vm0  ;;  %vm413_vm4 = vweird.f32 %v1124_v44 }
 0x21c   :  { %v389_v39 = vsub.f32 1.0, %v388_v51  ;;  %v1062_v51 = vld [vmem:[%s1976_s0 + $0x40] sm:$0xff]  ;;  %vm414_vm6 = vmor %vm412_vm5, %vm413_vm4 }
 0x21d   :  { %v409_v49 = vsub.f32 1.0, %v408_v41 }
 0x21e   :  { %v390_v47 = vmul.f32 %v1122_v63, %v389_v39  ;;  %v418_v39 = vand.u32 2147483648, %v406_v58 }
 0x21f   :  { %v410_v52 = vmul.f32 %v1124_v44, %v409_v49 }
 0x220   :  { %v391_v54 = vadd.f32 %v1122_v63, %v390_v47  ;;  %v419_v56 = vor.u32 1.1754944e-38, %v418_v39  ;;  %v1803_v39 = vld [vmem:[#allocation3 + $0x160] sm:$0xff] }
 0x221   :  { %v411_v61 = vadd.f32 %v1124_v44, %v410_v52 }
 0x222   :  { %v395_v55 = vsel %vm394_vm2, %v1122_v63, %v391_v54 }
 0x223   :  { %v400_v48 = vsel %vm397_vm3, %v399_v62, %v395_v55  ;;  %v415_v49 = vsel %vm414_vm6, %v1124_v44, %v411_v61  ;;  %v1179_v61 = vld [vmem:[#allocation3 + $0x170] sm:$0xff] }
 0x224   :  { %v423_v41 = vmul.f32 %v422_v57, %v400_v48  ;;  %v420_v38 = vsel %vm417_vm7, %v419_v56, %v415_v49  ;;  %v1800_v48 = vld [vmem:[#allocation3 + $0x178] sm:$0xff]  ;;  %v1185_v56 = vld [vmem:[#allocation3 + $0x140] sm:$0xff] }
 0x225   :  { %v426_v63 = vsub.f32 1.0, %v420_v38  ;;  %v428_v54 = vmul.f32 %v420_v38, %v1667_v42  ;;  %v1184_v49 = vld [vmem:[#allocation3 + $0x138] sm:$0xff]  ;;  %v1809_v38 = vld [vmem:[#allocation3 + $0x130] sm:$0xff] }
 0x226   :  { %v424_v47 = vadd.f32 %v1062_v51, %v423_v41  ;;  %v1178_v51 = vld [vmem:[#allocation3 + $0x168] sm:$0xff]  ;;  %v1181_v41 = vld [vmem:[#allocation3 + $0x150] sm:$0xff] }
 0x228   :  { %1125 = vtanh.f32 %v424_v47  ;;  %v1806_v47 = vld [vmem:[#allocation3 + $0x148] sm:$0xff] }
 0x22e   :  { %v1126_v53 = vpop.eup %1125 }
 0x22f   :  { %v427_v59 = vmul.f32 %v1126_v53, %v426_v63  ;;  %v1187_v63 = vld [vmem:[#allocation3 + $0x120] sm:$0xff]  ;;  %v1188_v53 = vld [vmem:[#allocation3 + $0x128] sm:$0xff] }
 0x231   :  { %v1731_v62 = vadd.f32 %v428_v54, %v427_v59  ;;  %v1812_v59 = vld [vmem:[#allocation3 + $0x118] sm:$0xff]  ;;  %v1190_v54 = vld [vmem:[#allocation3 + $0x108] sm:$0xff] }
 0x233   :  { %450 = vmatmul.f32.vlgmr.msra.gmra.mxu1 %v1731_v62  ;;  %470 = vmatmul.f32.vlgmr.msra.gmra.mxu2 %v1731_v62 }
 0x234   :  { %490 = vmatmul.f32.vlgmr.msra.gmra.mxu3 %v1731_v62  ;;  %698 = vmatpush.msra.mxu1 %v1351_v12 }
 0x235   :  { %770 = vmatpush.msra.mxu2 %v1316_v0  ;;  %790 = vmatpush.msra.mxu3 %v1318_v1  ;;  %v2015_v0 = vld [vmem:[#allocation13_spill] sm:$0xff] }
 0x236   :  { %699 = vmatpush.msra.mxu1 %v1356_v13  ;;  %v2016_v1 = vld [vmem:[#allocation9_spill] sm:$0xff] }
 0x237   :  { %771 = vmatpush.msra.mxu2 %v1320_v2  ;;  %791 = vmatpush.msra.mxu3 %v1324_v3  ;;  %v2017_v2 = vld [vmem:[#allocation10_spill] sm:$0xff] }
 0x238   :  { %700 = vmatpush.msra.mxu1 %v1366_v16  ;;  %v2018_v3 = vld [vmem:[#allocation14_spill] sm:$0xff] }
 0x239   :  { %772 = vmatpush.msra.mxu2 %v1326_v4  ;;  %792 = vmatpush.msra.mxu3 %v1328_v5  ;;  %v2019_v4 = vld [vmem:[#allocation11_spill] sm:$0xff]  ;;  %v2020_v5 = vld [vmem:[#allocation12_spill] sm:$0xff] }
 0x23a   :  { %701 = vmatpush.msra.mxu1 %v1376_v19 }
 0x23b   :  { %773 = vmatpush.msra.mxu2 %v1333_v6  ;;  %793 = vmatpush.msra.mxu3 %v1335_v7  ;;  %v1065_v6 = vld [vmem:[%s1976_s0 + $0x48] sm:$0xff] }
 0x23c   :  { %702 = vmatpush.msra.mxu1 %v1388_v23 }
 0x23d   :  { %774 = vmatpush.msra.mxu2 %v1340_v8  ;;  %794 = vmatpush.msra.mxu3 %v1342_v9 }
 0x23e   :  { %703 = vmatpush.msra.mxu1 %v1396_v25 }
 0x23f   :  { %775 = vmatpush.msra.mxu2 %v1347_v10  ;;  %795 = vmatpush.msra.mxu3 %v1349_v11  ;;  %v1066_v10 = vld [vmem:[%s1976_s0 + $0x50] sm:$0xff] }
 0x240   :  { %704 = vmatpush.msra.mxu1 %v1406_v28 }
 0x241   :  { %776 = vmatpush.msra.mxu2 %v1358_v14  ;;  %796 = vmatpush.msra.mxu3 %v1360_v15 }
 0x242   :  { %705 = vmatpush.msra.mxu1 %v1416_v31 }
 0x243   :  { %777 = vmatpush.msra.mxu2 %v1368_v17  ;;  %797 = vmatpush.msra.mxu3 %v1370_v18 }
 0x244   :  { %706 = vmatpush.msra.mxu1 %v1426_v34 }
 0x245   :  { %778 = vmatpush.msra.mxu2 %v1378_v20  ;;  %798 = vmatpush.msra.mxu3 %v1380_v21 }
 0x246   :  { %707 = vmatpush.msra.mxu1 %v1436_v37 }
 0x247   :  { %779 = vmatpush.msra.mxu2 %v1386_v22  ;;  %799 = vmatpush.msra.mxu3 %v1390_v24 }
 0x248   :  { %708 = vmatpush.msra.mxu1 %v1446_v40 }
 0x249   :  { %780 = vmatpush.msra.mxu2 %v1398_v26  ;;  %800 = vmatpush.msra.mxu3 %v1400_v27 }
 0x24a   :  { %709 = vmatpush.msra.mxu1 %v1457_v43 }
 0x24b   :  { %781 = vmatpush.msra.mxu2 %v1408_v29  ;;  %801 = vmatpush.msra.mxu3 %v1410_v30 }
 0x24c   :  { %710 = vmatpush.msra.mxu1 %v1462_v45 }
 0x24d   :  { %782 = vmatpush.msra.mxu2 %v1418_v32  ;;  %802 = vmatpush.msra.mxu3 %v1420_v33  ;;  %v1067_v32 = vld [vmem:[%s1976_s0 + $0x58] sm:$0xff] }
 0x24e   :  { %711 = vmatpush.msra.mxu1 %v1466_v46 }
 0x24f   :  { %783 = vmatpush.msra.mxu2 %v1428_v35  ;;  %803 = vmatpush.msra.mxu3 %v1430_v36 }
 0x250   :  { %712 = vmatpush.msra.mxu1 %v2015_v0  ;;  %v1815_v0 = vld [vmem:[#allocation3 + $0x100] sm:$0xff] }
 0x251   :  { %784 = vmatpush.msra.mxu2 %v2016_v1  ;;  %804 = vmatpush.msra.mxu3 %v2017_v2  ;;  %v1193_v1 = vld [vmem:[#allocation3 + $0xf0] sm:$0xff]  ;;  %v1194_v2 = vld [vmem:[#allocation3 + $0xf8] sm:$0xff] }
 0x252   :  { %713 = vmatpush.msra.mxu1 %v2018_v3  ;;  %v1818_v3 = vld [vmem:[#allocation3 + $0xe8] sm:$0xff] }
 0x253   :  { %785 = vmatpush.msra.mxu2 %v2019_v4  ;;  %805 = vmatpush.msra.mxu3 %v2020_v5  ;;  %v1196_v4 = vld [vmem:[#allocation3 + $0xd8] sm:$0xff]  ;;  %v1197_v5 = vld [vmem:[#allocation3 + $0xe0] sm:$0xff] }
 0x2b0   :  { %v451_v7 = vpop.f32.mrf.mxu1 }
 0x2b1   :  { %v494_v8 = vadd.f32 %v1065_v6, %v451_v7  ;;  %v1821_v6 = vld [vmem:[#allocation3 + $0xd0] sm:$0xff]  ;;  %v1199_v7 = vld [vmem:[#allocation3 + $0xc0] sm:$0xff] }
 0x2b3   :  { %v1068_v9 = vmul.f32 -1.442695, %v494_v8  ;;  %v1200_v8 = vld [vmem:[#allocation3 + $0xc8] sm:$0xff] }
 0x2b5   :  { %1127 = vpow2.f32 %v1068_v9  ;;  %v1824_v9 = vld [vmem:[#allocation3 + $0xb8] sm:$0xff] }
 0x2b6   :  { %v471_v11 = vpop.f32.mrf.mxu2 }
 0x2b7   :  { %v514_v12 = vadd.f32 %v1066_v10, %v471_v11  ;;  %v491_v25 = vpop.f32.mrf.mxu3  ;;  %v1202_v10 = vld [vmem:[#allocation3 + $0xa8] sm:$0xff]  ;;  %v1203_v11 = vld [vmem:[#allocation3 + $0xb0] sm:$0xff] }
 0x2b8   :  { %v534_v31 = vadd.f32 %v2008_v50, %v491_v25  ;;  %v1217_v25 = vld [vmem:[#allocation3 + $0x30] sm:$0xff] }
 0x2b9   :  { %v1069_v13 = vmul.f32 -1.442695, %v514_v12  ;;  %v1827_v12 = vld [vmem:[#allocation3 + $0xa0] sm:$0xff] }
 0x2bb   :  { %v1128_v14 = vpop.eup %1127  ;;  %1129 = vpow2.f32 %v1069_v13  ;;  %v1205_v13 = vld [vmem:[#allocation3 + $0x90] sm:$0xff] }
 0x2bc   :  { %v498_v15 = vadd.f32 1.0, %v1128_v14  ;;  %v1206_v14 = vld [vmem:[#allocation3 + $0x98] sm:$0xff] }
 0x2be   :  { %1131 = vrcp.f32 %v498_v15  ;;  %v510_v21 = vand.u32 2147483648, %v498_v15  ;;  %v508_v23 = vand.u32 2147483647, %v498_v15  ;;  %vm504_vm9 = vweird.f32 %v498_v15 }
 0x2c0   :  { %v511_v28 = vor.u32 1.1754944e-38, %v510_v21  ;;  %vm509_vm11 = vcmp.eq.f32.partialorder %v508_v23, 8.507059e+37  ;;  %v1836_v21 = vld [vmem:[#allocation3 + $0x58] sm:$0xff]  ;;  %v1215_v23 = vld [vmem:[#allocation3 + $0x50] sm:$0xff] }
 0x2c1   :  { %v1130_v16 = vpop.eup %1129 }
 0x2c2   :  { %v518_v17 = vadd.f32 1.0, %v1130_v16  ;;  %v1208_v16 = vld [vmem:[#allocation3 + $0x78] sm:$0xff] }
 0x2c4   :  { %v1132_v18 = vpop.eup %1131  ;;  %1133 = vrcp.f32 %v518_v17  ;;  %v530_v36 = vand.u32 2147483648, %v518_v17  ;;  %v528_v37 = vand.u32 2147483647, %v518_v17  ;;  %vm524_vm13 = vweird.f32 %v518_v17 }
 0x2c5   :  { %v500_v19 = vmul.f32 %v1132_v18, %v498_v15  ;;  %vm505_vm8 = vweird.f32 %v1132_v18  ;;  %v1830_v15 = vld [vmem:[#allocation3 + $0x88] sm:$0xff] }
 0x2c6   :  { %vm506_vm10 = vmor %vm504_vm9, %vm505_vm8  ;;  %v531_v46 = vor.u32 1.1754944e-38, %v530_v36  ;;  %vm529_vm15 = vcmp.eq.f32.partialorder %v528_v37, 8.507059e+37 }
 0x2c7   :  { %v501_v20 = vsub.f32 1.0, %v500_v19  ;;  %v1211_v19 = vld [vmem:[#allocation3 + $0x60] sm:$0xff] }
 0x2c9   :  { %v502_v22 = vmul.f32 %v1132_v18, %v501_v20  ;;  %v1212_v20 = vld [vmem:[#allocation3 + $0x68] sm:$0xff] }
 0x2ca   :  { %v1134_v24 = vpop.eup %1133 }
 0x2cb   :  { %v520_v26 = vmul.f32 %v1134_v24, %v518_v17  ;;  %v503_v27 = vadd.f32 %v1132_v18, %v502_v22  ;;  %vm525_vm12 = vweird.f32 %v1134_v24  ;;  %v1209_v17 = vld [vmem:[#allocation3 + $0x80] sm:$0xff]  ;;  %v1214_v22 = vld [vmem:[#allocation3 + $0x48] sm:$0xff] }
 0x2cc   :  { %vm526_vm14 = vmor %vm524_vm13, %vm525_vm12 }
 0x2cd   :  { %v521_v29 = vsub.f32 1.0, %v520_v26  ;;  %v507_v30 = vsel %vm506_vm10, %v1132_v18, %v503_v27  ;;  %v1833_v18 = vld [vmem:[#allocation3 + $0x70] sm:$0xff]  ;;  %v1218_v26 = vld [vmem:[#allocation3 + $0x38] sm:$0xff]  ;;  %v1842_v27 = vld [vmem:[#allocation3 + $0x28] sm:$0xff] }
 0x2ce   :  { %v512_v33 = vsel %vm509_vm11, %v511_v28, %v507_v30  ;;  %v1220_v28 = vld [vmem:[#allocation3 + $0x18] sm:$0xff]  ;;  %v1845_v30 = vld [vmem:[#allocation3 + $0x10] sm:$0xff] }
 0x2cf   :  { %v522_v34 = vmul.f32 %v1134_v24, %v521_v29  ;;  %v535_v35 = vmul.f32 %v534_v31, %v512_v33  ;;  %v1221_v29 = vld [vmem:[#allocation3 + $0x20] sm:$0xff] }
 0x2d0   :  { %v1223_v31 = vld [vmem:[#allocation3] sm:$0xff] }
 0x2d1   :  { %v536_v40 = vadd.f32 %v1067_v32, %v535_v35  ;;  %v523_v43 = vadd.f32 %v1134_v24, %v522_v34  ;;  %v1224_v32 = vld [vmem:[#allocation3 + $0x8] sm:$0xff]  ;;  %v1070_v33 = vld [vmem:[%s1976_s0 + $0x60] sm:$0xff] }
 0x2d2   :  { %v1071_v34 = vld [vmem:[%s1976_s0 + $0x68] sm:$0xff] }
 0x2d3   :  { %1135 = vtanh.f32 %v536_v40  ;;  %v527_v45 = vsel %vm526_vm14, %v1134_v24, %v523_v43  ;;  %v1839_v24 = vld [vmem:[#allocation3 + $0x40] sm:$0xff] }
 0x2d4   :  { %v532_v42 = vsel %vm529_vm15, %v531_v46, %v527_v45 }
 0x2d5   :  { %v538_v58 = vsub.f32 1.0, %v532_v42  ;;  %v540_v57 = vmul.f32 %v532_v42, %v1731_v62  ;;  %v1191_v62 = vld [vmem:[#allocation3 + $0x110] sm:$0xff] }
 0x2d9   :  { %v1136_v44 = vpop.eup %1135 }
 0x2da   :  { %v539_v52 = vmul.f32 %v1136_v44, %v538_v58 }
 0x2dc   :  { %v1795_v55 = vadd.f32 %v540_v57, %v539_v52 }
 0x2de   :  { %562 = vmatmul.f32.vlgmr.msrb.gmra.mxu0 %v1795_v55  ;;  %582 = vmatmul.f32.vlgmr.msrb.gmra.mxu1 %v1795_v55 }
 0x2df   :  { %602 = vmatmul.f32.vlgmr.msrb.gmra.mxu2 %v1795_v55  ;;  %810 = vmatpush.msrb.mxu0 %v1800_v48 }
 0x2e0   :  { %882 = vmatpush.msrb.mxu1 %v1178_v51  ;;  %902 = vmatpush.msrb.mxu2 %v1179_v61 }
 0x2e1   :  { %811 = vmatpush.msrb.mxu0 %v1803_v39 }
 0x2e2   :  { %883 = vmatpush.msrb.mxu1 %v1181_v41  ;;  %903 = vmatpush.msrb.mxu2 %v1182_v60 }
 0x2e3   :  { %812 = vmatpush.msrb.mxu0 %v1806_v47 }
 0x2e4   :  { %884 = vmatpush.msrb.mxu1 %v1184_v49  ;;  %904 = vmatpush.msrb.mxu2 %v1185_v56 }
 0x2e5   :  { %813 = vmatpush.msrb.mxu0 %v1809_v38 }
 0x2e6   :  { %885 = vmatpush.msrb.mxu1 %v1187_v63  ;;  %905 = vmatpush.msrb.mxu2 %v1188_v53 }
 0x2e7   :  { %814 = vmatpush.msrb.mxu0 %v1812_v59 }
 0x2e8   :  { %886 = vmatpush.msrb.mxu1 %v1190_v54  ;;  %906 = vmatpush.msrb.mxu2 %v1191_v62 }
 0x2e9   :  { %815 = vmatpush.msrb.mxu0 %v1815_v0 }
 0x2ea   :  { %887 = vmatpush.msrb.mxu1 %v1193_v1  ;;  %907 = vmatpush.msrb.mxu2 %v1194_v2 }
 0x2eb   :  { %816 = vmatpush.msrb.mxu0 %v1818_v3 }
 0x2ec   :  { %888 = vmatpush.msrb.mxu1 %v1196_v4  ;;  %908 = vmatpush.msrb.mxu2 %v1197_v5  ;;  %v1072_v5 = vld [vmem:[%s1976_s0 + $0x70] sm:$0xff] }
 0x2ed   :  { %817 = vmatpush.msrb.mxu0 %v1821_v6 }
 0x2ee   :  { %889 = vmatpush.msrb.mxu1 %v1199_v7  ;;  %909 = vmatpush.msrb.mxu2 %v1200_v8 }
 0x2ef   :  { %818 = vmatpush.msrb.mxu0 %v1824_v9 }
 0x2f0   :  { %890 = vmatpush.msrb.mxu1 %v1202_v10  ;;  %910 = vmatpush.msrb.mxu2 %v1203_v11 }
 0x2f1   :  { %819 = vmatpush.msrb.mxu0 %v1827_v12 }
 0x2f2   :  { %891 = vmatpush.msrb.mxu1 %v1205_v13  ;;  %911 = vmatpush.msrb.mxu2 %v1206_v14 }
 0x2f3   :  { %820 = vmatpush.msrb.mxu0 %v1830_v15 }
 0x2f4   :  { %892 = vmatpush.msrb.mxu1 %v1208_v16  ;;  %912 = vmatpush.msrb.mxu2 %v1209_v17 }
 0x2f5   :  { %821 = vmatpush.msrb.mxu0 %v1833_v18 }
 0x2f6   :  { %893 = vmatpush.msrb.mxu1 %v1211_v19  ;;  %913 = vmatpush.msrb.mxu2 %v1212_v20 }
 0x2f7   :  { %822 = vmatpush.msrb.mxu0 %v1836_v21 }
 0x2f8   :  { %894 = vmatpush.msrb.mxu1 %v1214_v22  ;;  %914 = vmatpush.msrb.mxu2 %v1215_v23 }
 0x2f9   :  { %823 = vmatpush.msrb.mxu0 %v1839_v24 }
 0x2fa   :  { %895 = vmatpush.msrb.mxu1 %v1217_v25  ;;  %915 = vmatpush.msrb.mxu2 %v1218_v26 }
 0x2fb   :  { %824 = vmatpush.msrb.mxu0 %v1842_v27 }
 0x2fc   :  { %896 = vmatpush.msrb.mxu1 %v1220_v28  ;;  %916 = vmatpush.msrb.mxu2 %v1221_v29 }
 0x2fd   :  { %825 = vmatpush.msrb.mxu0 %v1845_v30 }
 0x2fe   :  { %897 = vmatpush.msrb.mxu1 %v1223_v31  ;;  %917 = vmatpush.msrb.mxu2 %v1224_v32 }
 0x35b   :  { %v563_v35 = vpop.f32.mrf.mxu0  ;;  %v583_v36 = vpop.f32.mrf.mxu1 }
 0x35c   :  { %v606_v37 = vadd.f32 %v1070_v33, %v563_v35  ;;  %v626_v40 = vadd.f32 %v1071_v34, %v583_v36 }
 0x35e   :  { %v1073_v43 = vmul.f32 -1.442695, %v606_v37  ;;  %v1074_v45 = vmul.f32 -1.442695, %v626_v40 }
 0x360   :  { %1137 = vpow2.f32 %v1073_v43 }
 0x361   :  { %1139 = vpow2.f32 %v1074_v45  ;;  %v1077_v45 = vld [vmem:[%s1976_s0 + $0x88] sm:$0xff] }
 0x362   :  { %v603_v54 = vpop.f32.mrf.mxu2 }
 0x363   :  { %v646_v4 = vadd.f32 %v2008_v50, %v603_v54 }
 0x366   :  { %v1138_v46 = vpop.eup %1137 }
 0x367   :  { %v1140_v42 = vpop.eup %1139  ;;  %v610_v58 = vadd.f32 1.0, %v1138_v46 }
 0x368   :  { %v630_v44 = vadd.f32 1.0, %v1140_v42 }
 0x369   :  { %1141 = vrcp.f32 %v610_v58  ;;  %v622_v49 = vand.u32 2147483648, %v610_v58  ;;  %v620_v63 = vand.u32 2147483647, %v610_v58  ;;  %vm616_vm1 = vweird.f32 %v610_v58 }
 0x36a   :  { %1143 = vrcp.f32 %v630_v44  ;;  %v642_v11 = vand.u32 2147483648, %v630_v44  ;;  %vm636_vm5 = vweird.f32 %v630_v44  ;;  %v640_v13 = vand.u32 2147483647, %v630_v44 }
 0x36b   :  { %v623_v1 = vor.u32 1.1754944e-38, %v622_v49  ;;  %vm621_vm3 = vcmp.eq.f32.partialorder %v620_v63, 8.507059e+37  ;;  %v1080_v63 = vld [vmem:[%s1976_s0 + $0x90] sm:$0xff] }
 0x36c   :  { %v643_v17 = vor.u32 1.1754944e-38, %v642_v11  ;;  %vm641_vm7 = vcmp.eq.f32.partialorder %v640_v13, 8.507059e+37 }
 0x36f   :  { %v1142_v52 = vpop.eup %1141 }
 0x370   :  { %v1144_v57 = vpop.eup %1143  ;;  %v612_v51 = vmul.f32 %v1142_v52, %v610_v58  ;;  %vm617_vm0 = vweird.f32 %v1142_v52 }
 0x371   :  { %v632_v61 = vmul.f32 %v1144_v57, %v630_v44  ;;  %vm618_vm2 = vmor %vm616_vm1, %vm617_vm0  ;;  %vm637_vm4 = vweird.f32 %v1144_v57 }
 0x372   :  { %v613_v41 = vsub.f32 1.0, %v612_v51  ;;  %vm638_vm6 = vmor %vm636_vm5, %vm637_vm4 }
 0x373   :  { %v633_v60 = vsub.f32 1.0, %v632_v61 }
 0x374   :  { %v614_v56 = vmul.f32 %v1142_v52, %v613_v41 }
 0x375   :  { %v634_v53 = vmul.f32 %v1144_v57, %v633_v60 }
 0x376   :  { %v615_v62 = vadd.f32 %v1142_v52, %v614_v56 }
 0x377   :  { %v635_v8 = vadd.f32 %v1144_v57, %v634_v53  ;;  %v1081_v53 = vld [vmem:[%s1976_s0 + $0x98] sm:$0xff] }
 0x378   :  { %v619_v2 = vsel %vm618_vm2, %v1142_v52, %v615_v62 }
 0x379   :  { %v624_v7 = vsel %vm621_vm3, %v623_v1, %v619_v2  ;;  %v639_v16 = vsel %vm638_vm6, %v1144_v57, %v635_v8 }
 0x37a   :  { %v647_v10 = vmul.f32 %v646_v4, %v624_v7  ;;  %v644_v19 = vsel %vm641_vm7, %v643_v17, %v639_v16 }
 0x37b   :  { %v650_v20 = vsub.f32 1.0, %v644_v19  ;;  %v652_v25 = vmul.f32 %v644_v19, %v1795_v55  ;;  %v1076_v55 = vld [vmem:[%s1976_s0 + $0x80] sm:$0xff] }
 0x37c   :  { %v648_v14 = vadd.f32 %v1072_v5, %v647_v10 }
 0x37e   :  { %1145 = vtanh.f32 %v648_v14 }
 0x384   :  { %v1146_v22 = vpop.eup %1145 }
 0x385   :  { %v651_v23 = vmul.f32 %v1146_v22, %v650_v20 }
 0x387   :  { %v1859_v26 = vadd.f32 %v652_v25, %v651_v23 }
 0x389   :  { %674 = vmatmul.f32.vlgmr.msrb.gmra.mxu3 %v1859_v26  ;;  %694 = vmatmul.f32.vlgmr.msra.gmra.mxu0 %v1859_v26 }
 0x38a   :  { %714 = vmatmul.f32.vlgmr.msra.gmra.mxu1 %v1859_v26  ;;  %922 = vmatpush.msrb.mxu3 %v1800_v48 }
 0x38c   :  { %923 = vmatpush.msrb.mxu3 %v1803_v39 }
 0x38e   :  { %924 = vmatpush.msrb.mxu3 %v1806_v47 }
 0x390   :  { %925 = vmatpush.msrb.mxu3 %v1809_v38  ;;  %v1075_v38 = vld [vmem:[%s1976_s0 + $0x78] sm:$0xff] }
 0x392   :  { %926 = vmatpush.msrb.mxu3 %v1812_v59 }
 0x394   :  { %927 = vmatpush.msrb.mxu3 %v1815_v0 }
 0x396   :  { %928 = vmatpush.msrb.mxu3 %v1818_v3 }
 0x398   :  { %929 = vmatpush.msrb.mxu3 %v1821_v6 }
 0x39a   :  { %930 = vmatpush.msrb.mxu3 %v1824_v9 }
 0x39c   :  { %931 = vmatpush.msrb.mxu3 %v1827_v12 }
 0x39e   :  { %932 = vmatpush.msrb.mxu3 %v1830_v15 }
 0x3a0   :  { %933 = vmatpush.msrb.mxu3 %v1833_v18 }
 0x3a2   :  { %934 = vmatpush.msrb.mxu3 %v1836_v21 }
 0x3a4   :  { %935 = vmatpush.msrb.mxu3 %v1839_v24 }
 0x3a6   :  { %936 = vmatpush.msrb.mxu3 %v1842_v27 }
 0x3a8   :  { %937 = vmatpush.msrb.mxu3 %v1845_v30 }
 0x406   :  { %v695_v48 = vpop.f32.mrf.mxu0 }
 0x407   :  { %v738_v39 = vadd.f32 %v1076_v55, %v695_v48  ;;  %v715_v34 = vpop.f32.mrf.mxu1 }
 0x408   :  { %v758_v37 = vadd.f32 %v2008_v50, %v715_v34  ;;  %v1008_v34 = vld [vmem:[%s1979_s3 + $0x70] sm:$0xff] }
 0x409   :  { %v1079_v47 = vmul.f32 -1.442695, %v738_v39 }
 0x40b   :  { %1147 = vpow2.f32 %v1079_v47  ;;  %v1900_v47 = vld [vmem:[%s1978_s2] ss:$0 sm:$0xff] }
 0x40c   :  { %v675_v59 = vpop.f32.mrf.mxu3 }
 0x40d   :  { %v718_v0 = vadd.f32 %v1075_v38, %v675_v59 }
 0x40f   :  { %v1078_v3 = vmul.f32 -1.442695, %v718_v0 }
 0x411   :  { %v1148_v6 = vpop.eup %1147  ;;  %1149 = vpow2.f32 %v1078_v3  ;;  %v1082_v3 = vld [vmem:[%s1976_s0 + $0xa0] sm:$0xff] }
 0x412   :  { %v742_v9 = vadd.f32 1.0, %v1148_v6 }
 0x414   :  { %1151 = vrcp.f32 %v742_v9  ;;  %v754_v42 = vand.u32 2147483648, %v742_v9  ;;  %vm748_vm13 = vweird.f32 %v742_v9  ;;  %v752_v44 = vand.u32 2147483647, %v742_v9 }
 0x416   :  { %v755_v51 = vor.u32 1.1754944e-38, %v754_v42  ;;  %vm753_vm15 = vcmp.eq.f32.partialorder %v752_v44, 8.507059e+37  ;;  %v1001_v42 = vld [vmem:[%s1979_s3 + $0x38] sm:$0xff] }
 0x417   :  { %v1150_v12 = vpop.eup %1149 }
 0x418   :  { %v722_v15 = vadd.f32 1.0, %v1150_v12 }
 0x41a   :  { %1153 = vrcp.f32 %v722_v15  ;;  %v1152_v18 = vpop.eup %1151  ;;  %v734_v30 = vand.u32 2147483648, %v722_v15  ;;  %v732_v32 = vand.u32 2147483647, %v722_v15  ;;  %vm728_vm9 = vweird.f32 %v722_v15 }
 0x41b   :  { %v744_v21 = vmul.f32 %v1152_v18, %v742_v9  ;;  %vm749_vm12 = vweird.f32 %v1152_v18 }
 0x41c   :  { %v735_v36 = vor.u32 1.1754944e-38, %v734_v30  ;;  %vm733_vm11 = vcmp.eq.f32.partialorder %v732_v32, 8.507059e+37  ;;  %vm750_vm14 = vmor %vm748_vm13, %vm749_vm12 }
 0x41d   :  { %v745_v28 = vsub.f32 1.0, %v744_v21 }
 0x41f   :  { %v746_v33 = vmul.f32 %v1152_v18, %v745_v28 }
 0x420   :  { %v1154_v24 = vpop.eup %1153 }
 0x421   :  { %v724_v27 = vmul.f32 %v1154_v24, %v722_v15  ;;  %vm729_vm8 = vweird.f32 %v1154_v24  ;;  %v747_v46 = vadd.f32 %v1152_v18, %v746_v33  ;;  %v1009_v33 = vld [vmem:[%s1979_s3 + $0x78] sm:$0xff] }
 0x422   :  { %vm730_vm10 = vmor %vm728_vm9, %vm729_vm8  ;;  %1014 = vmatpush.msra.mxu0 %v1009_v33 }
 0x423   :  { %v725_v29 = vsub.f32 1.0, %v724_v27  ;;  %v751_v57 = vsel %vm750_vm14, %v1152_v18, %v747_v46  ;;  %v1085_v46 = vld [vmem:[%s1976_s0 + $0xa8] sm:$0xff] }
 0x424   :  { %v756_v50 = vsel %vm753_vm15, %v755_v51, %v751_v57  ;;  %1015 = vmatpush.msra.mxu0 %v1008_v34  ;;  %v999_v51 = vld [vmem:[%s1979_s3 + $0x28] sm:$0xff] }
 0x425   :  { %v726_v31 = vmul.f32 %v1154_v24, %v725_v29  ;;  %v762_v61 = vsub.f32 1.0, %v756_v50  ;;  %v764_v49 = vmul.f32 %v756_v50, %v1859_v26  ;;  %v998_v50 = vld [vmem:[%s1979_s3 + $0x20] sm:$0xff] }
 0x427   :  { %v727_v35 = vadd.f32 %v1154_v24, %v726_v31 }
 0x429   :  { %v731_v40 = vsel %vm730_vm10, %v1154_v24, %v727_v35  ;;  %v1007_v35 = vld [vmem:[%s1979_s3 + $0x68] sm:$0xff] }
 0x42a   :  { %v736_v43 = vsel %vm733_vm11, %v735_v36, %v731_v40  ;;  %1016 = vmatpush.msra.mxu0 %v1007_v35  ;;  %v1006_v36 = vld [vmem:[%s1979_s3 + $0x60] sm:$0xff]  ;;  %v1004_v40 = vld [vmem:[%s1979_s3 + $0x50] sm:$0xff] }
 0x42b   :  { %v759_v58 = vmul.f32 %v758_v37, %v736_v43  ;;  %v1005_v37 = vld [vmem:[%s1979_s3 + $0x58] sm:$0xff]  ;;  %v1003_v43 = vld [vmem:[%s1979_s3 + $0x48] sm:$0xff] }
 0x42c   :  { %1017 = vmatpush.msra.mxu0 %v1006_v36 }
 0x42d   :  { %v760_v52 = vadd.f32 %v1077_v45, %v759_v58  ;;  %v1002_v45 = vld [vmem:[%s1979_s3 + $0x40] sm:$0xff] }
 0x42e   :  { %1018 = vmatpush.msra.mxu0 %v1005_v37 }
 0x42f   :  { %1155 = vtanh.f32 %v760_v52  ;;  %v1000_v52 = vld [vmem:[%s1979_s3 + $0x30] sm:$0xff] }
 0x430   :  { %1019 = vmatpush.msra.mxu0 %v1004_v40 }
 0x432   :  { %1020 = vmatpush.msra.mxu0 %v1003_v43 }
 0x434   :  { %1021 = vmatpush.msra.mxu0 %v1002_v45 }
 0x435   :  { %v1156_v41 = vpop.eup %1155 }
 0x436   :  { %v763_v60 = vmul.f32 %v1156_v41, %v762_v61  ;;  %1022 = vmatpush.msra.mxu0 %v1001_v42  ;;  %v1086_v61 = vld [vmem:[%s1976_s0 + $0xb0] sm:$0xff]  ;;  %v997_v41 = vld [vmem:[%s1979_s3 + $0x18] sm:$0xff] }
 0x438   :  { %v765_v56 = vadd.f32 %v764_v49, %v763_v60  ;;  %1023 = vmatpush.msra.mxu0 %v1000_v52 }
 0x43a   :  { %786 = vmatmul.f32.vlgmr.msra.gmra.mxu2 %v765_v56  ;;  %806 = vmatmul.f32.vlgmr.msra.gmra.mxu3 %v765_v56 }
 0x43b   :  { %826 = vmatmul.f32.vlgmr.msrb.gmra.mxu0 %v765_v56 }
 0x43c   :  { %1024 = vmatpush.msra.mxu0 %v999_v51 }
 0x43e   :  { %1025 = vmatpush.msra.mxu0 %v998_v50 }
 0x440   :  { %1026 = vmatpush.msra.mxu0 %v997_v41 }
 0x4b8   :  { %v827_v26 = vpop.f32.mrf.mxu0 }
 0x4b9   :  { %v870_v38 = vadd.f32 %v1900_v47, %v827_v26  ;;  %v1087_v26 = vld [vmem:[%s1976_s0 + $0xb8] sm:$0xff] }
 0x4bd   :  { %v787_v54 = vpop.f32.mrf.mxu2  ;;  %v807_v62 = vpop.f32.mrf.mxu3 }
 0x4be   :  { %v830_v1 = vadd.f32 %v1080_v63, %v787_v54  ;;  %v850_v2 = vadd.f32 %v1081_v53, %v807_v62  ;;  %v995_v53 = vld [vmem:[%s1979_s3 + $0x8] sm:$0xff]  ;;  %v994_v62 = vld [vmem:[%s1979_s3] sm:$0xff] }
 0x4c0   :  { %v1083_v4 = vmul.f32 -1.442695, %v830_v1  ;;  %v1084_v5 = vmul.f32 -1.442695, %v850_v2 }
 0x4c2   :  { %1157 = vpow2.f32 %v1083_v4 }
 0x4c3   :  { %1159 = vpow2.f32 %v1084_v5 }
 0x4c8   :  { %v1158_v7 = vpop.eup %1157 }
 0x4c9   :  { %v1160_v8 = vpop.eup %1159  ;;  %v834_v10 = vadd.f32 1.0, %v1158_v7 }
 0x4ca   :  { %v854_v11 = vadd.f32 1.0, %v1160_v8 }
 0x4cb   :  { %1161 = vrcp.f32 %v834_v10  ;;  %v846_v20 = vand.u32 2147483648, %v834_v10  ;;  %v844_v25 = vand.u32 2147483647, %v834_v10  ;;  %vm840_vm1 = vweird.f32 %v834_v10 }
 0x4cc   :  { %1163 = vrcp.f32 %v854_v11  ;;  %v866_v9 = vand.u32 2147483648, %v854_v11  ;;  %vm860_vm5 = vweird.f32 %v854_v11  ;;  %v864_v15 = vand.u32 2147483647, %v854_v11 }
 0x4cd   :  { %v847_v39 = vor.u32 1.1754944e-38, %v846_v20  ;;  %vm845_vm3 = vcmp.eq.f32.partialorder %v844_v25, 8.507059e+37 }
 0x4ce   :  { %v867_v24 = vor.u32 1.1754944e-38, %v866_v9  ;;  %vm865_vm7 = vcmp.eq.f32.partialorder %v864_v15, 8.507059e+37 }
 0x4d1   :  { %v1162_v13 = vpop.eup %1161 }
 0x4d2   :  { %v1164_v14 = vpop.eup %1163  ;;  %v836_v16 = vmul.f32 %v1162_v13, %v834_v10  ;;  %vm841_vm0 = vweird.f32 %v1162_v13 }
 0x4d3   :  { %v856_v17 = vmul.f32 %v1164_v14, %v854_v11  ;;  %vm842_vm2 = vmor %vm840_vm1, %vm841_vm0  ;;  %vm861_vm4 = vweird.f32 %v1164_v14  ;;  %vm1034_vm0 = vcmask 39936  }
 0x4d4   :  { %v837_v19 = vsub.f32 1.0, %v836_v16  ;;  %vm862_vm6 = vmor %vm860_vm5, %vm861_vm4 }
 0x4d5   :  { %v857_v22 = vsub.f32 1.0, %v856_v17 }
 0x4d6   :  { %v838_v23 = vmul.f32 %v1162_v13, %v837_v19 }
 0x4d7   :  { %v858_v55 = vmul.f32 %v1164_v14, %v857_v22 }
 0x4d8   :  { %v839_v48 = vadd.f32 %v1162_v13, %v838_v23 }
 0x4d9   :  { %v859_v6 = vadd.f32 %v1164_v14, %v858_v55 }
 0x4da   :  { %v843_v59 = vsel %vm842_vm2, %v1162_v13, %v839_v48 }
 0x4db   :  { %v848_v0 = vsel %vm845_vm3, %v847_v39, %v843_v59  ;;  %v863_v21 = vsel %vm862_vm6, %v1164_v14, %v859_v6 }
 0x4dc   :  { %v871_v12 = vmul.f32 %v870_v38, %v848_v0  ;;  %v868_v27 = vsel %vm865_vm7, %v867_v24, %v863_v21 }
 0x4dd   :  { %v874_v28 = vsub.f32 1.0, %v868_v27  ;;  %v876_v31 = vmul.f32 %v868_v27, %v765_v56  ;;  %v996_v56 = vld [vmem:[%s1979_s3 + $0x10] sm:$0xff]  ;;  %v1096_v27 = vld [vmem:[%s1980_s4] ss:$0 sm:$0xff] }
 0x4de   :  { %v872_v18 = vadd.f32 %v1082_v3, %v871_v12  ;;  %1027 = vmatpush.msra.mxu0 %v996_v56 }
 0x4e0   :  { %1165 = vtanh.f32 %v872_v18  ;;  %1028 = vmatpush.msra.mxu0 %v995_v53 }
 0x4e2   :  { %1029 = vmatpush.msra.mxu0 %v994_v62 }
 0x4e6   :  { %v1166_v29 = vpop.eup %1165 }
 0x4e7   :  { %v875_v30 = vmul.f32 %v1166_v29, %v874_v28 }
 0x4e9   :  { %v1906_v32 = vadd.f32 %v876_v31, %v875_v30 }
 0x4eb   :  { %898 = vmatmul.f32.vlgmr.msrb.gmra.mxu1 %v1906_v32  ;;  %918 = vmatmul.f32.vlgmr.msrb.gmra.mxu2 %v1906_v32 }
 0x4ec   :  { %938 = vmatmul.f32.vlgmr.msrb.gmra.mxu3 %v1906_v32 }
 0x568   :  { %v899_v58 = vpop.f32.mrf.mxu1 }
 0x569   :  { %v942_v44 = vadd.f32 %v1085_v46, %v899_v58 }
 0x56b   :  { %v1088_v57 = vmul.f32 -1.442695, %v942_v44 }
 0x56d   :  { %1167 = vpow2.f32 %v1088_v57 }
 0x56e   :  { %v919_v60 = vpop.f32.mrf.mxu2 }
 0x56f   :  { %v962_v49 = vadd.f32 %v1086_v61, %v919_v60  ;;  %v939_v16 = vpop.f32.mrf.mxu3 }
 0x570   :  { %v982_v25 = vadd.f32 %v1900_v47, %v939_v16 }
 0x571   :  { %v1089_v63 = vmul.f32 -1.442695, %v962_v49 }
 0x573   :  { %v1168_v54 = vpop.eup %1167  ;;  %1169 = vpow2.f32 %v1089_v63 }
 0x574   :  { %v946_v1 = vadd.f32 1.0, %v1168_v54 }
 0x576   :  { %1171 = vrcp.f32 %v946_v1  ;;  %v958_v10 = vand.u32 2147483648, %v946_v1  ;;  %v956_v13 = vand.u32 2147483647, %v946_v1  ;;  %vm952_vm9 = vweird.f32 %v946_v1 }
 0x578   :  { %v959_v20 = vor.u32 1.1754944e-38, %v958_v10  ;;  %vm957_vm11 = vcmp.eq.f32.partialorder %v956_v13, 8.507059e+37 }
 0x579   :  { %v1170_v2 = vpop.eup %1169 }
 0x57a   :  { %v966_v4 = vadd.f32 1.0, %v1170_v2 }
 0x57c   :  { %v1172_v5 = vpop.eup %1171  ;;  %1173 = vrcp.f32 %v966_v4  ;;  %v978_v38 = vand.u32 2147483648, %v966_v4  ;;  %v976_v59 = vand.u32 2147483647, %v966_v4  ;;  %vm972_vm13 = vweird.f32 %v966_v4 }
 0x57d   :  { %v948_v7 = vmul.f32 %v1172_v5, %v946_v1  ;;  %vm953_vm8 = vweird.f32 %v1172_v5 }
 0x57e   :  { %vm954_vm10 = vmor %vm952_vm9, %vm953_vm8  ;;  %v979_v9 = vor.u32 1.1754944e-38, %v978_v38  ;;  %vm977_vm15 = vcmp.eq.f32.partialorder %v976_v59, 8.507059e+37 }
 0x57f   :  { %v949_v8 = vsub.f32 1.0, %v948_v7 }
 0x581   :  { %v950_v11 = vmul.f32 %v1172_v5, %v949_v8 }
 0x582   :  { %v1174_v14 = vpop.eup %1173 }
 0x583   :  { %v968_v17 = vmul.f32 %v1174_v14, %v966_v4  ;;  %v951_v19 = vadd.f32 %v1172_v5, %v950_v11  ;;  %vm973_vm12 = vweird.f32 %v1174_v14 }
 0x584   :  { %vm974_vm14 = vmor %vm972_vm13, %vm973_vm12 }
 0x585   :  { %v969_v22 = vsub.f32 1.0, %v968_v17  ;;  %v955_v23 = vsel %vm954_vm10, %v1172_v5, %v951_v19 }
 0x586   :  { %v960_v55 = vsel %vm957_vm11, %v959_v20, %v955_v23 }
 0x587   :  { %v970_v48 = vmul.f32 %v1174_v14, %v969_v22  ;;  %v983_v39 = vmul.f32 %v982_v25, %v960_v55 }
 0x589   :  { %v984_v0 = vadd.f32 %v1087_v26, %v983_v39  ;;  %v971_v3 = vadd.f32 %v1174_v14, %v970_v48 }
 0x58b   :  { %1175 = vtanh.f32 %v984_v0  ;;  %v975_v6 = vsel %vm974_vm14, %v1174_v14, %v971_v3 }
 0x58c   :  { %v980_v12 = vsel %vm977_vm15, %v979_v9, %v975_v6 }
 0x58d   :  { %v986_v47 = vsub.f32 1.0, %v980_v12  ;;  %v988_v21 = vmul.f32 %v980_v12, %v1906_v32 }
 0x591   :  { %v1176_v15 = vpop.eup %1175 }
 0x592   :  { %v987_v18 = vmul.f32 %v1176_v15, %v986_v47 }
 0x594   :  { %v989_v24 = vadd.f32 %v988_v21, %v987_v18 }
 0x596   :  { %1030 = vmatmul.f32.vlgmr.msra.gmra.mxu0 %v989_v24 }
 0x613   :  { %v1031_v28 = vpop.f32.mrf.mxu0 }
 0x614   :  { %v1032_v29 = vadd.f32 %v1096_v27, %v1031_v28 }
 0x616   :  { %1035 = vst.msk [vmem:[#allocation6] sm:$0xff] %vm1034_vm0, %v1032_v29 }
 0x617   :  { %1046 = dma.vmem_to_hbm [thread:$0]  %s1042_s29, 128, %s1044_s7, [#allocation5]  }
 0x618   :  { %1276 = dma.done.wait [#allocation5], 128  }
 0x619   :  { %1277 = vsyncadd [#allocation5], 4294967168 }
 0x61a   :  { %1051 = vsyncpa [#allocation4], 1 }
 0x61b   :  { %1052 = vsyncpa [#allocation5], 1 }

</bundles_post_ra>
